<compile_context>
chip_gen: v7x
topology: tpu7x:2x2x1
jax: 0.10.0
libtpu: 0.0.40
codegen_flags: <defaults>
</compile_context>

<pallas_src>
import math
import functools

import jax
import jax.numpy as jnp
from jax.experimental import pallas as pl
from jax.experimental.pallas import tpu as pltpu


# ----------------------------- kernel ----------------------------------------


def _layer_norm(x, gamma, beta, eps=1e-5):
    # PyTorch LayerNorm: biased variance over last dim, eps inside rsqrt.
    mu = jnp.mean(x, axis=-1, keepdims=True)
    var = jnp.mean((x - mu) ** 2, axis=-1, keepdims=True)
    return (x - mu) * jax.lax.rsqrt(var + eps) * gamma + beta


def fused_transformer_kernel(num_heads, num_layers,
                             x_ref,
                             wq_ref, bq_ref, wk_ref, bk_ref, wv_ref, bv_ref,
                             wo_ref, bo_ref,
                             g1_ref, be1_ref,
                             w1_ref, b1_ref, w2_ref, b2_ref,
                             g2_ref, be2_ref,
                             wfc_ref, bfc_ref,
                             o_ref):
    """Both post-norm encoder layers + Linear head for one batch element."""
    x = x_ref[0].astype(jnp.float32)          # (L, D)
    L, D = x.shape
    H = num_heads
    hd = D // H
    scale = 1.0 / math.sqrt(hd)

    for li in range(num_layers):              # static unroll over layers
        # ---- multi-head self-attention: head axis as leading batch dim ----
        xb = jnp.broadcast_to(x.astype(jnp.bfloat16), (H, L, D))
        q = jnp.einsum('hld,hde->hle', xb, wq_ref[li],
                       preferred_element_type=jnp.float32) + bq_ref[li]
        k = jnp.einsum('hld,hde->hle', xb, wk_ref[li],
                       preferred_element_type=jnp.float32) + bk_ref[li]
        v = jnp.einsum('hld,hde->hle', xb, wv_ref[li],
                       preferred_element_type=jnp.float32) + bv_ref[li]

        s = jnp.einsum('hqe,hke->hqk', q.astype(jnp.bfloat16),
                       k.astype(jnp.bfloat16),
                       preferred_element_type=jnp.float32) * scale   # (H, L, L)
        s = s - jnp.max(s, axis=-1, keepdims=True)
        p = jnp.exp(s)
        p = p / jnp.sum(p, axis=-1, keepdims=True)

        ctx = jnp.einsum('hqk,hke->hqe', p.astype(jnp.bfloat16),
                         v.astype(jnp.bfloat16),
                         preferred_element_type=jnp.float32)         # (H, L, hd)
        attn = jnp.einsum('hle,hed->hld', ctx.astype(jnp.bfloat16),
                          wo_ref[li],
                          preferred_element_type=jnp.float32)        # (H, L, D)
        attn = jnp.sum(attn, axis=0) + bo_ref[li]                    # (L, D)

        x = _layer_norm(x + attn, g1_ref[li], be1_ref[li])

        # ---- feed-forward (Linear -> ReLU -> Linear), bf16 MXU, f32 accum ----
        h1 = jnp.dot(x.astype(jnp.bfloat16), w1_ref[li],
                     preferred_element_type=jnp.float32) + b1_ref[li]
        h1 = jnp.maximum(h1, 0.0)
        ff = jnp.dot(h1.astype(jnp.bfloat16), w2_ref[li],
                     preferred_element_type=jnp.float32) + b2_ref[li]

        x = _layer_norm(x + ff, g2_ref[li], be2_ref[li])

    # ---- classifier head on the resident last-layer activations ----
    # out[c] = sum_{l,d} x[l, d] * wfc[l, d, c]; wfc is pre-arranged so this matches
    # PyTorch's permute(1,2,0).reshape flatten order. The static L-row loop avoids an
    # in-kernel (L, D) -> (1, L*D) lane relayout.
    acc = bfc_ref[...].astype(jnp.float32)                           # (1, C)
    for l in range(L):
        acc = acc + jnp.dot(x[l:l + 1, :], wfc_ref[l],
                            preferred_element_type=jnp.float32)
    o_ref[0] = acc.astype(o_ref.dtype)


# ----------------------------- wrapper ----------------------------------------


def _resident_spec(a):
    nd = a.ndim
    return pl.BlockSpec(a.shape, lambda b, _nd=nd: (0,) * _nd)


_WEIGHT_NAMES = ('wq', 'bq', 'wk', 'bk', 'wv', 'bv', 'wo', 'bo',
                 'g1', 'be1', 'w1', 'b1', 'w2', 'b2', 'g2', 'be2',
                 'wfc', 'bfc')


def transformer_classifier(x, params, num_heads=2):
    """Forward pass matching TransformerClassifier.forward (eval mode).

    x: (B, D, L)   (batch, input_dim, input_length)
    returns: (B, num_classes)
    """
    B, D, L = x.shape
    num_layers = params['wq'].shape[0]
    C = params['bfc'].shape[-1]

    h = jnp.transpose(x, (0, 2, 1))            # (B, L, D) — single tiny XLA op
    weights = [params[n] for n in _WEIGHT_NAMES]

    out = pl.pallas_call(
        functools.partial(fused_transformer_kernel, num_heads, num_layers),
        out_shape=jax.ShapeDtypeStruct((B, 1, C), jnp.float32),
        grid=(B,),
        in_specs=[pl.BlockSpec((1, L, D), lambda b: (b, 0, 0))]
                 + [_resident_spec(w) for w in weights],
        out_specs=pl.BlockSpec((1, 1, C), lambda b: (b, 0, 0)),
        compiler_params=pltpu.CompilerParams(dimension_semantics=("parallel",)),
    )(h, *weights)
    return out.reshape(B, C)


# ----------------------------- parameter init ----------------------------------


def init_params(key, input_length, input_dim, num_classes,
                num_heads=2, num_layers=2, dim_feedforward=2048):
    L, D, F, H = input_length, input_dim, dim_feedforward, num_heads
    hd = D // H
    ks = jax.random.split(key, 7)

    def nrm(k, shape, dtype=jnp.float32):
        return (0.05 * jax.random.normal(k, shape, jnp.float32)).astype(dtype)

    # Attention / FFN weights stored per layer (leading axis), per head (2nd axis for
    # attention) in (in, out) layout, bf16 for the MXU. Equivalent to
    # nn.MultiheadAttention's packed in_proj / out_proj up to a fixed re-packing of
    # these synthetic weights (loading a real state_dict would require transposes).
    return dict(
        wq=nrm(ks[0], (num_layers, H, D, hd), jnp.bfloat16),
        wk=nrm(ks[1], (num_layers, H, D, hd), jnp.bfloat16),
        wv=nrm(ks[2], (num_layers, H, D, hd), jnp.bfloat16),
        bq=jnp.zeros((num_layers, H, 1, hd), jnp.float32),
        bk=jnp.zeros((num_layers, H, 1, hd), jnp.float32),
        bv=jnp.zeros((num_layers, H, 1, hd), jnp.float32),
        wo=nrm(ks[3], (num_layers, H, hd, D), jnp.bfloat16),
        bo=jnp.zeros((num_layers, 1, D), jnp.float32),
        g1=jnp.ones((num_layers, 1, D), jnp.float32),
        be1=jnp.zeros((num_layers, 1, D), jnp.float32),
        w1=nrm(ks[4], (num_layers, D, F), jnp.bfloat16),
        b1=jnp.zeros((num_layers, 1, F), jnp.float32),
        w2=nrm(ks[5], (num_layers, F, D), jnp.bfloat16),
        b2=jnp.zeros((num_layers, 1, D), jnp.float32),
        g2=jnp.ones((num_layers, 1, D), jnp.float32),
        be2=jnp.zeros((num_layers, 1, D), jnp.float32),
        # classifier head: wfc[l, d, c] corresponds to fc.weight[c, d*L + l] under
        # PyTorch's permute(1,2,0).reshape flatten order.
        wfc=nrm(ks[6], (L, D, num_classes), jnp.float32),
        bfc=jnp.zeros((1, num_classes), jnp.float32),
    )


# ----------------------------- main ---------------------------------------------


if __name__ == "__main__":
    B = 2           # batch
    D = 32          # input_dim == d_model (divisible by num_heads=2)
    L = 8           # input_length == sequence length
    C = 5           # num_classes

    key = jax.random.PRNGKey(0)
    x = jax.random.normal(jax.random.fold_in(key, 123), (B, D, L), jnp.float32)
    params = init_params(jax.random.fold_in(key, 7), L, D, C, num_heads=2, num_layers=2)

    out = transformer_classifier(x, params, num_heads=2)
    out = jax.block_until_ready(out)

    assert out.shape == (B, C), out.shape
    assert bool(jnp.all(jnp.isfinite(out)))
    print("KERNEL_OK")
</pallas_src>

<mosaic_0001>
module attributes {stable_mosaic.version = 11 : i64} {
  func.func @fused_transformer_kernel(%arg0: i32, %arg1: memref<1x8x32xf32, #tpu.memory_space<vmem>>, %arg2: memref<2x2x32x16xbf16, #tpu.memory_space<vmem>>, %arg3: memref<2x2x1x16xf32, #tpu.memory_space<vmem>>, %arg4: memref<2x2x32x16xbf16, #tpu.memory_space<vmem>>, %arg5: memref<2x2x1x16xf32, #tpu.memory_space<vmem>>, %arg6: memref<2x2x32x16xbf16, #tpu.memory_space<vmem>>, %arg7: memref<2x2x1x16xf32, #tpu.memory_space<vmem>>, %arg8: memref<2x2x16x32xbf16, #tpu.memory_space<vmem>>, %arg9: memref<2x1x32xf32, #tpu.memory_space<vmem>>, %arg10: memref<2x1x32xf32, #tpu.memory_space<vmem>>, %arg11: memref<2x1x32xf32, #tpu.memory_space<vmem>>, %arg12: memref<2x32x2048xbf16, #tpu.memory_space<vmem>>, %arg13: memref<2x1x2048xf32, #tpu.memory_space<vmem>>, %arg14: memref<2x2048x32xbf16, #tpu.memory_space<vmem>>, %arg15: memref<2x1x32xf32, #tpu.memory_space<vmem>>, %arg16: memref<2x1x32xf32, #tpu.memory_space<vmem>>, %arg17: memref<2x1x32xf32, #tpu.memory_space<vmem>>, %arg18: memref<8x32x5xf32, #tpu.memory_space<vmem>>, %arg19: memref<1x5xf32, #tpu.memory_space<vmem>>, %arg20: memref<1x1x5xf32, #tpu.memory_space<vmem>>) attributes {dimension_semantics = [#tpu.dimension_semantics<parallel>], iteration_bounds = array<i64: 2>, scalar_prefetch = 0 : i64, scratch_operands = 0 : i64, tpu.core_type = #tpu.core_type<tc>, window_params = [{transform_indices = @transform_0, window_bounds = array<i64: 1, 8, 32>}, {pipeline_mode = #tpu.pipeline_mode<synchronous>, transform_indices = @transform_1, window_bounds = array<i64: 2, 2, 32, 16>}, {pipeline_mode = #tpu.pipeline_mode<synchronous>, transform_indices = @transform_2, window_bounds = array<i64: 2, 2, 1, 16>}, {pipeline_mode = #tpu.pipeline_mode<synchronous>, transform_indices = @transform_3, window_bounds = array<i64: 2, 2, 32, 16>}, {pipeline_mode = #tpu.pipeline_mode<synchronous>, transform_indices = @transform_4, window_bounds = array<i64: 2, 2, 1, 16>}, {pipeline_mode = #tpu.pipeline_mode<synchronous>, transform_indices = @transform_5, window_bounds = array<i64: 2, 2, 32, 16>}, {pipeline_mode = #tpu.pipeline_mode<synchronous>, transform_indices = @transform_6, window_bounds = array<i64: 2, 2, 1, 16>}, {pipeline_mode = #tpu.pipeline_mode<synchronous>, transform_indices = @transform_7, window_bounds = array<i64: 2, 2, 16, 32>}, {pipeline_mode = #tpu.pipeline_mode<synchronous>, transform_indices = @transform_8, window_bounds = array<i64: 2, 1, 32>}, {pipeline_mode = #tpu.pipeline_mode<synchronous>, transform_indices = @transform_9, window_bounds = array<i64: 2, 1, 32>}, {pipeline_mode = #tpu.pipeline_mode<synchronous>, transform_indices = @transform_10, window_bounds = array<i64: 2, 1, 32>}, {pipeline_mode = #tpu.pipeline_mode<synchronous>, transform_indices = @transform_11, window_bounds = array<i64: 2, 32, 2048>}, {pipeline_mode = #tpu.pipeline_mode<synchronous>, transform_indices = @transform_12, window_bounds = array<i64: 2, 1, 2048>}, {pipeline_mode = #tpu.pipeline_mode<synchronous>, transform_indices = @transform_13, window_bounds = array<i64: 2, 2048, 32>}, {pipeline_mode = #tpu.pipeline_mode<synchronous>, transform_indices = @transform_14, window_bounds = array<i64: 2, 1, 32>}, {pipeline_mode = #tpu.pipeline_mode<synchronous>, transform_indices = @transform_15, window_bounds = array<i64: 2, 1, 32>}, {pipeline_mode = #tpu.pipeline_mode<synchronous>, transform_indices = @transform_16, window_bounds = array<i64: 2, 1, 32>}, {pipeline_mode = #tpu.pipeline_mode<synchronous>, transform_indices = @transform_17, window_bounds = array<i64: 8, 32, 5>}, {pipeline_mode = #tpu.pipeline_mode<synchronous>, transform_indices = @transform_18, window_bounds = array<i64: 1, 5>}, {transform_indices = @transform_19, window_bounds = array<i64: 1, 1, 5>}]} {
    %c0 = arith.constant 0 : index
    %c0_0 = arith.constant 0 : index
    %c0_1 = arith.constant 0 : index
    %0 = vector.load %arg1[%c0, %c0_0, %c0_1] : memref<1x8x32xf32, #tpu.memory_space<vmem>>, vector<1x8x32xf32>
    %1 = vector.shape_cast %0 : vector<1x8x32xf32> to vector<8x32xf32>
    %2 = arith.truncf %1 : vector<8x32xf32> to vector<8x32xbf16>
    %3 = vector.shape_cast %2 : vector<8x32xbf16> to vector<1x8x32xbf16>
    %4 = vector.broadcast %3 : vector<1x8x32xbf16> to vector<2x8x32xbf16>
    %c0_2 = arith.constant 0 : index
    %c0_3 = arith.constant 0 : index
    %c0_4 = arith.constant 0 : index
    %c0_5 = arith.constant 0 : index
    %5 = vector.load %arg2[%c0_2, %c0_3, %c0_4, %c0_5] : memref<2x2x32x16xbf16, #tpu.memory_space<vmem>>, vector<1x2x32x16xbf16>
    %6 = vector.shape_cast %5 : vector<1x2x32x16xbf16> to vector<2x32x16xbf16>
    "tpu.trace_start"() <{level = 10 : i32, message = "hld,hde->hle"}> : () -> ()
    %cst = arith.constant dense<0.000000e+00> : vector<2x8x16xf32>
    %7 = tpu.matmul %4, %6, %cst {dimension_numbers = #tpu.dot_dimension_numbers<[2], [1], [1], [2], [0, 0, 0, 1, 1, 2], [0], [0]>} : vector<2x8x32xbf16>, vector<2x32x16xbf16>, vector<2x8x16xf32> -> vector<2x8x16xf32>
    "tpu.trace_stop"() : () -> ()
    %c0_6 = arith.constant 0 : index
    %c0_7 = arith.constant 0 : index
    %c0_8 = arith.constant 0 : index
    %c0_9 = arith.constant 0 : index
    %8 = vector.load %arg3[%c0_6, %c0_7, %c0_8, %c0_9] : memref<2x2x1x16xf32, #tpu.memory_space<vmem>>, vector<1x2x1x16xf32>
    %9 = vector.shape_cast %8 : vector<1x2x1x16xf32> to vector<2x1x16xf32>
    %10 = vector.broadcast %9 : vector<2x1x16xf32> to vector<2x8x16xf32>
    %11 = arith.addf %7, %10 : vector<2x8x16xf32>
    %c0_10 = arith.constant 0 : index
    %c0_11 = arith.constant 0 : index
    %c0_12 = arith.constant 0 : index
    %c0_13 = arith.constant 0 : index
    %12 = vector.load %arg4[%c0_10, %c0_11, %c0_12, %c0_13] : memref<2x2x32x16xbf16, #tpu.memory_space<vmem>>, vector<1x2x32x16xbf16>
    %13 = vector.shape_cast %12 : vector<1x2x32x16xbf16> to vector<2x32x16xbf16>
    "tpu.trace_start"() <{level = 10 : i32, message = "hld,hde->hle"}> : () -> ()
    %cst_14 = arith.constant dense<0.000000e+00> : vector<2x8x16xf32>
    %14 = tpu.matmul %4, %13, %cst_14 {dimension_numbers = #tpu.dot_dimension_numbers<[2], [1], [1], [2], [0, 0, 0, 1, 1, 2], [0], [0]>} : vector<2x8x32xbf16>, vector<2x32x16xbf16>, vector<2x8x16xf32> -> vector<2x8x16xf32>
    "tpu.trace_stop"() : () -> ()
    %c0_15 = arith.constant 0 : index
    %c0_16 = arith.constant 0 : index
    %c0_17 = arith.constant 0 : index
    %c0_18 = arith.constant 0 : index
    %15 = vector.load %arg5[%c0_15, %c0_16, %c0_17, %c0_18] : memref<2x2x1x16xf32, #tpu.memory_space<vmem>>, vector<1x2x1x16xf32>
    %16 = vector.shape_cast %15 : vector<1x2x1x16xf32> to vector<2x1x16xf32>
    %17 = vector.broadcast %16 : vector<2x1x16xf32> to vector<2x8x16xf32>
    %18 = arith.addf %14, %17 : vector<2x8x16xf32>
    %c0_19 = arith.constant 0 : index
    %c0_20 = arith.constant 0 : index
    %c0_21 = arith.constant 0 : index
    %c0_22 = arith.constant 0 : index
    %19 = vector.load %arg6[%c0_19, %c0_20, %c0_21, %c0_22] : memref<2x2x32x16xbf16, #tpu.memory_space<vmem>>, vector<1x2x32x16xbf16>
    %20 = vector.shape_cast %19 : vector<1x2x32x16xbf16> to vector<2x32x16xbf16>
    "tpu.trace_start"() <{level = 10 : i32, message = "hld,hde->hle"}> : () -> ()
    %cst_23 = arith.constant dense<0.000000e+00> : vector<2x8x16xf32>
    %21 = tpu.matmul %4, %20, %cst_23 {dimension_numbers = #tpu.dot_dimension_numbers<[2], [1], [1], [2], [0, 0, 0, 1, 1, 2], [0], [0]>} : vector<2x8x32xbf16>, vector<2x32x16xbf16>, vector<2x8x16xf32> -> vector<2x8x16xf32>
    "tpu.trace_stop"() : () -> ()
    %c0_24 = arith.constant 0 : index
    %c0_25 = arith.constant 0 : index
    %c0_26 = arith.constant 0 : index
    %c0_27 = arith.constant 0 : index
    %22 = vector.load %arg7[%c0_24, %c0_25, %c0_26, %c0_27] : memref<2x2x1x16xf32, #tpu.memory_space<vmem>>, vector<1x2x1x16xf32>
    %23 = vector.shape_cast %22 : vector<1x2x1x16xf32> to vector<2x1x16xf32>
    %24 = vector.broadcast %23 : vector<2x1x16xf32> to vector<2x8x16xf32>
    %25 = arith.addf %21, %24 : vector<2x8x16xf32>
    %26 = arith.truncf %11 : vector<2x8x16xf32> to vector<2x8x16xbf16>
    %27 = arith.truncf %18 : vector<2x8x16xf32> to vector<2x8x16xbf16>
    "tpu.trace_start"() <{level = 10 : i32, message = "hqe,hke->hqk"}> : () -> ()
    %cst_28 = arith.constant dense<0.000000e+00> : vector<2x8x8xf32>
    %28 = tpu.matmul %26, %27, %cst_28 {dimension_numbers = #tpu.dot_dimension_numbers<[2], [2], [1], [1], [0, 0, 0, 1, 1, 1], [0], [0]>} : vector<2x8x16xbf16>, vector<2x8x16xbf16>, vector<2x8x8xf32> -> vector<2x8x8xf32>
    "tpu.trace_stop"() : () -> ()
    %cst_29 = arith.constant 2.500000e-01 : f32
    %29 = vector.broadcast %cst_29 : f32 to vector<2x8x8xf32>
    %30 = arith.mulf %28, %29 : vector<2x8x8xf32>
    %cst_30 = arith.constant dense<0xFF800000> : vector<2x8xf32>
    %31 = vector.multi_reduction <maximumf>, %30, %cst_30 [2] : vector<2x8x8xf32> to vector<2x8xf32>
    %32 = vector.shape_cast %31 : vector<2x8xf32> to vector<2x8x1xf32>
    %33 = vector.broadcast %32 : vector<2x8x1xf32> to vector<2x8x8xf32>
    %34 = arith.subf %30, %33 : vector<2x8x8xf32>
    %35 = math.exp %34 : vector<2x8x8xf32>
    %cst_31 = arith.constant dense<0.000000e+00> : vector<2x8xf32>
    %36 = vector.multi_reduction <add>, %35, %cst_31 [2] : vector<2x8x8xf32> to vector<2x8xf32>
    %37 = vector.shape_cast %36 : vector<2x8xf32> to vector<2x8x1xf32>
    %38 = vector.broadcast %37 : vector<2x8x1xf32> to vector<2x8x8xf32>
    %39 = arith.divf %35, %38 : vector<2x8x8xf32>
    %40 = arith.truncf %39 : vector<2x8x8xf32> to vector<2x8x8xbf16>
    %41 = arith.truncf %25 : vector<2x8x16xf32> to vector<2x8x16xbf16>
    "tpu.trace_start"() <{level = 10 : i32, message = "hqk,hke->hqe"}> : () -> ()
    %cst_32 = arith.constant dense<0.000000e+00> : vector<2x8x16xf32>
    %42 = tpu.matmul %40, %41, %cst_32 {dimension_numbers = #tpu.dot_dimension_numbers<[2], [1], [1], [2], [0, 0, 0, 1, 1, 2], [0], [0]>} : vector<2x8x8xbf16>, vector<2x8x16xbf16>, vector<2x8x16xf32> -> vector<2x8x16xf32>
    "tpu.trace_stop"() : () -> ()
    %43 = arith.truncf %42 : vector<2x8x16xf32> to vector<2x8x16xbf16>
    %c0_33 = arith.constant 0 : index
    %c0_34 = arith.constant 0 : index
    %c0_35 = arith.constant 0 : index
    %c0_36 = arith.constant 0 : index
    %44 = vector.load %arg8[%c0_33, %c0_34, %c0_35, %c0_36] : memref<2x2x16x32xbf16, #tpu.memory_space<vmem>>, vector<1x2x16x32xbf16>
    %45 = vector.shape_cast %44 : vector<1x2x16x32xbf16> to vector<2x16x32xbf16>
    "tpu.trace_start"() <{level = 10 : i32, message = "hle,hed->hld"}> : () -> ()
    %cst_37 = arith.constant dense<0.000000e+00> : vector<2x8x32xf32>
    %46 = tpu.matmul %43, %45, %cst_37 {dimension_numbers = #tpu.dot_dimension_numbers<[2], [1], [1], [2], [0, 0, 0, 1, 1, 2], [0], [0]>} : vector<2x8x16xbf16>, vector<2x16x32xbf16>, vector<2x8x32xf32> -> vector<2x8x32xf32>
    "tpu.trace_stop"() : () -> ()
    %cst_38 = arith.constant dense<0.000000e+00> : vector<8x32xf32>
    %47 = vector.multi_reduction <add>, %46, %cst_38 [0] : vector<2x8x32xf32> to vector<8x32xf32>
    %c0_39 = arith.constant 0 : index
    %c0_40 = arith.constant 0 : index
    %c0_41 = arith.constant 0 : index
    %48 = vector.load %arg9[%c0_39, %c0_40, %c0_41] : memref<2x1x32xf32, #tpu.memory_space<vmem>>, vector<1x1x32xf32>
    %49 = vector.shape_cast %48 : vector<1x1x32xf32> to vector<1x32xf32>
    %50 = vector.broadcast %49 : vector<1x32xf32> to vector<8x32xf32>
    %51 = arith.addf %47, %50 : vector<8x32xf32>
    %52 = arith.addf %1, %51 : vector<8x32xf32>
    %c0_42 = arith.constant 0 : index
    %c0_43 = arith.constant 0 : index
    %c0_44 = arith.constant 0 : index
    %53 = vector.load %arg10[%c0_42, %c0_43, %c0_44] : memref<2x1x32xf32, #tpu.memory_space<vmem>>, vector<1x1x32xf32>
    %54 = vector.shape_cast %53 : vector<1x1x32xf32> to vector<1x32xf32>
    %c0_45 = arith.constant 0 : index
    %c0_46 = arith.constant 0 : index
    %c0_47 = arith.constant 0 : index
    %55 = vector.load %arg11[%c0_45, %c0_46, %c0_47] : memref<2x1x32xf32, #tpu.memory_space<vmem>>, vector<1x1x32xf32>
    %56 = vector.shape_cast %55 : vector<1x1x32xf32> to vector<1x32xf32>
    %cst_48 = arith.constant dense<0.000000e+00> : vector<8xf32>
    %57 = vector.multi_reduction <add>, %52, %cst_48 [1] : vector<8x32xf32> to vector<8xf32>
    %58 = vector.shape_cast %57 : vector<8xf32> to vector<8x1xf32>
    %cst_49 = arith.constant 3.200000e+01 : f32
    %59 = vector.broadcast %cst_49 : f32 to vector<8x1xf32>
    %60 = arith.divf %58, %59 : vector<8x1xf32>
    %61 = vector.broadcast %60 : vector<8x1xf32> to vector<8x32xf32>
    %62 = arith.subf %52, %61 : vector<8x32xf32>
    %63 = arith.mulf %62, %62 : vector<8x32xf32>
    %cst_50 = arith.constant dense<0.000000e+00> : vector<8xf32>
    %64 = vector.multi_reduction <add>, %63, %cst_50 [1] : vector<8x32xf32> to vector<8xf32>
    %65 = vector.shape_cast %64 : vector<8xf32> to vector<8x1xf32>
    %cst_51 = arith.constant 3.200000e+01 : f32
    %66 = vector.broadcast %cst_51 : f32 to vector<8x1xf32>
    %67 = arith.divf %65, %66 : vector<8x1xf32>
    %68 = vector.broadcast %60 : vector<8x1xf32> to vector<8x32xf32>
    %69 = arith.subf %52, %68 : vector<8x32xf32>
    %cst_52 = arith.constant 9.99999974E-6 : f32
    %70 = vector.broadcast %cst_52 : f32 to vector<8x1xf32>
    %71 = arith.addf %67, %70 : vector<8x1xf32>
    %72 = math.rsqrt %71 : vector<8x1xf32>
    %73 = vector.broadcast %72 : vector<8x1xf32> to vector<8x32xf32>
    %74 = arith.mulf %69, %73 : vector<8x32xf32>
    %75 = vector.broadcast %54 : vector<1x32xf32> to vector<8x32xf32>
    %76 = arith.mulf %74, %75 : vector<8x32xf32>
    %77 = vector.broadcast %56 : vector<1x32xf32> to vector<8x32xf32>
    %78 = arith.addf %76, %77 : vector<8x32xf32>
    %79 = arith.truncf %78 : vector<8x32xf32> to vector<8x32xbf16>
    %c0_53 = arith.constant 0 : index
    %c0_54 = arith.constant 0 : index
    %c0_55 = arith.constant 0 : index
    %80 = vector.load %arg12[%c0_53, %c0_54, %c0_55] : memref<2x32x2048xbf16, #tpu.memory_space<vmem>>, vector<1x32x2048xbf16>
    %81 = vector.shape_cast %80 : vector<1x32x2048xbf16> to vector<32x2048xbf16>
    %cst_56 = arith.constant dense<0.000000e+00> : vector<8x2048xf32>
    %82 = tpu.matmul %79, %81, %cst_56 {dimension_numbers = #tpu.dot_dimension_numbers<[1], [0], [0], [1], [0, 0, 1, 1], [], []>} : vector<8x32xbf16>, vector<32x2048xbf16>, vector<8x2048xf32> -> vector<8x2048xf32>
    %c0_57 = arith.constant 0 : index
    %c0_58 = arith.constant 0 : index
    %c0_59 = arith.constant 0 : index
    %83 = vector.load %arg13[%c0_57, %c0_58, %c0_59] : memref<2x1x2048xf32, #tpu.memory_space<vmem>>, vector<1x1x2048xf32>
    %84 = vector.shape_cast %83 : vector<1x1x2048xf32> to vector<1x2048xf32>
    %85 = vector.broadcast %84 : vector<1x2048xf32> to vector<8x2048xf32>
    %86 = arith.addf %82, %85 : vector<8x2048xf32>
    %cst_60 = arith.constant 0.000000e+00 : f32
    %87 = vector.broadcast %cst_60 : f32 to vector<8x2048xf32>
    %88 = arith.maximumf %86, %87 : vector<8x2048xf32>
    %89 = arith.truncf %88 : vector<8x2048xf32> to vector<8x2048xbf16>
    %c0_61 = arith.constant 0 : index
    %c0_62 = arith.constant 0 : index
    %c0_63 = arith.constant 0 : index
    %90 = vector.load %arg14[%c0_61, %c0_62, %c0_63] : memref<2x2048x32xbf16, #tpu.memory_space<vmem>>, vector<1x2048x32xbf16>
    %91 = vector.shape_cast %90 : vector<1x2048x32xbf16> to vector<2048x32xbf16>
    %cst_64 = arith.constant dense<0.000000e+00> : vector<8x32xf32>
    %92 = tpu.matmul %89, %91, %cst_64 {dimension_numbers = #tpu.dot_dimension_numbers<[1], [0], [0], [1], [0, 0, 1, 1], [], []>} : vector<8x2048xbf16>, vector<2048x32xbf16>, vector<8x32xf32> -> vector<8x32xf32>
    %c0_65 = arith.constant 0 : index
    %c0_66 = arith.constant 0 : index
    %c0_67 = arith.constant 0 : index
    %93 = vector.load %arg15[%c0_65, %c0_66, %c0_67] : memref<2x1x32xf32, #tpu.memory_space<vmem>>, vector<1x1x32xf32>
    %94 = vector.shape_cast %93 : vector<1x1x32xf32> to vector<1x32xf32>
    %95 = vector.broadcast %94 : vector<1x32xf32> to vector<8x32xf32>
    %96 = arith.addf %92, %95 : vector<8x32xf32>
    %97 = arith.addf %78, %96 : vector<8x32xf32>
    %c0_68 = arith.constant 0 : index
    %c0_69 = arith.constant 0 : index
    %c0_70 = arith.constant 0 : index
    %98 = vector.load %arg16[%c0_68, %c0_69, %c0_70] : memref<2x1x32xf32, #tpu.memory_space<vmem>>, vector<1x1x32xf32>
    %99 = vector.shape_cast %98 : vector<1x1x32xf32> to vector<1x32xf32>
    %c0_71 = arith.constant 0 : index
    %c0_72 = arith.constant 0 : index
    %c0_73 = arith.constant 0 : index
    %100 = vector.load %arg17[%c0_71, %c0_72, %c0_73] : memref<2x1x32xf32, #tpu.memory_space<vmem>>, vector<1x1x32xf32>
    %101 = vector.shape_cast %100 : vector<1x1x32xf32> to vector<1x32xf32>
    %cst_74 = arith.constant dense<0.000000e+00> : vector<8xf32>
    %102 = vector.multi_reduction <add>, %97, %cst_74 [1] : vector<8x32xf32> to vector<8xf32>
    %103 = vector.shape_cast %102 : vector<8xf32> to vector<8x1xf32>
    %cst_75 = arith.constant 3.200000e+01 : f32
    %104 = vector.broadcast %cst_75 : f32 to vector<8x1xf32>
    %105 = arith.divf %103, %104 : vector<8x1xf32>
    %106 = vector.broadcast %105 : vector<8x1xf32> to vector<8x32xf32>
    %107 = arith.subf %97, %106 : vector<8x32xf32>
    %108 = arith.mulf %107, %107 : vector<8x32xf32>
    %cst_76 = arith.constant dense<0.000000e+00> : vector<8xf32>
    %109 = vector.multi_reduction <add>, %108, %cst_76 [1] : vector<8x32xf32> to vector<8xf32>
    %110 = vector.shape_cast %109 : vector<8xf32> to vector<8x1xf32>
    %cst_77 = arith.constant 3.200000e+01 : f32
    %111 = vector.broadcast %cst_77 : f32 to vector<8x1xf32>
    %112 = arith.divf %110, %111 : vector<8x1xf32>
    %113 = vector.broadcast %105 : vector<8x1xf32> to vector<8x32xf32>
    %114 = arith.subf %97, %113 : vector<8x32xf32>
    %cst_78 = arith.constant 9.99999974E-6 : f32
    %115 = vector.broadcast %cst_78 : f32 to vector<8x1xf32>
    %116 = arith.addf %112, %115 : vector<8x1xf32>
    %117 = math.rsqrt %116 : vector<8x1xf32>
    %118 = vector.broadcast %117 : vector<8x1xf32> to vector<8x32xf32>
    %119 = arith.mulf %114, %118 : vector<8x32xf32>
    %120 = vector.broadcast %99 : vector<1x32xf32> to vector<8x32xf32>
    %121 = arith.mulf %119, %120 : vector<8x32xf32>
    %122 = vector.broadcast %101 : vector<1x32xf32> to vector<8x32xf32>
    %123 = arith.addf %121, %122 : vector<8x32xf32>
    %124 = arith.truncf %123 : vector<8x32xf32> to vector<8x32xbf16>
    %125 = vector.shape_cast %124 : vector<8x32xbf16> to vector<1x8x32xbf16>
    %126 = vector.broadcast %125 : vector<1x8x32xbf16> to vector<2x8x32xbf16>
    %c1 = arith.constant 1 : index
    %c0_79 = arith.constant 0 : index
    %c0_80 = arith.constant 0 : index
    %c0_81 = arith.constant 0 : index
    %127 = vector.load %arg2[%c1, %c0_79, %c0_80, %c0_81] : memref<2x2x32x16xbf16, #tpu.memory_space<vmem>>, vector<1x2x32x16xbf16>
    %128 = vector.shape_cast %127 : vector<1x2x32x16xbf16> to vector<2x32x16xbf16>
    "tpu.trace_start"() <{level = 10 : i32, message = "hld,hde->hle"}> : () -> ()
    %cst_82 = arith.constant dense<0.000000e+00> : vector<2x8x16xf32>
    %129 = tpu.matmul %126, %128, %cst_82 {dimension_numbers = #tpu.dot_dimension_numbers<[2], [1], [1], [2], [0, 0, 0, 1, 1, 2], [0], [0]>} : vector<2x8x32xbf16>, vector<2x32x16xbf16>, vector<2x8x16xf32> -> vector<2x8x16xf32>
    "tpu.trace_stop"() : () -> ()
    %c1_83 = arith.constant 1 : index
    %c0_84 = arith.constant 0 : index
    %c0_85 = arith.constant 0 : index
    %c0_86 = arith.constant 0 : index
    %130 = vector.load %arg3[%c1_83, %c0_84, %c0_85, %c0_86] : memref<2x2x1x16xf32, #tpu.memory_space<vmem>>, vector<1x2x1x16xf32>
    %131 = vector.shape_cast %130 : vector<1x2x1x16xf32> to vector<2x1x16xf32>
    %132 = vector.broadcast %131 : vector<2x1x16xf32> to vector<2x8x16xf32>
    %133 = arith.addf %129, %132 : vector<2x8x16xf32>
    %c1_87 = arith.constant 1 : index
    %c0_88 = arith.constant 0 : index
    %c0_89 = arith.constant 0 : index
    %c0_90 = arith.constant 0 : index
    %134 = vector.load %arg4[%c1_87, %c0_88, %c0_89, %c0_90] : memref<2x2x32x16xbf16, #tpu.memory_space<vmem>>, vector<1x2x32x16xbf16>
    %135 = vector.shape_cast %134 : vector<1x2x32x16xbf16> to vector<2x32x16xbf16>
    "tpu.trace_start"() <{level = 10 : i32, message = "hld,hde->hle"}> : () -> ()
    %cst_91 = arith.constant dense<0.000000e+00> : vector<2x8x16xf32>
    %136 = tpu.matmul %126, %135, %cst_91 {dimension_numbers = #tpu.dot_dimension_numbers<[2], [1], [1], [2], [0, 0, 0, 1, 1, 2], [0], [0]>} : vector<2x8x32xbf16>, vector<2x32x16xbf16>, vector<2x8x16xf32> -> vector<2x8x16xf32>
    "tpu.trace_stop"() : () -> ()
    %c1_92 = arith.constant 1 : index
    %c0_93 = arith.constant 0 : index
    %c0_94 = arith.constant 0 : index
    %c0_95 = arith.constant 0 : index
    %137 = vector.load %arg5[%c1_92, %c0_93, %c0_94, %c0_95] : memref<2x2x1x16xf32, #tpu.memory_space<vmem>>, vector<1x2x1x16xf32>
    %138 = vector.shape_cast %137 : vector<1x2x1x16xf32> to vector<2x1x16xf32>
    %139 = vector.broadcast %138 : vector<2x1x16xf32> to vector<2x8x16xf32>
    %140 = arith.addf %136, %139 : vector<2x8x16xf32>
    %c1_96 = arith.constant 1 : index
    %c0_97 = arith.constant 0 : index
    %c0_98 = arith.constant 0 : index
    %c0_99 = arith.constant 0 : index
    %141 = vector.load %arg6[%c1_96, %c0_97, %c0_98, %c0_99] : memref<2x2x32x16xbf16, #tpu.memory_space<vmem>>, vector<1x2x32x16xbf16>
    %142 = vector.shape_cast %141 : vector<1x2x32x16xbf16> to vector<2x32x16xbf16>
    "tpu.trace_start"() <{level = 10 : i32, message = "hld,hde->hle"}> : () -> ()
    %cst_100 = arith.constant dense<0.000000e+00> : vector<2x8x16xf32>
    %143 = tpu.matmul %126, %142, %cst_100 {dimension_numbers = #tpu.dot_dimension_numbers<[2], [1], [1], [2], [0, 0, 0, 1, 1, 2], [0], [0]>} : vector<2x8x32xbf16>, vector<2x32x16xbf16>, vector<2x8x16xf32> -> vector<2x8x16xf32>
    "tpu.trace_stop"() : () -> ()
    %c1_101 = arith.constant 1 : index
    %c0_102 = arith.constant 0 : index
    %c0_103 = arith.constant 0 : index
    %c0_104 = arith.constant 0 : index
    %144 = vector.load %arg7[%c1_101, %c0_102, %c0_103, %c0_104] : memref<2x2x1x16xf32, #tpu.memory_space<vmem>>, vector<1x2x1x16xf32>
    %145 = vector.shape_cast %144 : vector<1x2x1x16xf32> to vector<2x1x16xf32>
    %146 = vector.broadcast %145 : vector<2x1x16xf32> to vector<2x8x16xf32>
    %147 = arith.addf %143, %146 : vector<2x8x16xf32>
    %148 = arith.truncf %133 : vector<2x8x16xf32> to vector<2x8x16xbf16>
    %149 = arith.truncf %140 : vector<2x8x16xf32> to vector<2x8x16xbf16>
    "tpu.trace_start"() <{level = 10 : i32, message = "hqe,hke->hqk"}> : () -> ()
    %cst_105 = arith.constant dense<0.000000e+00> : vector<2x8x8xf32>
    %150 = tpu.matmul %148, %149, %cst_105 {dimension_numbers = #tpu.dot_dimension_numbers<[2], [2], [1], [1], [0, 0, 0, 1, 1, 1], [0], [0]>} : vector<2x8x16xbf16>, vector<2x8x16xbf16>, vector<2x8x8xf32> -> vector<2x8x8xf32>
    "tpu.trace_stop"() : () -> ()
    %cst_106 = arith.constant 2.500000e-01 : f32
    %151 = vector.broadcast %cst_106 : f32 to vector<2x8x8xf32>
    %152 = arith.mulf %150, %151 : vector<2x8x8xf32>
    %cst_107 = arith.constant dense<0xFF800000> : vector<2x8xf32>
    %153 = vector.multi_reduction <maximumf>, %152, %cst_107 [2] : vector<2x8x8xf32> to vector<2x8xf32>
    %154 = vector.shape_cast %153 : vector<2x8xf32> to vector<2x8x1xf32>
    %155 = vector.broadcast %154 : vector<2x8x1xf32> to vector<2x8x8xf32>
    %156 = arith.subf %152, %155 : vector<2x8x8xf32>
    %157 = math.exp %156 : vector<2x8x8xf32>
    %cst_108 = arith.constant dense<0.000000e+00> : vector<2x8xf32>
    %158 = vector.multi_reduction <add>, %157, %cst_108 [2] : vector<2x8x8xf32> to vector<2x8xf32>
    %159 = vector.shape_cast %158 : vector<2x8xf32> to vector<2x8x1xf32>
    %160 = vector.broadcast %159 : vector<2x8x1xf32> to vector<2x8x8xf32>
    %161 = arith.divf %157, %160 : vector<2x8x8xf32>
    %162 = arith.truncf %161 : vector<2x8x8xf32> to vector<2x8x8xbf16>
    %163 = arith.truncf %147 : vector<2x8x16xf32> to vector<2x8x16xbf16>
    "tpu.trace_start"() <{level = 10 : i32, message = "hqk,hke->hqe"}> : () -> ()
    %cst_109 = arith.constant dense<0.000000e+00> : vector<2x8x16xf32>
    %164 = tpu.matmul %162, %163, %cst_109 {dimension_numbers = #tpu.dot_dimension_numbers<[2], [1], [1], [2], [0, 0, 0, 1, 1, 2], [0], [0]>} : vector<2x8x8xbf16>, vector<2x8x16xbf16>, vector<2x8x16xf32> -> vector<2x8x16xf32>
    "tpu.trace_stop"() : () -> ()
    %165 = arith.truncf %164 : vector<2x8x16xf32> to vector<2x8x16xbf16>
    %c1_110 = arith.constant 1 : index
    %c0_111 = arith.constant 0 : index
    %c0_112 = arith.constant 0 : index
    %c0_113 = arith.constant 0 : index
    %166 = vector.load %arg8[%c1_110, %c0_111, %c0_112, %c0_113] : memref<2x2x16x32xbf16, #tpu.memory_space<vmem>>, vector<1x2x16x32xbf16>
    %167 = vector.shape_cast %166 : vector<1x2x16x32xbf16> to vector<2x16x32xbf16>
    "tpu.trace_start"() <{level = 10 : i32, message = "hle,hed->hld"}> : () -> ()
    %cst_114 = arith.constant dense<0.000000e+00> : vector<2x8x32xf32>
    %168 = tpu.matmul %165, %167, %cst_114 {dimension_numbers = #tpu.dot_dimension_numbers<[2], [1], [1], [2], [0, 0, 0, 1, 1, 2], [0], [0]>} : vector<2x8x16xbf16>, vector<2x16x32xbf16>, vector<2x8x32xf32> -> vector<2x8x32xf32>
    "tpu.trace_stop"() : () -> ()
    %cst_115 = arith.constant dense<0.000000e+00> : vector<8x32xf32>
    %169 = vector.multi_reduction <add>, %168, %cst_115 [0] : vector<2x8x32xf32> to vector<8x32xf32>
    %c1_116 = arith.constant 1 : index
    %c0_117 = arith.constant 0 : index
    %c0_118 = arith.constant 0 : index
    %170 = vector.load %arg9[%c1_116, %c0_117, %c0_118] : memref<2x1x32xf32, #tpu.memory_space<vmem>>, vector<1x1x32xf32>
    %171 = vector.shape_cast %170 : vector<1x1x32xf32> to vector<1x32xf32>
    %172 = vector.broadcast %171 : vector<1x32xf32> to vector<8x32xf32>
    %173 = arith.addf %169, %172 : vector<8x32xf32>
    %174 = arith.addf %123, %173 : vector<8x32xf32>
    %c1_119 = arith.constant 1 : index
    %c0_120 = arith.constant 0 : index
    %c0_121 = arith.constant 0 : index
    %175 = vector.load %arg10[%c1_119, %c0_120, %c0_121] : memref<2x1x32xf32, #tpu.memory_space<vmem>>, vector<1x1x32xf32>
    %176 = vector.shape_cast %175 : vector<1x1x32xf32> to vector<1x32xf32>
    %c1_122 = arith.constant 1 : index
    %c0_123 = arith.constant 0 : index
    %c0_124 = arith.constant 0 : index
    %177 = vector.load %arg11[%c1_122, %c0_123, %c0_124] : memref<2x1x32xf32, #tpu.memory_space<vmem>>, vector<1x1x32xf32>
    %178 = vector.shape_cast %177 : vector<1x1x32xf32> to vector<1x32xf32>
    %cst_125 = arith.constant dense<0.000000e+00> : vector<8xf32>
    %179 = vector.multi_reduction <add>, %174, %cst_125 [1] : vector<8x32xf32> to vector<8xf32>
    %180 = vector.shape_cast %179 : vector<8xf32> to vector<8x1xf32>
    %cst_126 = arith.constant 3.200000e+01 : f32
    %181 = vector.broadcast %cst_126 : f32 to vector<8x1xf32>
    %182 = arith.divf %180, %181 : vector<8x1xf32>
    %183 = vector.broadcast %182 : vector<8x1xf32> to vector<8x32xf32>
    %184 = arith.subf %174, %183 : vector<8x32xf32>
    %185 = arith.mulf %184, %184 : vector<8x32xf32>
    %cst_127 = arith.constant dense<0.000000e+00> : vector<8xf32>
    %186 = vector.multi_reduction <add>, %185, %cst_127 [1] : vector<8x32xf32> to vector<8xf32>
    %187 = vector.shape_cast %186 : vector<8xf32> to vector<8x1xf32>
    %cst_128 = arith.constant 3.200000e+01 : f32
    %188 = vector.broadcast %cst_128 : f32 to vector<8x1xf32>
    %189 = arith.divf %187, %188 : vector<8x1xf32>
    %190 = vector.broadcast %182 : vector<8x1xf32> to vector<8x32xf32>
    %191 = arith.subf %174, %190 : vector<8x32xf32>
    %cst_129 = arith.constant 9.99999974E-6 : f32
    %192 = vector.broadcast %cst_129 : f32 to vector<8x1xf32>
    %193 = arith.addf %189, %192 : vector<8x1xf32>
    %194 = math.rsqrt %193 : vector<8x1xf32>
    %195 = vector.broadcast %194 : vector<8x1xf32> to vector<8x32xf32>
    %196 = arith.mulf %191, %195 : vector<8x32xf32>
    %197 = vector.broadcast %176 : vector<1x32xf32> to vector<8x32xf32>
    %198 = arith.mulf %196, %197 : vector<8x32xf32>
    %199 = vector.broadcast %178 : vector<1x32xf32> to vector<8x32xf32>
    %200 = arith.addf %198, %199 : vector<8x32xf32>
    %201 = arith.truncf %200 : vector<8x32xf32> to vector<8x32xbf16>
    %c1_130 = arith.constant 1 : index
    %c0_131 = arith.constant 0 : index
    %c0_132 = arith.constant 0 : index
    %202 = vector.load %arg12[%c1_130, %c0_131, %c0_132] : memref<2x32x2048xbf16, #tpu.memory_space<vmem>>, vector<1x32x2048xbf16>
    %203 = vector.shape_cast %202 : vector<1x32x2048xbf16> to vector<32x2048xbf16>
    %cst_133 = arith.constant dense<0.000000e+00> : vector<8x2048xf32>
    %204 = tpu.matmul %201, %203, %cst_133 {dimension_numbers = #tpu.dot_dimension_numbers<[1], [0], [0], [1], [0, 0, 1, 1], [], []>} : vector<8x32xbf16>, vector<32x2048xbf16>, vector<8x2048xf32> -> vector<8x2048xf32>
    %c1_134 = arith.constant 1 : index
    %c0_135 = arith.constant 0 : index
    %c0_136 = arith.constant 0 : index
    %205 = vector.load %arg13[%c1_134, %c0_135, %c0_136] : memref<2x1x2048xf32, #tpu.memory_space<vmem>>, vector<1x1x2048xf32>
    %206 = vector.shape_cast %205 : vector<1x1x2048xf32> to vector<1x2048xf32>
    %207 = vector.broadcast %206 : vector<1x2048xf32> to vector<8x2048xf32>
    %208 = arith.addf %204, %207 : vector<8x2048xf32>
    %cst_137 = arith.constant 0.000000e+00 : f32
    %209 = vector.broadcast %cst_137 : f32 to vector<8x2048xf32>
    %210 = arith.maximumf %208, %209 : vector<8x2048xf32>
    %211 = arith.truncf %210 : vector<8x2048xf32> to vector<8x2048xbf16>
    %c1_138 = arith.constant 1 : index
    %c0_139 = arith.constant 0 : index
    %c0_140 = arith.constant 0 : index
    %212 = vector.load %arg14[%c1_138, %c0_139, %c0_140] : memref<2x2048x32xbf16, #tpu.memory_space<vmem>>, vector<1x2048x32xbf16>
    %213 = vector.shape_cast %212 : vector<1x2048x32xbf16> to vector<2048x32xbf16>
    %cst_141 = arith.constant dense<0.000000e+00> : vector<8x32xf32>
    %214 = tpu.matmul %211, %213, %cst_141 {dimension_numbers = #tpu.dot_dimension_numbers<[1], [0], [0], [1], [0, 0, 1, 1], [], []>} : vector<8x2048xbf16>, vector<2048x32xbf16>, vector<8x32xf32> -> vector<8x32xf32>
    %c1_142 = arith.constant 1 : index
    %c0_143 = arith.constant 0 : index
    %c0_144 = arith.constant 0 : index
    %215 = vector.load %arg15[%c1_142, %c0_143, %c0_144] : memref<2x1x32xf32, #tpu.memory_space<vmem>>, vector<1x1x32xf32>
    %216 = vector.shape_cast %215 : vector<1x1x32xf32> to vector<1x32xf32>
    %217 = vector.broadcast %216 : vector<1x32xf32> to vector<8x32xf32>
    %218 = arith.addf %214, %217 : vector<8x32xf32>
    %219 = arith.addf %200, %218 : vector<8x32xf32>
    %c1_145 = arith.constant 1 : index
    %c0_146 = arith.constant 0 : index
    %c0_147 = arith.constant 0 : index
    %220 = vector.load %arg16[%c1_145, %c0_146, %c0_147] : memref<2x1x32xf32, #tpu.memory_space<vmem>>, vector<1x1x32xf32>
    %221 = vector.shape_cast %220 : vector<1x1x32xf32> to vector<1x32xf32>
    %c1_148 = arith.constant 1 : index
    %c0_149 = arith.constant 0 : index
    %c0_150 = arith.constant 0 : index
    %222 = vector.load %arg17[%c1_148, %c0_149, %c0_150] : memref<2x1x32xf32, #tpu.memory_space<vmem>>, vector<1x1x32xf32>
    %223 = vector.shape_cast %222 : vector<1x1x32xf32> to vector<1x32xf32>
    %cst_151 = arith.constant dense<0.000000e+00> : vector<8xf32>
    %224 = vector.multi_reduction <add>, %219, %cst_151 [1] : vector<8x32xf32> to vector<8xf32>
    %225 = vector.shape_cast %224 : vector<8xf32> to vector<8x1xf32>
    %cst_152 = arith.constant 3.200000e+01 : f32
    %226 = vector.broadcast %cst_152 : f32 to vector<8x1xf32>
    %227 = arith.divf %225, %226 : vector<8x1xf32>
    %228 = vector.broadcast %227 : vector<8x1xf32> to vector<8x32xf32>
    %229 = arith.subf %219, %228 : vector<8x32xf32>
    %230 = arith.mulf %229, %229 : vector<8x32xf32>
    %cst_153 = arith.constant dense<0.000000e+00> : vector<8xf32>
    %231 = vector.multi_reduction <add>, %230, %cst_153 [1] : vector<8x32xf32> to vector<8xf32>
    %232 = vector.shape_cast %231 : vector<8xf32> to vector<8x1xf32>
    %cst_154 = arith.constant 3.200000e+01 : f32
    %233 = vector.broadcast %cst_154 : f32 to vector<8x1xf32>
    %234 = arith.divf %232, %233 : vector<8x1xf32>
    %235 = vector.broadcast %227 : vector<8x1xf32> to vector<8x32xf32>
    %236 = arith.subf %219, %235 : vector<8x32xf32>
    %cst_155 = arith.constant 9.99999974E-6 : f32
    %237 = vector.broadcast %cst_155 : f32 to vector<8x1xf32>
    %238 = arith.addf %234, %237 : vector<8x1xf32>
    %239 = math.rsqrt %238 : vector<8x1xf32>
    %240 = vector.broadcast %239 : vector<8x1xf32> to vector<8x32xf32>
    %241 = arith.mulf %236, %240 : vector<8x32xf32>
    %242 = vector.broadcast %221 : vector<1x32xf32> to vector<8x32xf32>
    %243 = arith.mulf %241, %242 : vector<8x32xf32>
    %244 = vector.broadcast %223 : vector<1x32xf32> to vector<8x32xf32>
    %245 = arith.addf %243, %244 : vector<8x32xf32>
    %c0_156 = arith.constant 0 : index
    %c0_157 = arith.constant 0 : index
    %246 = vector.load %arg19[%c0_156, %c0_157] : memref<1x5xf32, #tpu.memory_space<vmem>>, vector<1x5xf32>
    %247 = vector.extract_strided_slice %245 {offsets = [0, 0], sizes = [1, 32], strides = [1, 1]} : vector<8x32xf32> to vector<1x32xf32>
    %c0_158 = arith.constant 0 : index
    %c0_159 = arith.constant 0 : index
    %c0_160 = arith.constant 0 : index
    %248 = vector.load %arg18[%c0_158, %c0_159, %c0_160] : memref<8x32x5xf32, #tpu.memory_space<vmem>>, vector<1x32x5xf32>
    %249 = vector.shape_cast %248 : vector<1x32x5xf32> to vector<32x5xf32>
    %cst_161 = arith.constant dense<0.000000e+00> : vector<1x5xf32>
    %250 = tpu.matmul %247, %249, %cst_161 {dimension_numbers = #tpu.dot_dimension_numbers<[1], [0], [0], [1], [0, 0, 1, 1], [], []>} : vector<1x32xf32>, vector<32x5xf32>, vector<1x5xf32> -> vector<1x5xf32>
    %251 = arith.addf %246, %250 : vector<1x5xf32>
    %252 = vector.extract_strided_slice %245 {offsets = [1, 0], sizes = [1, 32], strides = [1, 1]} : vector<8x32xf32> to vector<1x32xf32>
    %c1_162 = arith.constant 1 : index
    %c0_163 = arith.constant 0 : index
    %c0_164 = arith.constant 0 : index
    %253 = vector.load %arg18[%c1_162, %c0_163, %c0_164] : memref<8x32x5xf32, #tpu.memory_space<vmem>>, vector<1x32x5xf32>
    %254 = vector.shape_cast %253 : vector<1x32x5xf32> to vector<32x5xf32>
    %cst_165 = arith.constant dense<0.000000e+00> : vector<1x5xf32>
    %255 = tpu.matmul %252, %254, %cst_165 {dimension_numbers = #tpu.dot_dimension_numbers<[1], [0], [0], [1], [0, 0, 1, 1], [], []>} : vector<1x32xf32>, vector<32x5xf32>, vector<1x5xf32> -> vector<1x5xf32>
    %256 = arith.addf %251, %255 : vector<1x5xf32>
    %257 = vector.extract_strided_slice %245 {offsets = [2, 0], sizes = [1, 32], strides = [1, 1]} : vector<8x32xf32> to vector<1x32xf32>
    %c2 = arith.constant 2 : index
    %c0_166 = arith.constant 0 : index
    %c0_167 = arith.constant 0 : index
    %258 = vector.load %arg18[%c2, %c0_166, %c0_167] : memref<8x32x5xf32, #tpu.memory_space<vmem>>, vector<1x32x5xf32>
    %259 = vector.shape_cast %258 : vector<1x32x5xf32> to vector<32x5xf32>
    %cst_168 = arith.constant dense<0.000000e+00> : vector<1x5xf32>
    %260 = tpu.matmul %257, %259, %cst_168 {dimension_numbers = #tpu.dot_dimension_numbers<[1], [0], [0], [1], [0, 0, 1, 1], [], []>} : vector<1x32xf32>, vector<32x5xf32>, vector<1x5xf32> -> vector<1x5xf32>
    %261 = arith.addf %256, %260 : vector<1x5xf32>
    %262 = vector.extract_strided_slice %245 {offsets = [3, 0], sizes = [1, 32], strides = [1, 1]} : vector<8x32xf32> to vector<1x32xf32>
    %c3 = arith.constant 3 : index
    %c0_169 = arith.constant 0 : index
    %c0_170 = arith.constant 0 : index
    %263 = vector.load %arg18[%c3, %c0_169, %c0_170] : memref<8x32x5xf32, #tpu.memory_space<vmem>>, vector<1x32x5xf32>
    %264 = vector.shape_cast %263 : vector<1x32x5xf32> to vector<32x5xf32>
    %cst_171 = arith.constant dense<0.000000e+00> : vector<1x5xf32>
    %265 = tpu.matmul %262, %264, %cst_171 {dimension_numbers = #tpu.dot_dimension_numbers<[1], [0], [0], [1], [0, 0, 1, 1], [], []>} : vector<1x32xf32>, vector<32x5xf32>, vector<1x5xf32> -> vector<1x5xf32>
    %266 = arith.addf %261, %265 : vector<1x5xf32>
    %267 = vector.extract_strided_slice %245 {offsets = [4, 0], sizes = [1, 32], strides = [1, 1]} : vector<8x32xf32> to vector<1x32xf32>
    %c4 = arith.constant 4 : index
    %c0_172 = arith.constant 0 : index
    %c0_173 = arith.constant 0 : index
    %268 = vector.load %arg18[%c4, %c0_172, %c0_173] : memref<8x32x5xf32, #tpu.memory_space<vmem>>, vector<1x32x5xf32>
    %269 = vector.shape_cast %268 : vector<1x32x5xf32> to vector<32x5xf32>
    %cst_174 = arith.constant dense<0.000000e+00> : vector<1x5xf32>
    %270 = tpu.matmul %267, %269, %cst_174 {dimension_numbers = #tpu.dot_dimension_numbers<[1], [0], [0], [1], [0, 0, 1, 1], [], []>} : vector<1x32xf32>, vector<32x5xf32>, vector<1x5xf32> -> vector<1x5xf32>
    %271 = arith.addf %266, %270 : vector<1x5xf32>
    %272 = vector.extract_strided_slice %245 {offsets = [5, 0], sizes = [1, 32], strides = [1, 1]} : vector<8x32xf32> to vector<1x32xf32>
    %c5 = arith.constant 5 : index
    %c0_175 = arith.constant 0 : index
    %c0_176 = arith.constant 0 : index
    %273 = vector.load %arg18[%c5, %c0_175, %c0_176] : memref<8x32x5xf32, #tpu.memory_space<vmem>>, vector<1x32x5xf32>
    %274 = vector.shape_cast %273 : vector<1x32x5xf32> to vector<32x5xf32>
    %cst_177 = arith.constant dense<0.000000e+00> : vector<1x5xf32>
    %275 = tpu.matmul %272, %274, %cst_177 {dimension_numbers = #tpu.dot_dimension_numbers<[1], [0], [0], [1], [0, 0, 1, 1], [], []>} : vector<1x32xf32>, vector<32x5xf32>, vector<1x5xf32> -> vector<1x5xf32>
    %276 = arith.addf %271, %275 : vector<1x5xf32>
    %277 = vector.extract_strided_slice %245 {offsets = [6, 0], sizes = [1, 32], strides = [1, 1]} : vector<8x32xf32> to vector<1x32xf32>
    %c6 = arith.constant 6 : index
    %c0_178 = arith.constant 0 : index
    %c0_179 = arith.constant 0 : index
    %278 = vector.load %arg18[%c6, %c0_178, %c0_179] : memref<8x32x5xf32, #tpu.memory_space<vmem>>, vector<1x32x5xf32>
    %279 = vector.shape_cast %278 : vector<1x32x5xf32> to vector<32x5xf32>
    %cst_180 = arith.constant dense<0.000000e+00> : vector<1x5xf32>
    %280 = tpu.matmul %277, %279, %cst_180 {dimension_numbers = #tpu.dot_dimension_numbers<[1], [0], [0], [1], [0, 0, 1, 1], [], []>} : vector<1x32xf32>, vector<32x5xf32>, vector<1x5xf32> -> vector<1x5xf32>
    %281 = arith.addf %276, %280 : vector<1x5xf32>
    %282 = vector.extract_strided_slice %245 {offsets = [7, 0], sizes = [1, 32], strides = [1, 1]} : vector<8x32xf32> to vector<1x32xf32>
    %c7 = arith.constant 7 : index
    %c0_181 = arith.constant 0 : index
    %c0_182 = arith.constant 0 : index
    %283 = vector.load %arg18[%c7, %c0_181, %c0_182] : memref<8x32x5xf32, #tpu.memory_space<vmem>>, vector<1x32x5xf32>
    %284 = vector.shape_cast %283 : vector<1x32x5xf32> to vector<32x5xf32>
    %cst_183 = arith.constant dense<0.000000e+00> : vector<1x5xf32>
    %285 = tpu.matmul %282, %284, %cst_183 {dimension_numbers = #tpu.dot_dimension_numbers<[1], [0], [0], [1], [0, 0, 1, 1], [], []>} : vector<1x32xf32>, vector<32x5xf32>, vector<1x5xf32> -> vector<1x5xf32>
    %286 = arith.addf %281, %285 : vector<1x5xf32>
    %c0_184 = arith.constant 0 : index
    %c0_185 = arith.constant 0 : index
    %c0_186 = arith.constant 0 : index
    %287 = vector.load %arg20[%c0_184, %c0_185, %c0_186] : memref<1x1x5xf32, #tpu.memory_space<vmem>>, vector<1x1x5xf32>
    %288 = vector.shape_cast %287 : vector<1x1x5xf32> to vector<1x5xf32>
    %289 = vector.shape_cast %286 : vector<1x5xf32> to vector<1x1x5xf32>
    tpu.vector_store %arg20[%c0_184, %c0_185, %c0_186], %289 {strides = array<i32>} : memref<1x1x5xf32, #tpu.memory_space<vmem>>, vector<1x1x5xf32>,
    return
  }
  func.func @transform_0(%arg0: i32) -> (i32, i32, i32) {
    %c0_i32 = arith.constant 0 : i32
    %c0_i32_0 = arith.constant 0 : i32
    %c0_i32_1 = arith.constant 0 : i32
    return %arg0, %c0_i32, %c0_i32_0 : i32, i32, i32
  }
  func.func @transform_1(%arg0: i32) -> (i32, i32, i32, i32) {
    %c0_i32 = arith.constant 0 : i32
    %c0_i32_0 = arith.constant 0 : i32
    %c0_i32_1 = arith.constant 0 : i32
    %c0_i32_2 = arith.constant 0 : i32
    %c0_i32_3 = arith.constant 0 : i32
    return %c0_i32, %c0_i32_0, %c0_i32_1, %c0_i32_2 : i32, i32, i32, i32
  }
  func.func @transform_2(%arg0: i32) -> (i32, i32, i32, i32) {
    %c0_i32 = arith.constant 0 : i32
    %c0_i32_0 = arith.constant 0 : i32
    %c0_i32_1 = arith.constant 0 : i32
    %c0_i32_2 = arith.constant 0 : i32
    %c0_i32_3 = arith.constant 0 : i32
    return %c0_i32, %c0_i32_0, %c0_i32_1, %c0_i32_2 : i32, i32, i32, i32
  }
  func.func @transform_3(%arg0: i32) -> (i32, i32, i32, i32) {
    %c0_i32 = arith.constant 0 : i32
    %c0_i32_0 = arith.constant 0 : i32
    %c0_i32_1 = arith.constant 0 : i32
    %c0_i32_2 = arith.constant 0 : i32
    %c0_i32_3 = arith.constant 0 : i32
    return %c0_i32, %c0_i32_0, %c0_i32_1, %c0_i32_2 : i32, i32, i32, i32
  }
  func.func @transform_4(%arg0: i32) -> (i32, i32, i32, i32) {
    %c0_i32 = arith.constant 0 : i32
    %c0_i32_0 = arith.constant 0 : i32
    %c0_i32_1 = arith.constant 0 : i32
    %c0_i32_2 = arith.constant 0 : i32
    %c0_i32_3 = arith.constant 0 : i32
    return %c0_i32, %c0_i32_0, %c0_i32_1, %c0_i32_2 : i32, i32, i32, i32
  }
  func.func @transform_5(%arg0: i32) -> (i32, i32, i32, i32) {
    %c0_i32 = arith.constant 0 : i32
    %c0_i32_0 = arith.constant 0 : i32
    %c0_i32_1 = arith.constant 0 : i32
    %c0_i32_2 = arith.constant 0 : i32
    %c0_i32_3 = arith.constant 0 : i32
    return %c0_i32, %c0_i32_0, %c0_i32_1, %c0_i32_2 : i32, i32, i32, i32
  }
  func.func @transform_6(%arg0: i32) -> (i32, i32, i32, i32) {
    %c0_i32 = arith.constant 0 : i32
    %c0_i32_0 = arith.constant 0 : i32
    %c0_i32_1 = arith.constant 0 : i32
    %c0_i32_2 = arith.constant 0 : i32
    %c0_i32_3 = arith.constant 0 : i32
    return %c0_i32, %c0_i32_0, %c0_i32_1, %c0_i32_2 : i32, i32, i32, i32
  }
  func.func @transform_7(%arg0: i32) -> (i32, i32, i32, i32) {
    %c0_i32 = arith.constant 0 : i32
    %c0_i32_0 = arith.constant 0 : i32
    %c0_i32_1 = arith.constant 0 : i32
    %c0_i32_2 = arith.constant 0 : i32
    %c0_i32_3 = arith.constant 0 : i32
    return %c0_i32, %c0_i32_0, %c0_i32_1, %c0_i32_2 : i32, i32, i32, i32
  }
  func.func @transform_8(%arg0: i32) -> (i32, i32, i32) {
    %c0_i32 = arith.constant 0 : i32
    %c0_i32_0 = arith.constant 0 : i32
    %c0_i32_1 = arith.constant 0 : i32
    %c0_i32_2 = arith.constant 0 : i32
    return %c0_i32, %c0_i32_0, %c0_i32_1 : i32, i32, i32
  }
  func.func @transform_9(%arg0: i32) -> (i32, i32, i32) {
    %c0_i32 = arith.constant 0 : i32
    %c0_i32_0 = arith.constant 0 : i32
    %c0_i32_1 = arith.constant 0 : i32
    %c0_i32_2 = arith.constant 0 : i32
    return %c0_i32, %c0_i32_0, %c0_i32_1 : i32, i32, i32
  }
  func.func @transform_10(%arg0: i32) -> (i32, i32, i32) {
    %c0_i32 = arith.constant 0 : i32
    %c0_i32_0 = arith.constant 0 : i32
    %c0_i32_1 = arith.constant 0 : i32
    %c0_i32_2 = arith.constant 0 : i32
    return %c0_i32, %c0_i32_0, %c0_i32_1 : i32, i32, i32
  }
  func.func @transform_11(%arg0: i32) -> (i32, i32, i32) {
    %c0_i32 = arith.constant 0 : i32
    %c0_i32_0 = arith.constant 0 : i32
    %c0_i32_1 = arith.constant 0 : i32
    %c0_i32_2 = arith.constant 0 : i32
    return %c0_i32, %c0_i32_0, %c0_i32_1 : i32, i32, i32
  }
  func.func @transform_12(%arg0: i32) -> (i32, i32, i32) {
    %c0_i32 = arith.constant 0 : i32
    %c0_i32_0 = arith.constant 0 : i32
    %c0_i32_1 = arith.constant 0 : i32
    %c0_i32_2 = arith.constant 0 : i32
    return %c0_i32, %c0_i32_0, %c0_i32_1 : i32, i32, i32
  }
  func.func @transform_13(%arg0: i32) -> (i32, i32, i32) {
    %c0_i32 = arith.constant 0 : i32
    %c0_i32_0 = arith.constant 0 : i32
    %c0_i32_1 = arith.constant 0 : i32
    %c0_i32_2 = arith.constant 0 : i32
    return %c0_i32, %c0_i32_0, %c0_i32_1 : i32, i32, i32
  }
  func.func @transform_14(%arg0: i32) -> (i32, i32, i32) {
    %c0_i32 = arith.constant 0 : i32
    %c0_i32_0 = arith.constant 0 : i32
    %c0_i32_1 = arith.constant 0 : i32
    %c0_i32_2 = arith.constant 0 : i32
    return %c0_i32, %c0_i32_0, %c0_i32_1 : i32, i32, i32
  }
  func.func @transform_15(%arg0: i32) -> (i32, i32, i32) {
    %c0_i32 = arith.constant 0 : i32
    %c0_i32_0 = arith.constant 0 : i32
    %c0_i32_1 = arith.constant 0 : i32
    %c0_i32_2 = arith.constant 0 : i32
    return %c0_i32, %c0_i32_0, %c0_i32_1 : i32, i32, i32
  }
  func.func @transform_16(%arg0: i32) -> (i32, i32, i32) {
    %c0_i32 = arith.constant 0 : i32
    %c0_i32_0 = arith.constant 0 : i32
    %c0_i32_1 = arith.constant 0 : i32
    %c0_i32_2 = arith.constant 0 : i32
    return %c0_i32, %c0_i32_0, %c0_i32_1 : i32, i32, i32
  }
  func.func @transform_17(%arg0: i32) -> (i32, i32, i32) {
    %c0_i32 = arith.constant 0 : i32
    %c0_i32_0 = arith.constant 0 : i32
    %c0_i32_1 = arith.constant 0 : i32
    %c0_i32_2 = arith.constant 0 : i32
    return %c0_i32, %c0_i32_0, %c0_i32_1 : i32, i32, i32
  }
  func.func @transform_18(%arg0: i32) -> (i32, i32) {
    %c0_i32 = arith.constant 0 : i32
    %c0_i32_0 = arith.constant 0 : i32
    %c0_i32_1 = arith.constant 0 : i32
    return %c0_i32, %c0_i32_0 : i32, i32
  }
  func.func @transform_19(%arg0: i32) -> (i32, i32, i32) {
    %c0_i32 = arith.constant 0 : i32
    %c0_i32_0 = arith.constant 0 : i32
    %c0_i32_1 = arith.constant 0 : i32
    return %arg0, %c0_i32, %c0_i32_0 : i32, i32, i32
  }
}

</mosaic_0001>

<bundles_post_ra>
// kernel: tpu_custom_call.1
= control target key start
LH: loop header
LB: loop body
LE: loop exit
PB: predicated region body
PF: predicated region fallthrough
CT: control target
= control target key end

     0   :  { %s10661_s0 = inlined_call_operand.vmem [shape: f32[2,8,32], index: 0, kind: input, shape index: {}]   ;;  %s10662_s1 = inlined_call_operand.vmem [shape: bf16[2,2,32,16], index: 1, kind: input, shape index: {}]   ;;  %s10663_s2 = inlined_call_operand.vmem [shape: f32[2,2,1,16], index: 2, kind: input, shape index: {}]   ;;  %s10664_s3 = inlined_call_operand.vmem [shape: bf16[2,2,32,16], index: 3, kind: input, shape index: {}]   ;;  %s10665_s4 = inlined_call_operand.vmem [shape: f32[2,2,1,16], index: 4, kind: input, shape index: {}]   ;;  %s10666_s5 = inlined_call_operand.vmem [shape: bf16[2,2,32,16], index: 5, kind: input, shape index: {}]   ;;  %s10667_s6 = inlined_call_operand.vmem [shape: f32[2,2,1,16], index: 6, kind: input, shape index: {}]   ;;  %s10668_s7 = inlined_call_operand.vmem [shape: bf16[2,2,16,32], index: 7, kind: input, shape index: {}]   ;;  %s10669_s8 = inlined_call_operand.vmem [shape: f32[2,1,32], index: 8, kind: input, shape index: {}]   ;;  %s10670_s9 = inlined_call_operand.vmem [shape: f32[2,1,32], index: 9, kind: input, shape index: {}]   ;;  %s10671_s10 = inlined_call_operand.vmem [shape: f32[2,1,32], index: 10, kind: input, shape index: {}]   ;;  %s10672_s11 = inlined_call_operand.vmem [shape: bf16[2,32,2048], index: 11, kind: input, shape index: {}]   ;;  %s10673_s12 = inlined_call_operand.vmem [shape: f32[2,1,2048], index: 12, kind: input, shape index: {}]   ;;  %s10674_s13 = inlined_call_operand.vmem [shape: bf16[2,2048,32], index: 13, kind: input, shape index: {}]   ;;  %s10675_s14 = inlined_call_operand.vmem [shape: f32[2,1,32], index: 14, kind: input, shape index: {}]   ;;  %s10676_s15 = inlined_call_operand.vmem [shape: f32[2,1,32], index: 15, kind: input, shape index: {}]   ;;  %s10677_s16 = inlined_call_operand.vmem [shape: f32[2,1,32], index: 16, kind: input, shape index: {}]   ;;  %s10678_s17 = inlined_call_operand.vmem [shape: f32[8,32,5], index: 17, kind: input, shape index: {}]   ;;  %s10679_s18 = inlined_call_operand.vmem [shape: f32[1,5], index: 18, kind: input, shape index: {}]   ;;  %s10680_s19 = inlined_call_operand.hbm [shape: f32[2,1,5], index: 19, kind: output, shape index: {}]  }
   0x1   :  { %10691 = sst [smem:[#allocation11_spill]] %s10661_s0 }
   0x2   :  { %10692 = sst [smem:[#allocation12_spill]] %s10662_s1 }
   0x3   :  { %10693 = sst [smem:[#allocation13_spill]] %s10663_s2 }
   0x4   :  { %10694 = sst [smem:[#allocation14_spill]] %s10664_s3 }
   0x5   :  { %10695 = sst [smem:[#allocation15_spill]] %s10665_s4 }
   0x6   :  { %10696 = sst [smem:[#allocation16_spill]] %s10666_s5 }
   0x7   :  { %10697 = sst [smem:[#allocation17_spill]] %s10680_s19 }
   0x8   :  { %24 = vsyncpa [#allocation3], 0 }
   0x9   :  { %26 = vsyncpa [#allocation3 + $0x1], 0  ;;  %s8928_s0 = smov 0   ;;  %s8930_s30 = smov 0  }
   0xa   :  { %s8932_s20 = smov 0   ;;  %s8934_s21 = smov 0  }
   0xb LB: > { %10698 = sst [smem:[#allocation5_spill]] %s8809_s0  ;;  %s8949_s1 = sadd.s32 4294967295, %s8821_s21   ;;  %s8821_s21 = sphi %s8934_s21, %s10716_s21   ;;  %s8817_s20 = sphi %s8932_s20, %s10721_s20   ;;  %s8813_s30 = sphi %s8930_s30, %s10720_s30   ;;  %s8809_s0 = sphi %s8928_s0, %s10719_s0  }
   0xc   : > { %10699 = sst [smem:[#allocation6_spill]] %s8817_s20  ;;  %s6850_s22 = sadd.s32 4294967294, %s8821_s21  }
   0xd   : > { %10700 = sst [smem:[#allocation7_spill]] %s8821_s21  ;;  %s8953_s2 = sadd.s32 1, %s8821_s21  }
   0xe   : > { %10701 = sst [smem:[#allocation8_spill]] %s8953_s2  ;;  %s443_s23 = sadd.s32 1, %s8817_s20 }
   0xf   : > { %s440_s24 = ssub.s32 %s8821_s21, %s8953_s2  ;;  %p453_p0 = scmp.ne.s32.totalorder %s8817_s20, %s8813_s30 }
  0x10   : > { %p441_p1 = scmp.eq.s32.totalorder %s440_s24, 0  ;;  %p454_p2 = scmp.eq.s32.totalorder %s8949_s1, 1 }
  0x11   : > { %p459_p3 = scmp.ne.s32.totalorder %s8813_s30, %s8809_s0  ;;  %p460_p4 = scmp.eq.s32.totalorder %s6850_s22, 1 }
  0x12   : > { %s8964_s25 = scalar_select %p441_p1, %s8817_s20, %s443_s23  }
  0x13   : > { %p8966_p5 = por %p454_p2, %p453_p0  ;;  %p8970_p6 = por %p460_p4, %p459_p3 }
  0x14   : > { %10702 = sst [smem:[#allocation9_spill]] %s8964_s25  ;;  %p6853_p7 = scmp.ge.s32.totalorder %s8821_s21, 1 }
  0x15   : > { %s10704_s26 = scalar_select %p8970_p6, 1, 0 }
  0x16   : > { %p539_p8 = scmp.lt.s32.totalorder %s8821_s21, 3 }
  0x17   : > { %10705 = sst [smem:[#allocation10_spill]] %s10704_s26 }
  0x18   : > { %p540_p9 = pnand %p6853_p7, %p539_p8 }
  0x19   : > { %s10706_s29 = sld [smem:[#allocation12_spill]] (!%p540_p9)  ;;  %v8823_v1 = vmov (!%p540_p9), 0.0   ;;  %vm8824_vm0 = vmmov (!%p540_p9), 0   ;;  %p593_p10 = scmp.lt.s32.totalorder (!%p540_p9), %s8949_s1, 1  ;;  %vm634_vm1 = vcmask (!%p540_p9), 261120   ;;  %vm986_vm2 = vcmask (!%p540_p9), 130048  }
  0x1a   : > { %543 = sbr.rel (%p540_p9) target bundleno = 5081 (0x13d9), region = 96  ;;  %8088 = vmatprep.subr.bf16.mxu0 (!%p540_p9), %v8823_v1  ;;  %8096 = vmatprep.subr.bf16.mxu1 (!%p540_p9), %v8823_v1  ;;  %s10707_s20 = sld [smem:[#allocation11_spill]] (!%p540_p9)  ;;  %v6871_v45 = vld [vmem:[%s10667_s6] ss:$0 sm:$0xff] (!%p540_p9)  ;;  %v6872_v46 = vld [vmem:[%s10667_s6 + $0x1] ss:$0 sm:$0xff] (!%p540_p9) }
  0x1b   : > { %8092 = vmatprep.mubr.msk.bf16.mxu0 (!%p540_p9), %vm8824_vm0, %v8823_v1  ;;  %8100 = vmatprep.mubr.msk.bf16.mxu1 (!%p540_p9), %vm8824_vm0, %v8823_v1  ;;  %s10708_s28 = sld [smem:[#allocation14_spill]] (!%p540_p9)  ;;  %s10709_s5 = sld [smem:[#allocation16_spill]] (!%p540_p9)  ;;  %vm1111_vm3 = vcmask (!%p540_p9), 1043456   ;;  %vm1081_vm4 = vcmask (!%p540_p9), 64512   ;;  %vm6780_vm5 = vcmask (!%p540_p9), 32768  }
  0x1c   : > { %s10710_s4 = sld [smem:[#allocation15_spill]] (!%p540_p9)  ;;  %s7633_s21 = sshll.u32 (!%p540_p9), %s8949_s1, 4 }
  0x1f   : > { %v8450_v0 = vld [vmem:[%s10706_s29] sm:$0xff] (!%p540_p9)   ;;  %v8451_v2 = vld [vmem:[%s10706_s29 + $0x10] sm:$0xff] (!%p540_p9)   ;;  %v8452_v3 = vld [vmem:[%s10706_s29 + $0x8] sm:$0xff] (!%p540_p9)  }
  0x20   : > { %8089 = vmatpush3.bf16.msra.mxu0 (!%p540_p9), %v8450_v0  ;;  %8097 = vmatpush3.bf16.msra.mxu1 (!%p540_p9), %v8451_v2  ;;  %v8453_v4 = vld [vmem:[%s10706_s29 + $0x18] sm:$0xff] (!%p540_p9)  }
  0x21   : > { %8090 = vmatprep.subr.bf16.mxu0 %v8823_v1  ;;  %8098 = vmatprep.subr.bf16.mxu1 %v8823_v1  ;;  %s594_s22 = scalar_select %p593_p10, %s8949_s1, 1  ;;  %v8454_v5 = vld [vmem:[%s10708_s28] sm:$0xff]   ;;  %v8455_v7 = vld [vmem:[%s10708_s28 + $0x10] sm:$0xff]   ;;  %v8456_v9 = vld [vmem:[%s10708_s28 + $0x8] sm:$0xff]  }
  0x22   : > { %v8457_v10 = vld [vmem:[%s10708_s28 + $0x18] sm:$0xff]   ;;  %v8458_v11 = vld [vmem:[%s10709_s5] sm:$0xff]   ;;  %v8459_v12 = vld [vmem:[%s10709_s5 + $0x10] sm:$0xff]   ;;  %s8827_s1 = smov [#allocation2]  }
  0x23   : > { %s6854_s25 = sshll.u32 %s594_s22, 3  ;;  %v8460_v13 = vld [vmem:[%s10709_s5 + $0x8] sm:$0xff]   ;;  %v8461_v14 = vld [vmem:[%s10709_s5 + $0x18] sm:$0xff]   ;;  %v6863_v23 = vld [vmem:[%s10710_s4] ss:$0 sm:$0xff]  ;;  %s10711_s22 = sld [smem:[#allocation13_spill]] }
  0x24   : > { %8091 = vmatpush3.bf16.msra.mxu0 %v8452_v3  ;;  %8099 = vmatpush3.bf16.msra.mxu1 %v8453_v4  ;;  %s9001_s2 = scalar_lea.vmem %s10707_s20, %s6854_s25  ;;  %v6864_v24 = vld [vmem:[%s10710_s4 + $0x1] ss:$0 sm:$0xff]  ;;  %s591_s20 = sand.u32 1, %s8813_s30  }
  0x25   : > { %8104 = vmatprep.subr.bf16.mxu0 %v8823_v1  ;;  %v598_v6 = vld [vmem:[%s9001_s2] sm:$0xff]  ;;  %8112 = vmatprep.subr.bf16.mxu1 %v8823_v1  ;;  %s592_s26 = scalar_lea.vmem [#allocation2], %s591_s20  ;;  %s6783_s25 = scalar_lea.sflag [#allocation3], %s591_s20 }
  0x26   : > { %v599_v8 = vpack.c.bf16 %v598_v6, %v598_v6  ;;  %s6795_s24 = sshll.u32 %s592_s26, 4  ;;  %s10621_s24 = int_to_ptr.vmem [resolvable:$true] %s6795_s24 }
  0x27   : > { %s8759_s0 = scalar_lea.vmem %s10621_s24, 16 }
  0x28   : > { %8093 = vmatmul.mubr.msk.bf16.vlgmr.msra.gmra.mrb[0].mxu0 %vm634_vm1, %v599_v8  ;;  %8101 = vmatmul.mubr.msk.bf16.vlgmr.msra.gmra.mrb[0].mxu1 %vm634_vm1, %v599_v8  ;;  %p8760_p11 = scmp.ne.s32.totalorder %s10621_s24, %s8759_s0 }
  0x29   : > { %8105 = vmatpush3.bf16.msra.mxu0 %v8454_v5  ;;  %8113 = vmatpush3.bf16.msra.mxu1 %v8455_v7  ;;  %v6855_v37 = vld [vmem:[%s10711_s22] ss:$0 sm:$0xff]  ;;  %v6856_v38 = vld [vmem:[%s10711_s22 + $0x1] ss:$0 sm:$0xff] }
  0x2a   : > { %8106 = vmatprep.subr.bf16.mxu0 %v8823_v1  ;;  %8114 = vmatprep.subr.bf16.mxu1 %v8823_v1  ;;  %p8761_p12 = pnand %p8760_p11, %p8966_p5 }
  0x2b   : > { %8108 = vmatprep.mubr.msk.bf16.mxu0 %vm8824_vm0, %v8823_v1  ;;  %8116 = vmatprep.mubr.msk.bf16.mxu1 %vm8824_vm0, %v8823_v1 }
  0x2c   : > { %p8762_p13 = pneg %p8761_p12 }
  0x2d   : > { %8107 = vmatpush3.bf16.msra.mxu0 %v8456_v9  ;;  %8115 = vmatpush3.bf16.msra.mxu1 %v8457_v10 }
  0x2e   : > { %8120 = vmatprep.subr.bf16.mxu0 %v8823_v1  ;;  %8128 = vmatprep.subr.bf16.mxu1 %v8823_v1 }
  0x30   : > { %8109 = vmatmul.mubr.msk.bf16.vlgmr.msra.gmra.mrb[4].mxu0 %vm634_vm1, %v599_v8  ;;  %8117 = vmatmul.mubr.msk.bf16.vlgmr.msra.gmra.mrb[4].mxu1 %vm634_vm1, %v599_v8 }
  0x31   : > { %8124 = vmatprep.mubr.msk.bf16.mxu0 %vm8824_vm0, %v8823_v1  ;;  %8132 = vmatprep.mubr.msk.bf16.mxu1 %vm8824_vm0, %v8823_v1 }
  0x32   : > { %8121 = vmatpush3.bf16.msra.mxu0 %v8458_v11  ;;  %8129 = vmatpush3.bf16.msra.mxu1 %v8459_v12 }
  0x33   : > { %8122 = vmatprep.subr.bf16.mxu0 %v8823_v1  ;;  %8130 = vmatprep.subr.bf16.mxu1 %v8823_v1 }
  0x36   : > { %8123 = vmatpush3.bf16.msra.mxu0 %v8460_v13  ;;  %8131 = vmatpush3.bf16.msra.mxu1 %v8461_v14 }
  0x37   : > { %8136 = vmatprep.subr.bf16.mxu0 %v8823_v1  ;;  %8142 = vmatprep.subr.bf16.mxu1 %v8823_v1 }
  0x39   : > { %8125 = vmatmul.mubr.msk.bf16.vlgmr.msra.gmra.mrb[8].mxu0 %vm634_vm1, %v599_v8  ;;  %8133 = vmatmul.mubr.msk.bf16.vlgmr.msra.gmra.mrb[8].mxu1 %vm634_vm1, %v599_v8 }
  0x3a   : > { %8138 = vmatprep.mubr.msk.bf16.mxu0 %vm8824_vm0, %v8823_v1  ;;  %8144 = vmatprep.mubr.msk.bf16.mxu1 %vm8824_vm0, %v8823_v1 }
  0xfb   : > { %v672_v15 = vpop.f32.mrb[0].mxu0  ;;  %v724_v16 = vpop.f32.mrb[0].mxu1 }
  0xfc   : > { %v8094_v17 = vpop.f32.mrb[1].mxu0  ;;  %v8102_v18 = vpop.f32.mrb[1].mxu1  ;;  %v673_v41 = vadd.f32 %v6855_v37, %v672_v15  ;;  %v725_v42 = vadd.f32 %v6856_v38, %v724_v16 }
  0xfd   : > { %v675_v19 = vpop.f32.mrb[2].mxu0  ;;  %v727_v20 = vpop.f32.mrb[2].mxu1 }
  0xfe   : > { %v8095_v21 = vpop.f32.mrb[3].mxu0  ;;  %v8103_v22 = vpop.f32.mrb[3].mxu1  ;;  %v982_v43 = vpack.c.bf16 %v673_v41, %v673_v41  ;;  %v983_v44 = vpack.c.bf16 %v725_v42, %v725_v42 }
 0x103   : > { %v798_v25 = vpop.f32.mrb[4].mxu0  ;;  %v850_v26 = vpop.f32.mrb[4].mxu1 }
 0x104   : > { %v799_v27 = vadd.f32 %v6863_v23, %v798_v25  ;;  %v851_v28 = vadd.f32 %v6864_v24, %v850_v26  ;;  %v8110_v29 = vpop.f32.mrb[5].mxu0  ;;  %v8118_v30 = vpop.f32.mrb[5].mxu1 }
 0x105   : > { %v801_v31 = vpop.f32.mrb[6].mxu0  ;;  %v853_v32 = vpop.f32.mrb[6].mxu1  ;;  %v8463_v29 = vld [vmem:[%s10668_s7 + $0x8] sm:$0xff]  }
 0x106   : > { %v984_v33 = vpack.c.bf16 %v799_v27, %v799_v27  ;;  %v985_v34 = vpack.c.bf16 %v851_v28, %v851_v28  ;;  %v8111_v35 = vpop.f32.mrb[7].mxu0  ;;  %v8119_v36 = vpop.f32.mrb[7].mxu1  ;;  %v8462_v28 = vld [vmem:[%s10668_s7] sm:$0xff]  }
 0x108   : > { %v991_v39 = vsel %vm986_vm2, %v984_v33, 0  ;;  %v1037_v40 = vsel %vm986_vm2, %v985_v34, 0 }
 0x109   : > { %8137 = vmatpush3.bf16.xpose.msra.mxu0 %v991_v39  ;;  %8143 = vmatpush3.bf16.xpose.msra.mxu1 %v1037_v40 }
 0x10a   : > { %8148 = vmatprep.subr.bf16.mxu0 %v8823_v1  ;;  %8154 = vmatprep.subr.bf16.mxu1 %v8823_v1 }
 0x10c   : > { %v924_v47 = vpop.f32.mrb[8].mxu0  ;;  %v976_v48 = vpop.f32.mrb[8].mxu1 }
 0x10d   : > { %v925_v49 = vadd.f32 %v6871_v45, %v924_v47  ;;  %v8126_v50 = vpop.f32.mrb[9].mxu0  ;;  %v977_v51 = vadd.f32 %v6872_v46, %v976_v48  ;;  %v8134_v52 = vpop.f32.mrb[9].mxu1  ;;  %v6887_v47 = vld [vmem:[%s10669_s8] ss:$0 sm:$0xff] }
 0x10e   : > { %v927_v53 = vpop.f32.mrb[10].mxu0  ;;  %v979_v54 = vpop.f32.mrb[10].mxu1 }
 0x10f   : > { %v1106_v55 = vpack.c.bf16 %v925_v49, %v925_v49  ;;  %v8127_v56 = vpop.f32.mrb[11].mxu0  ;;  %v1107_v57 = vpack.c.bf16 %v977_v51, %v977_v51  ;;  %v8135_v58 = vpop.f32.mrb[11].mxu1  ;;  %v8758_v53 = vld [vmem:[%s9001_s2] sm:$0xff]  ;;  %s10712_s2 = sld [smem:[#allocation17_spill]] }
 0x110   : > { %8139 = vmatmul.mubr.msk.bf16.vlgmr.msra.gmra.mrb[12].mxu0 %vm986_vm2, %v982_v43  ;;  %8145 = vmatmul.mubr.msk.bf16.vlgmr.msra.gmra.mrb[12].mxu1 %vm986_vm2, %v983_v44 }
 0x111   : > { %8150 = vmatprep.mubr.msk.bf16.mxu0 %vm8824_vm0, %v8823_v1  ;;  %8156 = vmatprep.mubr.msk.bf16.mxu1 %vm8824_vm0, %v8823_v1  ;;  %v1113_v59 = vsel %vm1111_vm3, %v1106_v55, 0  ;;  %v1159_v60 = vsel %vm1111_vm3, %v1107_v57, 0 }
 0x112   : > { %8149 = vmatpush3.bf16.msra.mxu0 %v1113_v59  ;;  %8155 = vmatpush3.bf16.msra.mxu1 %v1159_v60 }
 0x113   : > { %8160 = vmatprep.subr.bf16.mxu0 %v8823_v1  ;;  %8166 = vmatprep.subr.bf16.mxu1 %v8823_v1 }
 0x115   : > { %s10619_s23 = scalar_lea.hbm %s10712_s2, %s7633_s21 }
 0x1e3   : > { %v1027_v61 = vpop.f32.mrb[12].mxu0  ;;  %v1073_v62 = vpop.f32.mrb[12].mxu1 }
 0x1e4   : > { %v1079_v63 = vmul.f32 0.25, %v1027_v61  ;;  %v8140_v0 = vpop.f32.mrb[13].mxu0  ;;  %v8146_v2 = vpop.f32.mrb[13].mxu1  ;;  %v1080_v5 = vmul.f32 0.25, %v1073_v62  ;;  %v1348_v61 = vld [vmem:[%s10672_s11] sm:$0xff] }
 0x1e5   : > { %v1030_v3 = vpop.f32.mrb[14].mxu0  ;;  %v1076_v4 = vpop.f32.mrb[14].mxu1  ;;  %v1356_v62 = vld [vmem:[%s10672_s11 + $0x40] sm:$0xff]  ;;  %v1357_v2 = vld [vmem:[%s10672_s11 + $0x48] sm:$0xff] }
 0x1e6   : > { %v8141_v6 = vpop.f32.mrb[15].mxu0  ;;  %v8147_v7 = vpop.f32.mrb[15].mxu1  ;;  %v1082_v8 = vsel %vm1081_vm4, %v1079_v63, -inf  ;;  %v1085_v9 = vsel %vm1081_vm4, %v1080_v5, -inf  ;;  %v6891_v0 = vcombine.high %v1348_v61, %v1356_v62  ;;  %v6890_v3 = vcombine.low %v1348_v61, %v1356_v62 }
 0x1e7   : > { %1083 = vmax.xlane.f32.xlu0 %v1082_v8  ;;  %v1364_v6 = vld [vmem:[%s10672_s11 + $0x80] sm:$0xff]  ;;  %v1365_v8 = vld [vmem:[%s10672_s11 + $0x88] sm:$0xff] }
 0x1e8   : > { %v1372_v7 = vld [vmem:[%s10672_s11 + $0xc0] sm:$0xff] }
 0x1eb   : > { %1086 = vmax.xlane.f32.xlu0 %v1085_v9  ;;  %v6907_v9 = vcombine.high %v1364_v6, %v1372_v7 }
 0x274   : > { %v1084_v10 = vpop.xlane.xlu0 %1083 }
 0x275   : > { %v1088_v11 = vsub.f32 %v1079_v63, %v1084_v10  ;;  %v1349_v63 = vld [vmem:[%s10672_s11 + $0x8] sm:$0xff] }
 0x276   : > { %v6892_v4 = vcombine.low %v1349_v63, %v1357_v2  ;;  %v1373_v10 = vld [vmem:[%s10672_s11 + $0xc8] sm:$0xff] }
 0x277   : > { %v1090_v12 = vmul.f32 1.442695, %v1088_v11  ;;  %v6906_v11 = vcombine.low %v1364_v6, %v1372_v7 }
 0x278   : > { %v1087_v13 = vpop.xlane.xlu0 %1086 }
 0x279   : > { %8734 = vpow2.f32 %v1090_v12  ;;  %v1089_v14 = vsub.f32 %v1080_v5, %v1087_v13  ;;  %v6893_v5 = vcombine.high %v1349_v63, %v1357_v2  ;;  %v6908_v12 = vcombine.low %v1365_v8, %v1373_v10  ;;  %v1370_v63 = vld [vmem:[%s10672_s11 + $0xb0] sm:$0xff]  ;;  %v1371_v2 = vld [vmem:[%s10672_s11 + $0xb8] sm:$0xff] }
 0x27a   : > { %v6909_v13 = vcombine.high %v1365_v8, %v1373_v10  ;;  %v8464_v10 = vld [vmem:[%s10674_s13 + $0x40] sm:$0xff]  }
 0x27b   : > { %v1092_v15 = vmul.f32 1.442695, %v1089_v14  ;;  %v1350_v14 = vld [vmem:[%s10672_s11 + $0x10] sm:$0xff] }
 0x27d   : > { %8736 = vpow2.f32 %v1092_v15  ;;  %v1358_v15 = vld [vmem:[%s10672_s11 + $0x50] sm:$0xff] }
 0x283   : > { %v8735_v16 = vpop.eup %8734 }
 0x284   : > { %v1094_v17 = vsel %vm1081_vm4, %v8735_v16, 0.0 }
 0x285   : > { %1095 = vadd.xlane.f32.xlu1 %v1094_v17  ;;  %v6895_v17 = vcombine.high %v1350_v14, %v1358_v15 }
 0x287   : > { %v8737_v18 = vpop.eup %8736 }
 0x288   : > { %v1097_v19 = vsel %vm1081_vm4, %v8737_v18, 0.0 }
 0x289   : > { %1098 = vadd.xlane.f32.xlu1 %v1097_v19  ;;  %v8825_v19 = vmov 0  }
 0x312   : > { %v1096_v20 = vpop.xlane.xlu1 %1095 }
 0x313   : > { %8738 = vrcp.f32 %v1096_v20  ;;  %v6894_v20 = vcombine.low %v1350_v14, %v1358_v15  ;;  %v8466_v14 = vld [vmem:[%s10674_s13 + $0x48] sm:$0xff]  }
 0x314   : > { %v8473_v15 = vld [vmem:[%s10674_s13 + $0x148] sm:$0xff]  }
 0x316   : > { %v1099_v21 = vpop.xlane.xlu1 %1098 }
 0x317   : > { %8740 = vrcp.f32 %v1099_v21 }
 0x31d   : > { %v8739_v22 = vpop.eup %8738 }
 0x31e   : > { %v1101_v23 = vmul.f32 %v8739_v22, %v8735_v16  ;;  %v1351_v16 = vld [vmem:[%s10672_s11 + $0x18] sm:$0xff] }
 0x320   : > { %v1104_v24 = vpack.c.bf16 %v1101_v23, %v1101_v23 }
 0x321   : > { %v8741_v25 = vpop.eup %8740 }
 0x322   : > { %v1103_v26 = vmul.f32 %v8741_v25, %v8737_v18  ;;  %8151 = vmatmul.mubr.msk.bf16.vlgmr.msra.gmra.mrb[16].mxu0 %vm1081_vm4, %v1104_v24  ;;  %v1359_v18 = vld [vmem:[%s10672_s11 + $0x58] sm:$0xff] }
 0x323   : > { %8162 = vmatprep.mubr.msk.bf16.mxu0 %vm8824_vm0, %v8823_v1  ;;  %8161 = vmatpush3.bf16.msra.mxu0 %v8462_v28  ;;  %v6896_v21 = vcombine.low %v1351_v16, %v1359_v18  ;;  %v6897_v22 = vcombine.high %v1351_v16, %v1359_v18  ;;  %v8467_v16 = vld [vmem:[%s10674_s13 + $0x8] sm:$0xff]   ;;  %v8468_v18 = vld [vmem:[%s10674_s13 + $0x50] sm:$0xff]  }
 0x324   : > { %v1105_v27 = vpack.c.bf16 %v1103_v26, %v1103_v26  ;;  %1627 = vmatprep.subr.bf16.mxu0 %v6891_v0  ;;  %v1378_v0 = vld [vmem:[%s10672_s11 + $0xf0] sm:$0xff] }
 0x325   : > { %v6919_v6 = vcombine.high %v1370_v63, %v1378_v0  ;;  %v6918_v8 = vcombine.low %v1370_v63, %v1378_v0 }
 0x326   : > { %8157 = vmatmul.mubr.msk.bf16.vlgmr.msra.gmra.mrb[16].mxu1 %vm1081_vm4, %v1105_v27  ;;  %v6888_v27 = vld [vmem:[%s10670_s9] ss:$0 sm:$0xff] }
 0x327   : > { %8168 = vmatprep.mubr.msk.bf16.mxu1 %vm8824_vm0, %v8823_v1  ;;  %8167 = vmatpush3.bf16.msra.mxu1 %v8463_v29  ;;  %v6889_v29 = vld [vmem:[%s10671_s10] ss:$0 sm:$0xff] }
 0x328   : > { %1668 = vmatprep.subr.bf16.mxu1 %v6893_v5 }
 0x3f5   : > { %v1149_v30 = vpop.f32.mrb[16].mxu0 }
 0x3f6   : > { %v1201_v31 = vpack.c.bf16 %v1149_v30, %v1149_v30  ;;  %v8152_v32 = vpop.f32.mrb[17].mxu0 }
 0x3f7   : > { %v1152_v33 = vpop.f32.mrb[18].mxu0  ;;  %v1374_v32 = vld [vmem:[%s10672_s11 + $0xd0] sm:$0xff] }
 0x3f8   : > { %v8153_v34 = vpop.f32.mrb[19].mxu0  ;;  %8163 = vmatmul.mubr.msk.bf16.vlgmr.msra.gmra.mrb[20].mxu0 %vm986_vm2, %v1201_v31  ;;  %v1366_v31 = vld [vmem:[%s10672_s11 + $0x90] sm:$0xff]  ;;  %v1367_v33 = vld [vmem:[%s10672_s11 + $0x98] sm:$0xff] }
 0x3f9   : > { %v1195_v35 = vpop.f32.mrb[16].mxu1  ;;  %1628 = vmatpush1.bf16.msra.mxu0 %v6890_v3  ;;  %1659 = vmatprep.mubr.bf16.mxu0 %v8825_v19  ;;  %v1375_v34 = vld [vmem:[%s10672_s11 + $0xd8] sm:$0xff] }
 0x3fa   : > { %v1202_v36 = vpack.c.bf16 %v1195_v35, %v1195_v35  ;;  %v8158_v37 = vpop.f32.mrb[17].mxu1  ;;  %1629 = vmatprep.subr.bf16.mxu0 %v6907_v9  ;;  %v1379_v3 = vld [vmem:[%s10672_s11 + $0xf8] sm:$0xff] }
 0x3fb   : > { %v1198_v38 = vpop.f32.mrb[18].mxu1  ;;  %v6911_v37 = vcombine.high %v1366_v31, %v1374_v32  ;;  %v6921_v7 = vcombine.high %v1371_v2, %v1379_v3  ;;  %v6920_v9 = vcombine.low %v1371_v2, %v1379_v3 }
 0x3fc   : > { %v8159_v39 = vpop.f32.mrb[19].mxu1  ;;  %8169 = vmatmul.mubr.msk.bf16.vlgmr.msra.gmra.mrb[20].mxu1 %vm986_vm2, %v1202_v36  ;;  %v6913_v38 = vcombine.high %v1367_v33, %v1375_v34 }
 0x3fd   : > { %1669 = vmatpush1.bf16.msra.mxu1 %v6892_v4  ;;  %1630 = vmatpush1.bf16.msra.mxu0 %v6906_v11  ;;  %v1352_v39 = vld [vmem:[%s10672_s11 + $0x20] sm:$0xff] }
 0x3fe   : > { %1670 = vmatprep.subr.bf16.mxu1 %v6909_v13  ;;  %1700 = vmatprep.mubr.bf16.mxu1 %v8825_v19  ;;  %v8469_v11 = vld [vmem:[%s10674_s13 + $0x140] sm:$0xff]  }
 0x3ff   : > { %1709 = vmatprep.subr.bf16.mxu0 %v6895_v17  ;;  %v8471_v13 = vld [vmem:[%s10674_s13 + $0x100] sm:$0xff]   ;;  %v8475_v17 = vld [vmem:[%s10674_s13 + $0x108] sm:$0xff]  }
 0x401   : > { %1671 = vmatpush1.bf16.msra.mxu1 %v6908_v12  ;;  %v8465_v12 = vld [vmem:[%s10674_s13] sm:$0xff]  }
 0x402   : > { %1750 = vmatprep.subr.bf16.mxu1 %v6897_v22  ;;  %v8479_v22 = vld [vmem:[%s10674_s13 + $0x110] sm:$0xff]  }
 0x4cb   : > { %v1250_v40 = vpop.f32.mrb[20].mxu0 }
 0x4cc   : > { %v8164_v41 = vpop.f32.mrb[21].mxu0  ;;  %v1305_v45 = vsel %vm634_vm1, %v1250_v40, 0.0  ;;  %v1360_v40 = vld [vmem:[%s10672_s11 + $0x60] sm:$0xff] }
 0x4cd   : > { %v1253_v42 = vpop.f32.mrb[22].mxu0  ;;  %v1353_v41 = vld [vmem:[%s10672_s11 + $0x28] sm:$0xff] }
 0x4ce   : > { %v8165_v43 = vpop.f32.mrb[23].mxu0  ;;  %v1361_v42 = vld [vmem:[%s10672_s11 + $0x68] sm:$0xff] }
 0x4cf   : > { %v1299_v44 = vpop.f32.mrb[20].mxu1  ;;  %v6910_v43 = vcombine.low %v1366_v31, %v1374_v32  ;;  %v8484_v31 = vld [vmem:[%s10674_s13 + $0x70] sm:$0xff]   ;;  %v8485_v32 = vld [vmem:[%s10674_s13 + $0x160] sm:$0xff]  }
 0x4d0   : > { %v1306_v46 = vsel %vm634_vm1, %v1299_v44, 0.0  ;;  %v8170_v48 = vpop.f32.mrb[21].mxu1  ;;  %v6912_v44 = vcombine.low %v1367_v33, %v1375_v34  ;;  %v8486_v33 = vld [vmem:[%s10674_s13 + $0x30] sm:$0xff]   ;;  %v8487_v34 = vld [vmem:[%s10674_s13 + $0x120] sm:$0xff]  }
 0x4d1   : > { %v1307_v49 = vadd.f32 %v1306_v46, %v1305_v45  ;;  %v1302_v50 = vpop.f32.mrb[22].mxu1  ;;  %v6899_v45 = vcombine.high %v1352_v39, %v1360_v40  ;;  %v6901_v46 = vcombine.high %v1353_v41, %v1361_v42  ;;  %v1376_v48 = vld [vmem:[%s10672_s11 + $0xe0] sm:$0xff] }
 0x4d2   : > { %v8171_v51 = vpop.f32.mrb[23].mxu1  ;;  %v1377_v50 = vld [vmem:[%s10672_s11 + $0xe8] sm:$0xff] }
 0x4d3   : > { %v1315_v52 = vadd.f32 %v6887_v47, %v1307_v49  ;;  %v1368_v47 = vld [vmem:[%s10672_s11 + $0xa0] sm:$0xff]  ;;  %v1369_v49 = vld [vmem:[%s10672_s11 + $0xa8] sm:$0xff]  ;;  %v6898_v51 = vcombine.low %v1352_v39, %v1360_v40 }
 0x4d4   : > { %v8491_v39 = vld [vmem:[%s10674_s13 + $0x128] sm:$0xff]   ;;  %v8492_v40 = vld [vmem:[%s10674_s13 + $0xc0] sm:$0xff]  }
 0x4d5   : > { %v1316_v54 = vadd.f32 %v8758_v53, %v1315_v52  ;;  %v6900_v52 = vcombine.low %v1353_v41, %v1361_v42  ;;  %v6915_v53 = vcombine.high %v1368_v47, %v1376_v48  ;;  %v8493_v41 = vld [vmem:[%s10674_s13 + $0x170] sm:$0xff]  }
 0x4d6   : > { %v8495_v42 = vld [vmem:[%s10674_s13 + $0x130] sm:$0xff]  }
 0x4d7   : > { %v1319_v55 = vsel %vm634_vm1, %v1316_v54, 0.0 }
 0x4d8   : > { %1320 = vadd.xlane.f32.xlu0 %v1319_v55  ;;  %v1354_v55 = vld [vmem:[%s10672_s11 + $0x30] sm:$0xff] }
 0x565   : > { %v1321_v56 = vpop.xlane.xlu0 %1320 }
 0x566   : > { %v1323_v57 = vmul.f32 0.03125, %v1321_v56  ;;  %v1362_v56 = vld [vmem:[%s10672_s11 + $0x70] sm:$0xff] }
 0x567   : > { %v6903_v61 = vcombine.high %v1354_v55, %v1362_v56  ;;  %v6902_v4 = vcombine.low %v1354_v55, %v1362_v56 }
 0x568   : > { %v1324_v58 = vsub.f32 %v1316_v54, %v1323_v57  ;;  %v6917_v54 = vcombine.high %v1369_v49, %v1377_v50  ;;  %v1355_v57 = vld [vmem:[%s10672_s11 + $0x38] sm:$0xff] }
 0x56a   : > { %v1325_v59 = vmul.f32 %v1324_v58, %v1324_v58 }
 0x56c   : > { %v1326_v60 = vsel %vm634_vm1, %v1325_v59, 0.0  ;;  %v6914_v59 = vcombine.low %v1368_v47, %v1376_v48 }
 0x56d   : > { %1327 = vadd.xlane.f32.xlu1 %v1326_v60  ;;  %v6916_v60 = vcombine.low %v1369_v49, %v1377_v50  ;;  %v9356_v49 = vld [vmem:[%s10673_s12] sm:$0xff] }
 0x5fa   : > { %v1328_v23 = vpop.xlane.xlu1 %1327 }
 0x5fb   : > { %v1329_v24 = vmul.f32 0.03125, %v1328_v23  ;;  %v8472_v23 = vld [vmem:[%s10674_s13 + $0x58] sm:$0xff]  }
 0x5fd   : > { %v1330_v25 = vadd.f32 1e-05, %v1329_v24  ;;  %v8481_v24 = vld [vmem:[%s10674_s13 + $0x158] sm:$0xff]  }
 0x5ff   : > { %8742 = vrsqrt.f32 %v1330_v25  ;;  %v8474_v25 = vld [vmem:[%s10674_s13 + $0x18] sm:$0xff]  }
 0x609   : > { %v8743_v26 = vpop.eup %8742 }
 0x60a   : > { %v1332_v28 = vmul.f32 %v8743_v26, %v1324_v58  ;;  %v1363_v58 = vld [vmem:[%s10672_s11 + $0x78] sm:$0xff] }
 0x60b   : > { %v6905_v62 = vcombine.high %v1355_v57, %v1363_v58  ;;  %v6904_v5 = vcombine.low %v1355_v57, %v1363_v58  ;;  %v8483_v26 = vld [vmem:[%s10674_s13 + $0x118] sm:$0xff]  }
 0x60c   : > { %v1339_v30 = vmul.f32 %v6888_v27, %v1332_v28  ;;  %v8476_v27 = vld [vmem:[%s10674_s13 + $0x60] sm:$0xff]  }
 0x60d   : > { %v8478_v28 = vld [vmem:[%s10674_s13 + $0x20] sm:$0xff]  }
 0x60e   : > { %v9170_v35 = vadd.f32 %v6889_v29, %v1339_v30  ;;  %v8480_v29 = vld [vmem:[%s10674_s13 + $0x68] sm:$0xff]  }
 0x60f   : > { %v8482_v30 = vld [vmem:[%s10674_s13 + $0x28] sm:$0xff]  }
 0x610   : > { %v9174_v36 = vpack.c.bf16 %v9170_v35, %v9170_v35 }
 0x612   : > { %6922 = vmatmul.mubr.msk.bf16.vlgmr.msra.gmra.mrb[24].mxu0 %vm634_vm1, %v9174_v36  ;;  %6923 = vmatmul.mubr.msk.bf16.vlgmr.msra.gmra.mrb[24].mxu1 %vm634_vm1, %v9174_v36 }
 0x613   : > { %1710 = vmatpush1.bf16.msra.mxu0 %v6894_v20  ;;  %1751 = vmatpush1.bf16.msra.mxu1 %v6896_v21  ;;  %v8477_v20 = vld [vmem:[%s10674_s13 + $0x150] sm:$0xff]  }
 0x614   : > { %1711 = vmatprep.subr.bf16.mxu0 %v6911_v37  ;;  %1752 = vmatprep.subr.bf16.mxu1 %v6913_v38  ;;  %v8470_v21 = vld [vmem:[%s10674_s13 + $0x10] sm:$0xff]   ;;  %v8489_v37 = vld [vmem:[%s10674_s13 + $0x168] sm:$0xff]   ;;  %v8490_v38 = vld [vmem:[%s10674_s13 + $0x38] sm:$0xff]  }
 0x615   : > { %1741 = vmatprep.mubr.bf16.mxu0 %v8825_v19  ;;  %1782 = vmatprep.mubr.bf16.mxu1 %v8825_v19 }
 0x617   : > { %1712 = vmatpush1.bf16.msra.mxu0 %v6910_v43  ;;  %1753 = vmatpush1.bf16.msra.mxu1 %v6912_v44  ;;  %v8497_v43 = vld [vmem:[%s10674_s13 + $0x178] sm:$0xff]  }
 0x618   : > { %1791 = vmatprep.subr.bf16.mxu0 %v6899_v45  ;;  %1832 = vmatprep.subr.bf16.mxu1 %v6901_v46  ;;  %v8499_v44 = vld [vmem:[%s10674_s13 + $0x138] sm:$0xff]   ;;  %v8501_v45 = vld [vmem:[%s10674_s13 + $0x240] sm:$0xff]   ;;  %v1384_v46 = vlaneseq }
 0x61a   : > { %6924 = vmatmul.mubr.msk.bf16.vlgmr.msra.gmra.mrb[28].mxu0 %vm634_vm1, %v9174_v36  ;;  %6925 = vmatmul.mubr.msk.bf16.vlgmr.msra.gmra.mrb[28].mxu1 %vm634_vm1, %v9174_v36  ;;  %v9348_v47 = vshrl.u32 %v1384_v46, 7 }
 0x61b   : > { %1792 = vmatpush1.bf16.msra.mxu0 %v6898_v51  ;;  %1833 = vmatpush1.bf16.msra.mxu1 %v6900_v52 }
 0x61c   : > { %1793 = vmatprep.subr.bf16.mxu0 %v6915_v53  ;;  %1834 = vmatprep.subr.bf16.mxu1 %v6917_v54  ;;  %v9351_v48 = vsub.s32 0, %v9348_v47  ;;  %v9359_v50 = vsub.s32 1, %v9348_v47  ;;  %v9362_v51 = vsub.s32 3, %v9348_v47  ;;  %v9376_v2 = vsub.s32 5, %v9348_v47 }
 0x61d   : > { %1823 = vmatprep.mubr.bf16.mxu0 %v8825_v19  ;;  %1864 = vmatprep.mubr.bf16.mxu1 %v8825_v19 }
 0x61e   : > { %v1387_v52 = vrot.slane %v9356_v49, %v9351_v48  ;;  %v1391_v53 = vrot.slane %v9356_v49, %v9359_v50  ;;  %v1399_v54 = vrot.slane %v9356_v49, %v9362_v51 }
 0x61f   : > { %1794 = vmatpush1.bf16.msra.mxu0 %v6914_v59  ;;  %1835 = vmatpush1.bf16.msra.mxu1 %v6916_v60  ;;  %v9373_v60 = vsub.s32 4, %v9348_v47 }
 0x620   : > { %1873 = vmatprep.subr.bf16.mxu0 %v6903_v61  ;;  %1914 = vmatprep.subr.bf16.mxu1 %v6905_v62 }
 0x622   : > { %6926 = vmatmul.mubr.msk.bf16.vlgmr.msra.gmra.mrb[32].mxu0 %vm634_vm1, %v9174_v36  ;;  %6927 = vmatmul.mubr.msk.bf16.vlgmr.msra.gmra.mrb[32].mxu1 %vm634_vm1, %v9174_v36 }
 0x623   : > { %1874 = vmatpush1.bf16.msra.mxu0 %v6902_v4  ;;  %1915 = vmatpush1.bf16.msra.mxu1 %v6904_v5 }
 0x624   : > { %1875 = vmatprep.subr.bf16.mxu0 %v6919_v6  ;;  %1916 = vmatprep.subr.bf16.mxu1 %v6921_v7 }
 0x625   : > { %1905 = vmatprep.mubr.bf16.mxu0 %v8825_v19  ;;  %1946 = vmatprep.mubr.bf16.mxu1 %v8825_v19 }
 0x627   : > { %1876 = vmatpush1.bf16.msra.mxu0 %v6918_v8  ;;  %1917 = vmatpush1.bf16.msra.mxu1 %v6920_v9  ;;  %v1403_v8 = vrot.slane %v9356_v49, %v9373_v60 }
 0x628   : > { %7666 = vmatprep.subr.bf16.mxu1 %v8464_v10  ;;  %7710 = vmatprep.subr.bf16.mxu0 %v8469_v11  ;;  %v1407_v10 = vrot.slane %v9356_v49, %v9376_v2  ;;  %v8494_v11 = vld [vmem:[%s10674_s13 + $0x80] sm:$0xff]  }
 0x62a   : > { %6928 = vmatmul.mubr.msk.bf16.vlgmr.msra.gmra.mrb[36].mxu0 %vm634_vm1, %v9174_v36  ;;  %6929 = vmatmul.mubr.msk.bf16.vlgmr.msra.gmra.mrb[36].mxu1 %vm634_vm1, %v9174_v36  ;;  %v8488_v36 = vld [vmem:[%s10674_s13 + $0x78] sm:$0xff]  }
 0x62b   : > { %7667 = vmatpush3.bf16.msra.mxu1 %v8465_v12  ;;  %7711 = vmatpush3.bf16.msra.mxu0 %v8471_v13  ;;  %v8496_v13 = vld [vmem:[%s10674_s13 + $0xc8] sm:$0xff]  }
 0x62c   : > { %7668 = vmatprep.subr.bf16.mxu1 %v8466_v14  ;;  %7712 = vmatprep.subr.bf16.mxu0 %v8473_v15 }
 0x62f   : > { %7669 = vmatpush3.bf16.msra.mxu1 %v8467_v16  ;;  %7713 = vmatpush3.bf16.msra.mxu0 %v8475_v17 }
 0x630   : > { %7670 = vmatprep.subr.bf16.mxu1 %v8468_v18  ;;  %7714 = vmatprep.subr.bf16.mxu0 %v8477_v20 }
 0x633   : > { %7671 = vmatpush3.bf16.msra.mxu1 %v8470_v21  ;;  %7715 = vmatpush3.bf16.msra.mxu0 %v8479_v22 }
 0x634   : > { %7672 = vmatprep.subr.bf16.mxu1 %v8472_v23  ;;  %7716 = vmatprep.subr.bf16.mxu0 %v8481_v24  ;;  %v8498_v24 = vld [vmem:[%s10674_s13 + $0x88] sm:$0xff]  }
 0x637   : > { %7673 = vmatpush3.bf16.msra.mxu1 %v8474_v25  ;;  %7717 = vmatpush3.bf16.msra.mxu0 %v8483_v26  ;;  %v9398_v25 = vld [vmem:[%s10673_s12 + $0x8] sm:$0xff]  ;;  %v9401_v26 = vsub.s32 2, %v9348_v47 }
 0x638   : > { %7674 = vmatprep.subr.bf16.mxu1 %v8476_v27  ;;  %7718 = vmatprep.subr.bf16.mxu0 %v8485_v32 }
 0x639   : > { %v1427_v32 = vrot.slane %v9398_v25, %v9401_v26 }
 0x63b   : > { %7675 = vmatpush3.bf16.msra.mxu1 %v8478_v28  ;;  %7719 = vmatpush3.bf16.msra.mxu0 %v8487_v34  ;;  %v1423_v34 = vrot.slane %v9398_v25, %v9359_v50 }
 0x63c   : > { %7676 = vmatprep.subr.bf16.mxu1 %v8480_v29  ;;  %7720 = vmatprep.subr.bf16.mxu0 %v8489_v37  ;;  %v8503_v37 = vld [vmem:[%s10674_s13 + $0x200] sm:$0xff]  }
 0x63f   : > { %7677 = vmatpush3.bf16.msra.mxu1 %v8482_v30  ;;  %7721 = vmatpush3.bf16.msra.mxu0 %v8491_v39  ;;  %v8500_v30 = vld [vmem:[%s10674_s13 + $0xd0] sm:$0xff]   ;;  %v8504_v39 = vld [vmem:[%s10674_s13 + $0xd8] sm:$0xff]  }
 0x640   : > { %7678 = vmatprep.subr.bf16.mxu1 %v8484_v31  ;;  %7722 = vmatprep.subr.bf16.mxu0 %v8493_v41 }
 0x643   : > { %7679 = vmatpush3.bf16.msra.mxu1 %v8486_v33  ;;  %7723 = vmatpush3.bf16.msra.mxu0 %v8495_v42 }
 0x644   : > { %7680 = vmatprep.subr.bf16.mxu1 %v8488_v36  ;;  %7724 = vmatprep.subr.bf16.mxu0 %v8497_v43  ;;  %v8502_v36 = vld [vmem:[%s10674_s13 + $0x90] sm:$0xff]  }
 0x647   : > { %7681 = vmatpush3.bf16.msra.mxu1 %v8490_v38  ;;  %7725 = vmatpush3.bf16.msra.mxu0 %v8499_v44 }
 0x648   : > { %7688 = vmatprep.subr.bf16.mxu1 %v8492_v40  ;;  %7754 = vmatprep.subr.bf16.mxu0 %v8501_v45  ;;  %v8505_v40 = vld [vmem:[%s10674_s13 + $0x248] sm:$0xff]  }
 0x6e5   : > { %v1661_v55 = vpop.f32.mrb[24].mxu0  ;;  %v9370_v56 = vpop.f32.mrb[24].mxu1 }
 0x6e6   : > { %v1662_v57 = vadd.f32 %v1661_v55, %v1387_v52  ;;  %v1663_v58 = vpop.f32.mrb[25].mxu0  ;;  %v1704_v59 = vpop.f32.mrb[25].mxu1  ;;  %v8507_v55 = vld [vmem:[%s10674_s13 + $0x208] sm:$0xff]  }
 0x6e7   : > { %v1664_v61 = vadd.f32 %v1663_v58, %v1391_v53  ;;  %v1705_v62 = vadd.f32 %v1704_v59, %v1399_v54  ;;  %v1665_v63 = vpop.f32.mrb[26].mxu0  ;;  %v1706_v0 = vpop.f32.mrb[26].mxu1  ;;  %v8506_v54 = vld [vmem:[%s10674_s13 + $0x98] sm:$0xff]  }
 0x6e8   : > { %v1955_v3 = vmax.f32 %v1662_v57, 0.0  ;;  %v1666_v4 = vpop.f32.mrb[27].mxu0  ;;  %v1707_v5 = vpop.f32.mrb[27].mxu1  ;;  %v9435_v57 = vsub.s32 6, %v9348_v47  ;;  %v9444_v63 = vsub.s32 7, %v9348_v47  ;;  %v8512_v47 = vld [vmem:[%s10674_s13 + $0xe8] sm:$0xff]  }
 0x6e9   : > { %v1956_v6 = vmax.f32 %v1664_v61, 0.0  ;;  %v1958_v7 = vmax.f32 %v1705_v62, 0.0  ;;  %v8508_v61 = vld [vmem:[%s10674_s13 + $0xe0] sm:$0xff]   ;;  %v8509_v62 = vld [vmem:[%s10674_s13 + $0x250] sm:$0xff]  }
 0x6ea   : > { %v1971_v12 = vpack.c.bf16 %v1955_v3, %v1955_v3  ;;  %v1443_v3 = vrot.slane %v9398_v25, %v9435_v57  ;;  %v1447_v5 = vrot.slane %v9398_v25, %v9444_v63 }
 0x6eb   : > { %v1972_v9 = vpack.c.bf16 %v1956_v6, %v1956_v6  ;;  %v1974_v14 = vpack.c.bf16 %v1958_v7, %v1958_v7  ;;  %v8510_v6 = vld [vmem:[%s10674_s13 + $0xa0] sm:$0xff]   ;;  %v8511_v7 = vld [vmem:[%s10674_s13 + $0x210] sm:$0xff]  }
 0x6ed   : > { %v1743_v15 = vpop.f32.mrb[28].mxu0  ;;  %v9388_v16 = vpop.f32.mrb[28].mxu1  ;;  %3050 = vmatprep.mubr.bf16.mxu1 %v1972_v9 }
 0x6ee   : > { %v1744_v17 = vadd.f32 %v1743_v15, %v1403_v8  ;;  %v1745_v18 = vpop.f32.mrb[29].mxu0  ;;  %v9390_v20 = vpop.f32.mrb[29].mxu1  ;;  %3051 = vmatmul.mubr.bf16.vlgmr.msra.gmra.mrb[40].mxu1 %v1971_v12  ;;  %v8513_v8 = vld [vmem:[%s10674_s13 + $0x258] sm:$0xff]  }
 0x6ef   : > { %v1746_v21 = vadd.f32 %v1745_v18, %v1407_v10  ;;  %7689 = vmatpush3.bf16.msra.mxu1 %v8494_v11  ;;  %v1747_v22 = vpop.f32.mrb[30].mxu0  ;;  %v1788_v23 = vpop.f32.mrb[30].mxu1  ;;  %3090 = vmatprep.mubr.bf16.mxu1 %v1974_v14  ;;  %v8514_v18 = vld [vmem:[%s10674_s13 + $0xa8] sm:$0xff]  }
 0x6f0   : > { %v1959_v27 = vmax.f32 %v1744_v17, 0.0  ;;  %v1748_v28 = vpop.f32.mrb[31].mxu0  ;;  %v1789_v29 = vpop.f32.mrb[31].mxu1  ;;  %7690 = vmatprep.subr.bf16.mxu1 %v8496_v13  ;;  %v1395_v22 = vrot.slane %v9356_v49, %v9401_v26 }
 0x6f1   : > { %v1960_v31 = vmax.f32 %v1746_v21, 0.0  ;;  %v8515_v21 = vld [vmem:[%s10674_s13 + $0x218] sm:$0xff]   ;;  %v8517_v28 = vld [vmem:[%s10674_s13 + $0x260] sm:$0xff]   ;;  %v1415_v29 = vrot.slane %v9356_v49, %v9444_v63 }
 0x6f2   : > { %v1975_v38 = vpack.c.bf16 %v1959_v27, %v1959_v27  ;;  %v8516_v27 = vld [vmem:[%s10674_s13 + $0xf0] sm:$0xff]  }
 0x6f3   : > { %v1976_v33 = vpack.c.bf16 %v1960_v31, %v1960_v31  ;;  %7691 = vmatpush3.bf16.msra.mxu1 %v8498_v24  ;;  %v8519_v31 = vld [vmem:[%s10674_s13 + $0x220] sm:$0xff]  }
 0x6f4   : > { %7692 = vmatprep.subr.bf16.mxu1 %v8500_v30  ;;  %v8518_v30 = vld [vmem:[%s10674_s13 + $0xb0] sm:$0xff]  }
 0x6f5   : > { %v9422_v41 = vpop.f32.mrb[32].mxu0  ;;  %v1866_v42 = vpop.f32.mrb[32].mxu1  ;;  %3130 = vmatprep.mubr.bf16.mxu0 %v1976_v33  ;;  %v8520_v33 = vld [vmem:[%s10674_s13 + $0xf8] sm:$0xff]  }
 0x6f6   : > { %v9424_v43 = vadd.f32 %v1866_v42, %v1427_v32  ;;  %v1827_v44 = vpop.f32.mrb[33].mxu0  ;;  %v9426_v45 = vpop.f32.mrb[33].mxu1  ;;  %3131 = vmatmul.mubr.bf16.vlgmr.msra.gmra.mrb[40].mxu0 %v1975_v38  ;;  %v1703_v32 = vadd.f32 %v9370_v56, %v1395_v22  ;;  %v8523_v56 = vld [vmem:[%s10674_s13 + $0x228] sm:$0xff]   ;;  %v1419_v42 = vrot.slane %v9398_v25, %v9351_v48  ;;  %v8543_v22 = vld [vmem:[%s10674_s13 + $0x310] sm:$0xff]  }
 0x6f7   : > { %v1828_v46 = vadd.f32 %v1827_v44, %v1423_v34  ;;  %7693 = vmatpush3.bf16.msra.mxu1 %v8502_v36  ;;  %7755 = vmatpush3.bf16.msra.mxu0 %v8503_v37  ;;  %v1829_v52 = vpop.f32.mrb[34].mxu0  ;;  %v1870_v53 = vpop.f32.mrb[34].mxu1  ;;  %v8521_v34 = vld [vmem:[%s10674_s13 + $0x268] sm:$0xff]   ;;  %v1787_v36 = vadd.f32 %v9390_v20, %v1415_v29  ;;  %v8522_v37 = vld [vmem:[%s10674_s13 + $0xb8] sm:$0xff]   ;;  %v8525_v20 = vld [vmem:[%s10674_s13 + $0x270] sm:$0xff]   ;;  %v1439_v44 = vrot.slane %v9398_v25, %v9376_v2 }
 0x6f8   : > { %v1830_v58 = vpop.f32.mrb[35].mxu0  ;;  %v1871_v59 = vpop.f32.mrb[35].mxu1  ;;  %7694 = vmatprep.subr.bf16.mxu1 %v8504_v39  ;;  %7756 = vmatprep.subr.bf16.mxu0 %v8505_v40  ;;  %v1957_v38 = vmax.f32 %v1703_v32, 0.0  ;;  %v8524_v39 = vld [vmem:[%s10674_s13 + $0x1c0] sm:$0xff]   ;;  %v8527_v53 = vld [vmem:[%s10674_s13 + $0x230] sm:$0xff]   ;;  %v8547_v29 = vld [vmem:[%s10674_s13 + $0x318] sm:$0xff]  }
 0x6f9   : > { %v1964_v0 = vmax.f32 %v1828_v46, 0.0  ;;  %v1962_v40 = vmax.f32 %v1787_v36, 0.0  ;;  %v8526_v46 = vld [vmem:[%s10674_s13 + $0x180] sm:$0xff]   ;;  %v1826_v58 = vadd.f32 %v9422_v41, %v1419_v42  ;;  %v8529_v59 = vld [vmem:[%s10674_s13 + $0x278] sm:$0xff]   ;;  %v8532_v41 = vld [vmem:[%s10674_s13 + $0x1d0] sm:$0xff]  }
 0x6fa   : > { %v1973_v52 = vpack.c.bf16 %v1957_v38, %v1957_v38  ;;  %v8549_v32 = vld [vmem:[%s10674_s13 + $0x360] sm:$0xff]   ;;  %v8552_v36 = vld [vmem:[%s10674_s13 + $0x1f8] sm:$0xff]   ;;  %v8557_v42 = vld [vmem:[%s10674_s13 + $0x370] sm:$0xff]  }
 0x6fb   : > { %v1980_v4 = vpack.c.bf16 %v1964_v0, %v1964_v0  ;;  %7695 = vmatpush3.bf16.msra.mxu1 %v8506_v54  ;;  %7757 = vmatpush3.bf16.msra.mxu0 %v8507_v55  ;;  %v8528_v54 = vld [vmem:[%s10674_s13 + $0x1c8] sm:$0xff]   ;;  %v1978_v55 = vpack.c.bf16 %v1962_v40, %v1962_v40  ;;  %v8531_v0 = vld [vmem:[%s10674_s13 + $0x238] sm:$0xff]   ;;  %v1435_v40 = vrot.slane %v9398_v25, %v9373_v60 }
 0x6fc   : > { %7696 = vmatprep.subr.bf16.mxu1 %v8508_v61  ;;  %7758 = vmatprep.subr.bf16.mxu0 %v8509_v62  ;;  %v8530_v62 = vld [vmem:[%s10674_s13 + $0x188] sm:$0xff]  }
 0x6fd   : > { %v9462_v9 = vpop.f32.mrb[36].mxu0  ;;  %v1948_v10 = vpop.f32.mrb[36].mxu1  ;;  %3210 = vmatprep.mubr.bf16.mxu0 %v1980_v4  ;;  %v8533_v4 = vld [vmem:[%s10674_s13 + $0x340] sm:$0xff]  }
 0x6fe   : > { %v9464_v11 = vadd.f32 %v1948_v10, %v1443_v3  ;;  %v1909_v12 = vpop.f32.mrb[37].mxu0  ;;  %v1950_v13 = vpop.f32.mrb[37].mxu1  ;;  %v1963_v3 = vmax.f32 %v1826_v58, 0.0  ;;  %v8537_v10 = vld [vmem:[%s10674_s13 + $0x348] sm:$0xff]  }
 0x6ff   : > { %v9466_v14 = vadd.f32 %v1950_v13, %v1447_v5  ;;  %7697 = vmatpush3.bf16.msra.mxu1 %v8510_v6  ;;  %7759 = vmatpush3.bf16.msra.mxu0 %v8511_v7  ;;  %v1911_v15 = vpop.f32.mrb[38].mxu0  ;;  %v1952_v17 = vpop.f32.mrb[38].mxu1  ;;  %v1910_v61 = vadd.f32 %v1909_v12, %v1439_v44  ;;  %v8534_v6 = vld [vmem:[%s10674_s13 + $0x190] sm:$0xff]   ;;  %v8535_v7 = vld [vmem:[%s10674_s13 + $0x300] sm:$0xff]   ;;  %v8538_v13 = vld [vmem:[%s10674_s13 + $0x198] sm:$0xff]  }
 0x700   : > { %v1912_v23 = vpop.f32.mrb[39].mxu0  ;;  %v1953_v24 = vpop.f32.mrb[39].mxu1  ;;  %7698 = vmatprep.subr.bf16.mxu1 %v8512_v47  ;;  %7760 = vmatprep.subr.bf16.mxu0 %v8513_v8  ;;  %v1979_v47 = vpack.c.bf16 %v1963_v3, %v1963_v3  ;;  %v8536_v8 = vld [vmem:[%s10674_s13 + $0x1d8] sm:$0xff]   ;;  %v8539_v15 = vld [vmem:[%s10674_s13 + $0x308] sm:$0xff]   ;;  %v8540_v17 = vld [vmem:[%s10674_s13 + $0x1e0] sm:$0xff]  }
 0x701   : > { %v1968_v5 = vmax.f32 %v1910_v61, 0.0  ;;  %v8544_v23 = vld [vmem:[%s10674_s13 + $0x1e8] sm:$0xff]   ;;  %v8545_v24 = vld [vmem:[%s10674_s13 + $0x358] sm:$0xff]   ;;  %v8558_v44 = vld [vmem:[%s10674_s13 + $0x280] sm:$0xff]  }
 0x702   : > { %v8562_v58 = vld [vmem:[%s10674_s13 + $0x288] sm:$0xff]   ;;  %v8567_v3 = vld [vmem:[%s10674_s13 + $0x298] sm:$0xff]  }
 0x703   : > { %7699 = vmatpush3.bf16.msra.mxu1 %v8514_v18  ;;  %7761 = vmatpush3.bf16.msra.mxu0 %v8515_v21  ;;  %v1984_v12 = vpack.c.bf16 %v1968_v5, %v1968_v5  ;;  %v8541_v18 = vld [vmem:[%s10674_s13 + $0x350] sm:$0xff]   ;;  %v8542_v21 = vld [vmem:[%s10674_s13 + $0x1a0] sm:$0xff]  }
 0x704   : > { %7700 = vmatprep.subr.bf16.mxu1 %v8516_v27  ;;  %7762 = vmatprep.subr.bf16.mxu0 %v8517_v28  ;;  %v8546_v27 = vld [vmem:[%s10674_s13 + $0x1a8] sm:$0xff]   ;;  %v1411_v28 = vrot.slane %v9356_v49, %v9435_v57  ;;  %v8550_v49 = vld [vmem:[%s10674_s13 + $0x1b0] sm:$0xff]   ;;  %v8569_v5 = vld [vmem:[%s10674_s13 + $0x2a0] sm:$0xff]  }
 0x707   : > { %7701 = vmatpush3.bf16.msra.mxu1 %v8518_v30  ;;  %7763 = vmatpush3.bf16.msra.mxu0 %v8519_v31  ;;  %v8548_v30 = vld [vmem:[%s10674_s13 + $0x1f0] sm:$0xff]   ;;  %v1431_v31 = vrot.slane %v9398_v25, %v9362_v51  ;;  %v8560_v25 = vld [vmem:[%s10674_s13 + $0x2c8] sm:$0xff]  }
 0x708   : > { %7702 = vmatprep.subr.bf16.mxu1 %v8520_v33  ;;  %7764 = vmatprep.subr.bf16.mxu0 %v8521_v34  ;;  %v1785_v33 = vadd.f32 %v9388_v16, %v1411_v28  ;;  %v8551_v34 = vld [vmem:[%s10674_s13 + $0x320] sm:$0xff]   ;;  %v8554_v16 = vld [vmem:[%s10674_s13 + $0x1b8] sm:$0xff]  }
 0x709   : > { %v8583_v28 = vld [vmem:[%s10674_s13 + $0x398] sm:$0xff]  }
 0x70a   : > { %v1961_v38 = vmax.f32 %v1785_v33, 0.0  ;;  %v8589_v33 = vld [vmem:[%s10674_s13 + $0x3b0] sm:$0xff]  }
 0x70b   : > { %7703 = vmatpush3.bf16.msra.mxu1 %v8522_v37  ;;  %7765 = vmatpush3.bf16.msra.mxu0 %v8523_v56  ;;  %v1869_v37 = vadd.f32 %v9426_v45, %v1431_v31  ;;  %v8553_v56 = vld [vmem:[%s10674_s13 + $0x368] sm:$0xff]   ;;  %v8556_v45 = vld [vmem:[%s10674_s13 + $0x2c0] sm:$0xff]  }
 0x70c   : > { %7732 = vmatprep.subr.bf16.mxu1 %v8524_v39  ;;  %7766 = vmatprep.subr.bf16.mxu0 %v8525_v20  ;;  %v8555_v39 = vld [vmem:[%s10674_s13 + $0x328] sm:$0xff]  }
 0x70d   : > { %v1966_v20 = vmax.f32 %v1869_v37, 0.0  ;;  %v8586_v31 = vld [vmem:[%s10674_s13 + $0x3e8] sm:$0xff]   ;;  %v1969_v37 = vmax.f32 %v9464_v11, 0.0  ;;  %v6930_v11 = vld [vmem:[%s10675_s14] ss:$0 sm:$0xff] }
 0x70e   : > { %3091 = vmatmul.mubr.bf16.vlgmr.msra.gmra.mrb[44].mxu1 %v1973_v52  ;;  %v8559_v52 = vld [vmem:[%s10674_s13 + $0x330] sm:$0xff]  }
 0x70f   : > { %7733 = vmatpush3.bf16.msra.mxu1 %v8526_v46  ;;  %3170 = vmatprep.mubr.bf16.mxu1 %v1978_v55  ;;  %v1977_v46 = vpack.c.bf16 %v1961_v38, %v1961_v38  ;;  %v8561_v55 = vld [vmem:[%s10674_s13 + $0x378] sm:$0xff]  }
 0x710   : > { %7767 = vmatpush3.bf16.msra.mxu0 %v8527_v53  ;;  %7734 = vmatprep.subr.bf16.mxu1 %v8528_v54  ;;  %v1982_v53 = vpack.c.bf16 %v1966_v20, %v1966_v20  ;;  %v1908_v54 = vadd.f32 %v9462_v9, %v1435_v40  ;;  %v8564_v9 = vld [vmem:[%s10674_s13 + $0x2d0] sm:$0xff]  }
 0x711   : > { %7768 = vmatprep.subr.bf16.mxu0 %v8529_v59  ;;  %v8563_v59 = vld [vmem:[%s10674_s13 + $0x338] sm:$0xff]  }
 0x712   : > { %v1967_v61 = vmax.f32 %v1908_v54, 0.0 }
 0x713   : > { %7735 = vmatpush3.bf16.msra.mxu1 %v8530_v62  ;;  %v8565_v62 = vld [vmem:[%s10674_s13 + $0x290] sm:$0xff]  }
 0x714   : > { %7769 = vmatpush3.bf16.msra.mxu0 %v8531_v0  ;;  %7736 = vmatprep.subr.bf16.mxu1 %v8532_v41  ;;  %v8566_v0 = vld [vmem:[%s10674_s13 + $0x2d8] sm:$0xff]   ;;  %v1983_v41 = vpack.c.bf16 %v1967_v61, %v1967_v61 }
 0x715   : > { %7798 = vmatprep.subr.bf16.mxu0 %v8533_v4  ;;  %v8568_v4 = vld [vmem:[%s10674_s13 + $0x2e0] sm:$0xff]  }
 0x717   : > { %3211 = vmatmul.mubr.bf16.vlgmr.msra.gmra.mrb[44].mxu0 %v1979_v47  ;;  %7737 = vmatpush3.bf16.msra.mxu1 %v8534_v6  ;;  %v8570_v6 = vld [vmem:[%s10674_s13 + $0x2e8] sm:$0xff]   ;;  %v8572_v47 = vld [vmem:[%s10674_s13 + $0x2f0] sm:$0xff]  }
 0x718   : > { %7799 = vmatpush3.bf16.msra.mxu0 %v8535_v7  ;;  %3290 = vmatprep.mubr.bf16.mxu0 %v1984_v12  ;;  %v8571_v7 = vld [vmem:[%s10674_s13 + $0x2a8] sm:$0xff]   ;;  %v8575_v12 = vld [vmem:[%s10674_s13 + $0x2b8] sm:$0xff]  }
 0x719   : > { %7738 = vmatprep.subr.bf16.mxu1 %v8536_v8  ;;  %7800 = vmatprep.subr.bf16.mxu0 %v8537_v10  ;;  %v8573_v8 = vld [vmem:[%s10674_s13 + $0x2b0] sm:$0xff]   ;;  %v8574_v10 = vld [vmem:[%s10674_s13 + $0x2f8] sm:$0xff]  }
 0x71b   : > { %7739 = vmatpush3.bf16.msra.mxu1 %v8538_v13  ;;  %v1965_v13 = vmax.f32 %v9424_v43, 0.0  ;;  %v8579_v43 = vld [vmem:[%s10674_s13 + $0x388] sm:$0xff]  }
 0x71c   : > { %7801 = vmatpush3.bf16.msra.mxu0 %v8539_v15  ;;  %7740 = vmatprep.subr.bf16.mxu1 %v8540_v17  ;;  %v8576_v15 = vld [vmem:[%s10674_s13 + $0x3c0] sm:$0xff]   ;;  %v1970_v17 = vmax.f32 %v9466_v14, 0.0  ;;  %v8580_v14 = vld [vmem:[%s10674_s13 + $0x3d0] sm:$0xff]  }
 0x71d   : > { %7802 = vmatprep.subr.bf16.mxu0 %v8541_v18  ;;  %v8577_v18 = vld [vmem:[%s10674_s13 + $0x380] sm:$0xff]  }
 0x71f   : > { %7741 = vmatpush3.bf16.msra.mxu1 %v8542_v21  ;;  %v1981_v21 = vpack.c.bf16 %v1965_v13, %v1965_v13 }
 0x720   : > { %7803 = vmatpush3.bf16.msra.mxu0 %v8543_v22  ;;  %7742 = vmatprep.subr.bf16.mxu1 %v8544_v23  ;;  %v8578_v22 = vld [vmem:[%s10674_s13 + $0x3c8] sm:$0xff]   ;;  %v1986_v23 = vpack.c.bf16 %v1970_v17, %v1970_v17 }
 0x721   : > { %7804 = vmatprep.subr.bf16.mxu0 %v8545_v24  ;;  %v8581_v24 = vld [vmem:[%s10674_s13 + $0x390] sm:$0xff]  }
 0x723   : > { %7743 = vmatpush3.bf16.msra.mxu1 %v8546_v27  ;;  %v8582_v27 = vld [vmem:[%s10674_s13 + $0x3d8] sm:$0xff]  }
 0x724   : > { %7805 = vmatpush3.bf16.msra.mxu0 %v8547_v29  ;;  %7744 = vmatprep.subr.bf16.mxu1 %v8548_v30  ;;  %v8584_v29 = vld [vmem:[%s10674_s13 + $0x3e0] sm:$0xff]  }
 0x725   : > { %7806 = vmatprep.subr.bf16.mxu0 %v8549_v32  ;;  %v8585_v30 = vld [vmem:[%s10674_s13 + $0x3a0] sm:$0xff]   ;;  %v8587_v32 = vld [vmem:[%s10674_s13 + $0x3a8] sm:$0xff]  }
 0x727   : > { %7745 = vmatpush3.bf16.msra.mxu1 %v8550_v49  ;;  %v8588_v49 = vld [vmem:[%s10674_s13 + $0x3f0] sm:$0xff]  }
 0x728   : > { %7807 = vmatpush3.bf16.msra.mxu0 %v8551_v34  ;;  %7746 = vmatprep.subr.bf16.mxu1 %v8552_v36  ;;  %v8590_v34 = vld [vmem:[%s10674_s13 + $0x3f8] sm:$0xff]  }
 0x729   : > { %7808 = vmatprep.subr.bf16.mxu0 %v8553_v56  ;;  %v8591_v36 = vld [vmem:[%s10674_s13 + $0x3b8] sm:$0xff]   ;;  %v1985_v56 = vpack.c.bf16 %v1969_v37, %v1969_v37 }
 0x72b   : > { %7747 = vmatpush3.bf16.msra.mxu1 %v8554_v16 }
 0x72c   : > { %7809 = vmatpush3.bf16.msra.mxu0 %v8555_v39  ;;  %7776 = vmatprep.subr.bf16.mxu1 %v8556_v45 }
 0x72d   : > { %7810 = vmatprep.subr.bf16.mxu0 %v8557_v42 }
 0x72e   : > { %3171 = vmatmul.mubr.bf16.vlgmr.msra.gmra.mrb[48].mxu1 %v1977_v46 }
 0x72f   : > { %7777 = vmatpush3.bf16.msra.mxu1 %v8558_v44  ;;  %3250 = vmatprep.mubr.bf16.mxu1 %v1982_v53 }
 0x730   : > { %7811 = vmatpush3.bf16.msra.mxu0 %v8559_v52  ;;  %7778 = vmatprep.subr.bf16.mxu1 %v8560_v25 }
 0x731   : > { %7812 = vmatprep.subr.bf16.mxu0 %v8561_v55 }
 0x733   : > { %7779 = vmatpush3.bf16.msra.mxu1 %v8562_v58 }
 0x734   : > { %7813 = vmatpush3.bf16.msra.mxu0 %v8563_v59  ;;  %7780 = vmatprep.subr.bf16.mxu1 %v8564_v9 }
 0x735   : > { %8172 = vmatprep.subr.bf16.mxu0 %v8823_v1 }
 0x737   : > { %3291 = vmatmul.mubr.bf16.vlgmr.msra.gmra.mrb[48].mxu0 %v1983_v41  ;;  %7781 = vmatpush3.bf16.msra.mxu1 %v8565_v62 }
 0x738   : > { %7782 = vmatprep.subr.bf16.mxu1 %v8566_v0  ;;  %8176 = vmatprep.mubr.msk.bf16.mxu0 %vm8824_vm0, %v8823_v1 }
 0x73b   : > { %7783 = vmatpush3.bf16.msra.mxu1 %v8567_v3 }
 0x73c   : > { %7784 = vmatprep.subr.bf16.mxu1 %v8568_v4 }
 0x73f   : > { %7785 = vmatpush3.bf16.msra.mxu1 %v8569_v5 }
 0x740   : > { %7786 = vmatprep.subr.bf16.mxu1 %v8570_v6 }
 0x743   : > { %7787 = vmatpush3.bf16.msra.mxu1 %v8571_v7 }
 0x744   : > { %7788 = vmatprep.subr.bf16.mxu1 %v8572_v47 }
 0x747   : > { %7789 = vmatpush3.bf16.msra.mxu1 %v8573_v8 }
 0x748   : > { %7790 = vmatprep.subr.bf16.mxu1 %v8574_v10 }
 0x74b   : > { %7791 = vmatpush3.bf16.msra.mxu1 %v8575_v12 }
 0x74c   : > { %7820 = vmatprep.subr.bf16.mxu1 %v8576_v15 }
 0x74e   : > { %3251 = vmatmul.mubr.bf16.vlgmr.msra.gmra.mrb[52].mxu1 %v1981_v21 }
 0x74f   : > { %7821 = vmatpush3.bf16.msra.mxu1 %v8577_v18  ;;  %3330 = vmatprep.mubr.bf16.mxu1 %v1986_v23 }
 0x750   : > { %7822 = vmatprep.subr.bf16.mxu1 %v8578_v22 }
 0x753   : > { %7823 = vmatpush3.bf16.msra.mxu1 %v8579_v43 }
 0x754   : > { %7824 = vmatprep.subr.bf16.mxu1 %v8580_v14 }
 0x757   : > { %7825 = vmatpush3.bf16.msra.mxu1 %v8581_v24 }
 0x758   : > { %7826 = vmatprep.subr.bf16.mxu1 %v8582_v27 }
 0x75b   : > { %7827 = vmatpush3.bf16.msra.mxu1 %v8583_v28 }
 0x75c   : > { %7828 = vmatprep.subr.bf16.mxu1 %v8584_v29 }
 0x75f   : > { %7829 = vmatpush3.bf16.msra.mxu1 %v8585_v30 }
 0x760   : > { %7830 = vmatprep.subr.bf16.mxu1 %v8586_v31 }
 0x763   : > { %7831 = vmatpush3.bf16.msra.mxu1 %v8587_v32 }
 0x764   : > { %7832 = vmatprep.subr.bf16.mxu1 %v8588_v49 }
 0x767   : > { %7833 = vmatpush3.bf16.msra.mxu1 %v8589_v33 }
 0x768   : > { %7834 = vmatprep.subr.bf16.mxu1 %v8590_v34 }
 0x76b   : > { %7835 = vmatpush3.bf16.msra.mxu1 %v8591_v36 }
 0x76c   : > { %8180 = vmatprep.subr.bf16.mxu1 %v8823_v1 }
 0x76e   : > { %3331 = vmatmul.mubr.bf16.vlgmr.msra.gmra.mrb[56].mxu1 %v1985_v56 }
 0x76f   : > { %8184 = vmatprep.mubr.msk.bf16.mxu1 %vm8824_vm0, %v8823_v1 }
 0x7c1   : > { %v7682_v16 = vpop.f32.mrb[40].mxu1 }
 0x7c2   : > { %v7683_v38 = vpop.f32.mrb[41].mxu1 }
 0x7c3   : > { %v7684_v39 = vadd.f32 %v7683_v38, %v7682_v16  ;;  %v7685_v45 = vpop.f32.mrb[42].mxu1 }
 0x7c4   : > { %v7686_v20 = vpop.f32.mrb[43].mxu1  ;;  %v8592_v45 = vld [vmem:[%s10706_s29 + $0x20] sm:$0xff]  }
 0x7c5   : > { %v3053_v54 = vadd.f32 %v7684_v39, %v6930_v11  ;;  %v8593_v20 = vld [vmem:[%s10706_s29 + $0x30] sm:$0xff]   ;;  %8173 = vmatpush3.bf16.msra.mxu0 %v8592_v45  ;;  %v7059_v11 = vld [vmem:[%s10676_s15] ss:$0 sm:$0xff] }
 0x7c6   : > { %8181 = vmatpush3.bf16.msra.mxu1 %v8593_v20  ;;  %8174 = vmatprep.subr.bf16.mxu0 %v8823_v1 }
 0x7c7   : > { %8182 = vmatprep.subr.bf16.mxu1 %v8823_v1 }
 0x7c9   : > { %v7726_v40 = vpop.f32.mrb[40].mxu0 }
 0x7ca   : > { %v7727_v42 = vpop.f32.mrb[41].mxu0 }
 0x7cb   : > { %v7728_v44 = vadd.f32 %v7727_v42, %v7726_v40  ;;  %v7729_v46 = vpop.f32.mrb[42].mxu0  ;;  %v8595_v40 = vld [vmem:[%s10706_s29 + $0x38] sm:$0xff]  }
 0x7cc   : > { %v7730_v52 = vpop.f32.mrb[43].mxu0  ;;  %8183 = vmatpush3.bf16.msra.mxu1 %v8595_v40 }
 0x7cd   : > { %8196 = vmatprep.subr.bf16.mxu1 %v8823_v1 }
 0x7e1   : > { %v7704_v25 = vpop.f32.mrb[44].mxu1 }
 0x7e2   : > { %v7705_v53 = vpop.f32.mrb[45].mxu1 }
 0x7e3   : > { %v7706_v55 = vadd.f32 %v7705_v53, %v7704_v25  ;;  %v7707_v58 = vpop.f32.mrb[46].mxu1  ;;  %v7060_v53 = vld [vmem:[%s10677_s16] ss:$0 sm:$0xff] }
 0x7e4   : > { %v7708_v59 = vpop.f32.mrb[47].mxu1  ;;  %v8596_v58 = vld [vmem:[%s10708_s28 + $0x20] sm:$0xff]  }
 0x7e5   : > { %v3093_v9 = vadd.f32 %v7706_v55, %v3053_v54  ;;  %v8597_v59 = vld [vmem:[%s10708_s28 + $0x30] sm:$0xff]  }
 0x7e7   : > { %v3133_v61 = vadd.f32 %v7728_v44, %v3093_v9 }
 0x7ea   : > { %v7770_v62 = vpop.f32.mrb[44].mxu0 }
 0x7eb   : > { %v7771_v0 = vpop.f32.mrb[45].mxu0 }
 0x7ec   : > { %v7772_v41 = vadd.f32 %v7771_v0, %v7770_v62  ;;  %v7773_v3 = vpop.f32.mrb[46].mxu0  ;;  %v8599_v62 = vld [vmem:[%s10708_s28 + $0x38] sm:$0xff]   ;;  %v8600_v0 = vld [vmem:[%s10709_s5 + $0x20] sm:$0xff]  }
 0x7ed   : > { %v7774_v4 = vpop.f32.mrb[47].mxu0  ;;  %v8602_v3 = vld [vmem:[%s10709_s5 + $0x28] sm:$0xff]  }
 0x7ee   : > { %v8603_v4 = vld [vmem:[%s10709_s5 + $0x38] sm:$0xff]  }
 0x801   : > { %v7748_v5 = vpop.f32.mrb[48].mxu1 }
 0x802   : > { %v7749_v6 = vpop.f32.mrb[49].mxu1 }
 0x803   : > { %v7750_v7 = vadd.f32 %v7749_v6, %v7748_v5  ;;  %v7751_v47 = vpop.f32.mrb[50].mxu1 }
 0x804   : > { %v7752_v8 = vpop.f32.mrb[51].mxu1 }
 0x805   : > { %v3173_v10 = vadd.f32 %v7750_v7, %v3133_v61  ;;  %v8598_v61 = vld [vmem:[%s10708_s28 + $0x28] sm:$0xff]  }
 0x807   : > { %v3213_v12 = vadd.f32 %v7772_v41, %v3173_v10  ;;  %v8601_v41 = vld [vmem:[%s10709_s5 + $0x30] sm:$0xff]  }
 0x80a   : > { %v7814_v13 = vpop.f32.mrb[48].mxu0 }
 0x80b   : > { %v7815_v15 = vpop.f32.mrb[49].mxu0 }
 0x80c   : > { %v7816_v17 = vadd.f32 %v7815_v15, %v7814_v13  ;;  %v7817_v18 = vpop.f32.mrb[50].mxu0  ;;  %v7089_v15 = vld [vmem:[%s10710_s4 + $0x2] ss:$0 sm:$0xff] }
 0x80d   : > { %v7818_v21 = vpop.f32.mrb[51].mxu0 }
 0x821   : > { %v7792_v22 = vpop.f32.mrb[52].mxu1 }
 0x822   : > { %v7793_v23 = vpop.f32.mrb[53].mxu1 }
 0x823   : > { %v7794_v43 = vadd.f32 %v7793_v23, %v7792_v22  ;;  %v7795_v14 = vpop.f32.mrb[54].mxu1 }
 0x824   : > { %v7796_v24 = vpop.f32.mrb[55].mxu1 }
 0x825   : > { %v3253_v27 = vadd.f32 %v7794_v43, %v3213_v12 }
 0x827   : > { %v3293_v28 = vadd.f32 %v7816_v17, %v3253_v27  ;;  %v7090_v17 = vld [vmem:[%s10710_s4 + $0x3] ss:$0 sm:$0xff]  ;;  %s8763_s4 = sshll.u32 %s8827_s1, 4  ;;  %s8764_s4 = int_to_ptr.vmem [resolvable:$false] %s8763_s4 }
 0x828   : > { %s8765_s5 = scalar_lea.vmem %s8764_s4, 32  ;;  %p8766_p0 = scmp.lt.s32.totalorder %s10621_s24, %s8764_s4 }
 0x829   : > { %p8767_p1 = scmp.lt.s32.totalorder %s8765_s5, %s8759_s0 }
 0x82b   : > { %p8768_p2 = por %p8767_p1, %p8766_p0 }
 0x82d   : > { %p8769_p3 = pnand %p8768_p2, %p8762_p13 }
 0x841   : > { %v7836_v29 = vpop.f32.mrb[56].mxu1 }
 0x842   : > { %v7837_v30 = vpop.f32.mrb[57].mxu1 }
 0x843   : > { %v7838_v31 = vadd.f32 %v7837_v30, %v7836_v29  ;;  %v7839_v32 = vpop.f32.mrb[58].mxu1 }
 0x844   : > { %v7840_v49 = vpop.f32.mrb[59].mxu1  ;;  %v7071_v32 = vld [vmem:[%s10711_s22 + $0x2] ss:$0 sm:$0xff] }
 0x845   : > { %v3333_v33 = vadd.f32 %v7838_v31, %v3293_v28  ;;  %v7072_v49 = vld [vmem:[%s10711_s22 + $0x3] ss:$0 sm:$0xff] }
 0x847   : > { %v3338_v34 = vadd.f32 %v3333_v33, %v9170_v35  ;;  %v8594_v35 = vld [vmem:[%s10706_s29 + $0x28] sm:$0xff]  }
 0x848   : > { %8175 = vmatpush3.bf16.msra.mxu0 %v8594_v35 }
 0x849   : > { %v3341_v36 = vsel %vm634_vm1, %v3338_v34, 0.0  ;;  %8188 = vmatprep.subr.bf16.mxu0 %v8823_v1 }
 0x84a   : > { %3342 = vadd.xlane.f32.xlu0 %v3341_v36  ;;  %v7107_v36 = vld [vmem:[%s10667_s6 + $0x2] ss:$0 sm:$0xff] }
 0x8d7   : > { %v3343_v37 = vpop.xlane.xlu0 %3342 }
 0x8d8   : > { %v3344_v56 = vmul.f32 0.03125, %v3343_v37  ;;  %v7108_v37 = vld [vmem:[%s10667_s6 + $0x3] ss:$0 sm:$0xff] }
 0x8da   : > { %v3345_v16 = vsub.f32 %v3338_v34, %v3344_v56 }
 0x8dc   : > { %v3346_v38 = vmul.f32 %v3345_v16, %v3345_v16 }
 0x8de   : > { %v3347_v39 = vsel %vm634_vm1, %v3346_v38, 0.0 }
 0x8df   : > { %3348 = vadd.xlane.f32.xlu1 %v3347_v39 }
 0x96c   : > { %v3349_v42 = vpop.xlane.xlu1 %3348 }
 0x96d   : > { %v3350_v44 = vmul.f32 0.03125, %v3349_v42 }
 0x96f   : > { %v3351_v46 = vadd.f32 1e-05, %v3350_v44 }
 0x971   : > { %8744 = vrsqrt.f32 %v3351_v46 }
 0x97b   : > { %v8745_v52 = vpop.eup %8744 }
 0x97c   : > { %v3353_v25 = vmul.f32 %v8745_v52, %v3345_v16 }
 0x97e   : > { %v3360_v54 = vmul.f32 %v7059_v11, %v3353_v25 }
 0x980   : > { %v9759_v55 = vadd.f32 %v7060_v53, %v3360_v54 }
 0x982   : > { %v3368_v9 = vpack.c.bf16 %v9759_v55, %v9759_v55 }
 0x984   : > { %8177 = vmatmul.mubr.msk.bf16.vlgmr.msra.gmra.mrb[52].mxu0 %vm634_vm1, %v3368_v9  ;;  %8185 = vmatmul.mubr.msk.bf16.vlgmr.msra.gmra.mrb[60].mxu1 %vm634_vm1, %v3368_v9 }
 0x985   : > { %8189 = vmatpush3.bf16.msra.mxu0 %v8596_v58  ;;  %8197 = vmatpush3.bf16.msra.mxu1 %v8597_v59 }
 0x986   : > { %8190 = vmatprep.subr.bf16.mxu0 %v8823_v1  ;;  %8198 = vmatprep.subr.bf16.mxu1 %v8823_v1 }
 0x987   : > { %8192 = vmatprep.mubr.msk.bf16.mxu0 %vm8824_vm0, %v8823_v1  ;;  %8200 = vmatprep.mubr.msk.bf16.mxu1 %vm8824_vm0, %v8823_v1 }
 0x989   : > { %8191 = vmatpush3.bf16.msra.mxu0 %v8598_v61  ;;  %8199 = vmatpush3.bf16.msra.mxu1 %v8599_v62 }
 0x98a   : > { %8204 = vmatprep.subr.bf16.mxu0 %v8823_v1  ;;  %8212 = vmatprep.subr.bf16.mxu1 %v8823_v1 }
 0x98c   : > { %8193 = vmatmul.mubr.msk.bf16.vlgmr.msra.gmra.mrb[56].mxu0 %vm634_vm1, %v3368_v9  ;;  %8201 = vmatmul.mubr.msk.bf16.vlgmr.msra.gmra.mrb[64].mxu1 %vm634_vm1, %v3368_v9 }
 0x98d   : > { %8205 = vmatpush3.bf16.msra.mxu0 %v8600_v0  ;;  %8213 = vmatpush3.bf16.msra.mxu1 %v8601_v41 }
 0x98e   : > { %8206 = vmatprep.subr.bf16.mxu0 %v8823_v1  ;;  %8214 = vmatprep.subr.bf16.mxu1 %v8823_v1 }
 0x98f   : > { %8208 = vmatprep.mubr.msk.bf16.mxu0 %vm8824_vm0, %v8823_v1  ;;  %8216 = vmatprep.mubr.msk.bf16.mxu1 %vm8824_vm0, %v8823_v1 }
 0x991   : > { %8207 = vmatpush3.bf16.msra.mxu0 %v8602_v3  ;;  %8215 = vmatpush3.bf16.msra.mxu1 %v8603_v4 }
 0x992   : > { %8220 = vmatprep.subr.bf16.mxu0 %v8823_v1  ;;  %8226 = vmatprep.subr.bf16.mxu1 %v8823_v1 }
 0x994   : > { %8209 = vmatmul.mubr.msk.bf16.vlgmr.msra.gmra.mrb[60].mxu0 %vm634_vm1, %v3368_v9  ;;  %8217 = vmatmul.mubr.msk.bf16.vlgmr.msra.gmra.mrb[68].mxu1 %vm634_vm1, %v3368_v9 }
 0x995   : > { %8222 = vmatprep.mubr.msk.bf16.mxu0 %vm8824_vm0, %v8823_v1  ;;  %8228 = vmatprep.mubr.msk.bf16.mxu1 %vm8824_vm0, %v8823_v1 }
 0xa57   : > { %v3442_v5 = vpop.f32.mrb[52].mxu0  ;;  %v3494_v6 = vpop.f32.mrb[60].mxu1 }
 0xa58   : > { %v8178_v7 = vpop.f32.mrb[53].mxu0  ;;  %v8186_v47 = vpop.f32.mrb[61].mxu1  ;;  %v3443_v56 = vadd.f32 %v7071_v32, %v3442_v5  ;;  %v3495_v16 = vadd.f32 %v7072_v49, %v3494_v6  ;;  %v8604_v49 = vld [vmem:[%s10668_s7 + $0x10] sm:$0xff]  }
 0xa59   : > { %v3445_v8 = vpop.f32.mrb[54].mxu0  ;;  %v3497_v10 = vpop.f32.mrb[62].mxu1 }
 0xa5a   : > { %v8179_v12 = vpop.f32.mrb[55].mxu0  ;;  %v8187_v13 = vpop.f32.mrb[63].mxu1  ;;  %v3756_v46 = vpack.c.bf16 %v3443_v56, %v3443_v56  ;;  %v3757_v52 = vpack.c.bf16 %v3495_v16, %v3495_v16 }
 0xa5f   : > { %v3570_v18 = vpop.f32.mrb[56].mxu0  ;;  %v3622_v21 = vpop.f32.mrb[64].mxu1 }
 0xa60   : > { %v3571_v22 = vadd.f32 %v7089_v15, %v3570_v18  ;;  %v3623_v23 = vadd.f32 %v7090_v17, %v3622_v21  ;;  %v8194_v43 = vpop.f32.mrb[57].mxu0  ;;  %v8202_v14 = vpop.f32.mrb[65].mxu1 }
 0xa61   : > { %v3573_v24 = vpop.f32.mrb[58].mxu0  ;;  %v3625_v27 = vpop.f32.mrb[66].mxu1 }
 0xa62   : > { %v3758_v28 = vpack.c.bf16 %v3571_v22, %v3571_v22  ;;  %v3759_v29 = vpack.c.bf16 %v3623_v23, %v3623_v23  ;;  %v8195_v30 = vpop.f32.mrb[59].mxu0  ;;  %v8203_v31 = vpop.f32.mrb[67].mxu1 }
 0xa63   : > { %v8605_v31 = vld [vmem:[%s10668_s7 + $0x18] sm:$0xff]  }
 0xa64   : > { %v3764_v33 = vsel %vm986_vm2, %v3758_v28, 0  ;;  %v3810_v34 = vsel %vm986_vm2, %v3759_v29, 0 }
 0xa65   : > { %8221 = vmatpush3.bf16.xpose.msra.mxu0 %v3764_v33  ;;  %8227 = vmatpush3.bf16.xpose.msra.mxu1 %v3810_v34 }
 0xa66   : > { %8232 = vmatprep.subr.bf16.mxu0 %v8823_v1  ;;  %8238 = vmatprep.subr.bf16.mxu1 %v8823_v1 }
 0xa67   : > { %v3698_v38 = vpop.f32.mrb[60].mxu0  ;;  %v3750_v39 = vpop.f32.mrb[68].mxu1 }
 0xa68   : > { %v3699_v45 = vadd.f32 %v7107_v36, %v3698_v38  ;;  %v3751_v20 = vadd.f32 %v7108_v37, %v3750_v39  ;;  %v8210_v35 = vpop.f32.mrb[61].mxu0  ;;  %v8218_v40 = vpop.f32.mrb[69].mxu1 }
 0xa69   : > { %v3701_v42 = vpop.f32.mrb[62].mxu0  ;;  %v3753_v44 = vpop.f32.mrb[70].mxu1 }
 0xa6a   : > { %v3878_v11 = vpack.c.bf16 %v3699_v45, %v3699_v45  ;;  %v3879_v25 = vpack.c.bf16 %v3751_v20, %v3751_v20  ;;  %v8211_v53 = vpop.f32.mrb[63].mxu0  ;;  %v8219_v54 = vpop.f32.mrb[71].mxu1 }
 0xa6c   : > { %v3884_v58 = vsel %vm1111_vm3, %v3878_v11, 0  ;;  %v3930_v59 = vsel %vm1111_vm3, %v3879_v25, 0  ;;  %8223 = vmatmul.mubr.msk.bf16.vlgmr.msra.gmra.mrb[64].mxu0 %vm986_vm2, %v3756_v46  ;;  %8229 = vmatmul.mubr.msk.bf16.vlgmr.msra.gmra.mrb[72].mxu1 %vm986_vm2, %v3757_v52  ;;  %v7128_v11 = vld [vmem:[%s10669_s8 + $0x1] ss:$0 sm:$0xff] }
 0xa6d   : > { %8233 = vmatpush3.bf16.msra.mxu0 %v3884_v58  ;;  %8239 = vmatpush3.bf16.msra.mxu1 %v3930_v59 }
 0xa6e   : > { %8234 = vmatprep.mubr.msk.bf16.mxu0 %vm8824_vm0, %v8823_v1  ;;  %8240 = vmatprep.mubr.msk.bf16.mxu1 %vm8824_vm0, %v8823_v1 }
 0xa6f   : > { %8244 = vmatprep.subr.bf16.mxu0 %v8823_v1  ;;  %8250 = vmatprep.subr.bf16.mxu1 %v8823_v1 }
 0xb3f   : > { %v3800_v9 = vpop.f32.mrb[64].mxu0  ;;  %v3846_v61 = vpop.f32.mrb[72].mxu1 }
 0xb40   : > { %v3852_v62 = vmul.f32 0.25, %v3800_v9  ;;  %v3853_v0 = vmul.f32 0.25, %v3846_v61  ;;  %v8224_v41 = vpop.f32.mrb[65].mxu0  ;;  %v8230_v3 = vpop.f32.mrb[73].mxu1 }
 0xb41   : > { %v3803_v4 = vpop.f32.mrb[66].mxu0  ;;  %v3849_v5 = vpop.f32.mrb[74].mxu1 }
 0xb42   : > { %v8225_v6 = vpop.f32.mrb[67].mxu0  ;;  %v8231_v7 = vpop.f32.mrb[75].mxu1  ;;  %v3857_v47 = vsel %vm1081_vm4, %v3853_v0, -inf  ;;  %v3854_v8 = vsel %vm1081_vm4, %v3852_v62, -inf }
 0xb43   : > { %3858 = vmax.xlane.f32.xlu1 %v3857_v47  ;;  %3855 = vmax.xlane.f32.xlu0 %v3854_v8  ;;  %v7133_v7 = vld [vmem:[%s10672_s11 + $0x100] sm:$0xff] }
 0xb44   : > { %v7141_v47 = vld [vmem:[%s10672_s11 + $0x140] sm:$0xff] }
 0xb45   : > { %v7168_v8 = vcombine.high %v7133_v7, %v7141_v47 }
 0xbd0   : > { %v3859_v10 = vpop.xlane.xlu1 %3858  ;;  %v3856_v12 = vpop.xlane.xlu0 %3855 }
 0xbd1   : > { %v3861_v13 = vsub.f32 %v3853_v0, %v3859_v10  ;;  %v3860_v15 = vsub.f32 %v3852_v62, %v3856_v12  ;;  %v7142_v10 = vld [vmem:[%s10672_s11 + $0x148] sm:$0xff]  ;;  %v7167_v12 = vcombine.low %v7133_v7, %v7141_v47 }
 0xbd3   : > { %v3864_v17 = vmul.f32 1.442695, %v3861_v13  ;;  %v3862_v18 = vmul.f32 1.442695, %v3860_v15 }
 0xbd5   : > { %8746 = vpow2.f32 %v3864_v17  ;;  %v7149_v17 = vld [vmem:[%s10672_s11 + $0x180] sm:$0xff] }
 0xbd6   : > { %8748 = vpow2.f32 %v3862_v18  ;;  %v7157_v18 = vld [vmem:[%s10672_s11 + $0x1c0] sm:$0xff] }
 0xbdf   : > { %v8747_v21 = vpop.eup %8746 }
 0xbe0   : > { %v8749_v22 = vpop.eup %8748  ;;  %v3869_v23 = vsel %vm1081_vm4, %v8747_v21, 0.0 }
 0xbe1   : > { %3870 = vadd.xlane.f32.xlu1 %v3869_v23  ;;  %v3866_v43 = vsel %vm1081_vm4, %v8749_v22, 0.0  ;;  %v7158_v23 = vld [vmem:[%s10672_s11 + $0x1c8] sm:$0xff] }
 0xbe2   : > { %3867 = vadd.xlane.f32.xlu0 %v3866_v43  ;;  %v7183_v43 = vcombine.low %v7149_v17, %v7157_v18 }
 0xc6e   : > { %v3871_v14 = vpop.xlane.xlu1 %3870 }
 0xc6f   : > { %8750 = vrcp.f32 %v3871_v14  ;;  %v3868_v24 = vpop.xlane.xlu0 %3867 }
 0xc70   : > { %8752 = vrcp.f32 %v3868_v24 }
 0xc79   : > { %v8751_v27 = vpop.eup %8750 }
 0xc7a   : > { %v8753_v28 = vpop.eup %8752  ;;  %v3875_v29 = vmul.f32 %v8751_v27, %v8747_v21  ;;  %v7150_v21 = vld [vmem:[%s10672_s11 + $0x188] sm:$0xff]  ;;  %v7135_v27 = vld [vmem:[%s10672_s11 + $0x110] sm:$0xff] }
 0xc7b   : > { %v3873_v30 = vmul.f32 %v8753_v28, %v8749_v22  ;;  %v7184_v22 = vcombine.high %v7149_v17, %v7157_v18  ;;  %v7185_v14 = vcombine.low %v7150_v21, %v7158_v23  ;;  %v7186_v24 = vcombine.high %v7150_v21, %v7158_v23  ;;  %v7143_v28 = vld [vmem:[%s10672_s11 + $0x150] sm:$0xff]  ;;  %v7156_v23 = vld [vmem:[%s10672_s11 + $0x1b8] sm:$0xff] }
 0xc7c   : > { %v3877_v32 = vpack.c.bf16 %v3875_v29, %v3875_v29  ;;  %v7136_v29 = vld [vmem:[%s10672_s11 + $0x118] sm:$0xff]  ;;  %v7155_v21 = vld [vmem:[%s10672_s11 + $0x1b0] sm:$0xff] }
 0xc7d   : > { %v3876_v33 = vpack.c.bf16 %v3873_v30, %v3873_v30  ;;  %v7172_v30 = vcombine.high %v7135_v27, %v7143_v28 }
 0xc7e   : > { %8241 = vmatmul.mubr.msk.bf16.vlgmr.msra.gmra.mrb[76].mxu1 %vm1081_vm4, %v3877_v32  ;;  %v7171_v32 = vcombine.low %v7135_v27, %v7143_v28 }
 0xc7f   : > { %8235 = vmatmul.mubr.msk.bf16.vlgmr.msra.gmra.mrb[68].mxu0 %vm1081_vm4, %v3876_v33  ;;  %8251 = vmatpush3.bf16.msra.mxu1 %v8605_v31  ;;  %v7144_v31 = vld [vmem:[%s10672_s11 + $0x158] sm:$0xff] }
 0xc80   : > { %8245 = vmatpush3.bf16.msra.mxu0 %v8604_v49  ;;  %8246 = vmatprep.mubr.msk.bf16.mxu0 %vm8824_vm0, %v8823_v1  ;;  %v7173_v49 = vcombine.low %v7136_v29, %v7144_v31  ;;  %v7174_v33 = vcombine.high %v7136_v29, %v7144_v31  ;;  %v8606_v31 = vld [vmem:[%s10674_s13 + $0x440] sm:$0xff]  }
 0xc81   : > { %8252 = vmatprep.mubr.msk.bf16.mxu1 %vm8824_vm0, %v8823_v1  ;;  %4403 = vmatprep.subr.bf16.mxu0 %v7168_v8  ;;  %v7147_v8 = vld [vmem:[%s10672_s11 + $0x170] sm:$0xff] }
 0xd51   : > { %v3966_v34 = vpop.f32.mrb[76].mxu1 }
 0xd52   : > { %v3920_v36 = vpop.f32.mrb[68].mxu0  ;;  %v3973_v37 = vpack.c.bf16 %v3966_v34, %v3966_v34  ;;  %v8242_v56 = vpop.f32.mrb[77].mxu1 }
 0xd53   : > { %v3972_v16 = vpack.c.bf16 %v3920_v36, %v3920_v36  ;;  %v8236_v38 = vpop.f32.mrb[69].mxu0  ;;  %v3969_v39 = vpop.f32.mrb[78].mxu1 }
 0xd54   : > { %v3923_v45 = vpop.f32.mrb[70].mxu0  ;;  %v8243_v20 = vpop.f32.mrb[79].mxu1  ;;  %8253 = vmatmul.mubr.msk.bf16.vlgmr.msra.gmra.mrb[80].mxu1 %vm986_vm2, %v3973_v37  ;;  %v7132_v39 = vld [vmem:[%s10671_s10 + $0x1] ss:$0 sm:$0xff] }
 0xd55   : > { %v8237_v35 = vpop.f32.mrb[71].mxu0  ;;  %8247 = vmatmul.mubr.msk.bf16.vlgmr.msra.gmra.mrb[72].mxu0 %vm986_vm2, %v3972_v16  ;;  %4476 = vmatprep.mubr.bf16.mxu1 %v8825_v19  ;;  %v7131_v16 = vld [vmem:[%s10670_s9 + $0x1] ss:$0 sm:$0xff]  ;;  %v7151_v20 = vld [vmem:[%s10672_s11 + $0x190] sm:$0xff] }
 0xd56   : > { %4435 = vmatprep.mubr.bf16.mxu0 %v8825_v19  ;;  %4404 = vmatpush1.bf16.msra.mxu0 %v7167_v12  ;;  %v7159_v35 = vld [vmem:[%s10672_s11 + $0x1d0] sm:$0xff]  ;;  %v7148_v12 = vld [vmem:[%s10672_s11 + $0x178] sm:$0xff] }
 0xd57   : > { %4405 = vmatprep.subr.bf16.mxu0 %v7184_v22  ;;  %v7163_v22 = vld [vmem:[%s10672_s11 + $0x1f0] sm:$0xff] }
 0xd58   : > { %v7196_v27 = vcombine.high %v7155_v21, %v7163_v22  ;;  %v7195_v29 = vcombine.low %v7155_v21, %v7163_v22 }
 0xd5a   : > { %4406 = vmatpush1.bf16.msra.mxu0 %v7183_v43  ;;  %v7164_v43 = vld [vmem:[%s10672_s11 + $0x1f8] sm:$0xff] }
 0xd5b   : > { %4485 = vmatprep.subr.bf16.mxu0 %v7172_v30  ;;  %v7198_v28 = vcombine.high %v7156_v23, %v7164_v43  ;;  %v7197_v30 = vcombine.low %v7156_v23, %v7164_v43 }
 0xe27   : > { %v4071_v40 = vpop.f32.mrb[80].mxu1 }
 0xe28   : > { %v4022_v42 = vpop.f32.mrb[72].mxu0  ;;  %v4078_v44 = vsel %vm634_vm1, %v4071_v40, 0.0  ;;  %v8254_v46 = vpop.f32.mrb[81].mxu1  ;;  %v7152_v40 = vld [vmem:[%s10672_s11 + $0x198] sm:$0xff] }
 0xe29   : > { %v4077_v52 = vsel %vm634_vm1, %v4022_v42, 0.0  ;;  %v8248_v25 = vpop.f32.mrb[73].mxu0  ;;  %v4074_v53 = vpop.f32.mrb[82].mxu1  ;;  %v7160_v42 = vld [vmem:[%s10672_s11 + $0x1d8] sm:$0xff] }
 0xe2a   : > { %v4079_v54 = vadd.f32 %v4078_v44, %v4077_v52  ;;  %v4025_v58 = vpop.f32.mrb[74].mxu0  ;;  %v8255_v59 = vpop.f32.mrb[83].mxu1  ;;  %v7188_v52 = vcombine.high %v7151_v20, %v7159_v35  ;;  %v7137_v25 = vld [vmem:[%s10672_s11 + $0x120] sm:$0xff] }
 0xe2b   : > { %v8249_v9 = vpop.f32.mrb[75].mxu0  ;;  %v7145_v53 = vld [vmem:[%s10672_s11 + $0x160] sm:$0xff]  ;;  %v7146_v58 = vld [vmem:[%s10672_s11 + $0x168] sm:$0xff]  ;;  %v7187_v59 = vcombine.low %v7151_v20, %v7159_v35  ;;  %v8619_v20 = vld [vmem:[%s10674_s13 + $0x4d8] sm:$0xff]  }
 0xe2c   : > { %v4088_v61 = vadd.f32 %v7128_v11, %v4079_v54  ;;  %v7190_v11 = vcombine.high %v7152_v40, %v7160_v42  ;;  %v7138_v54 = vld [vmem:[%s10672_s11 + $0x128] sm:$0xff]  ;;  %v7189_v9 = vcombine.low %v7152_v40, %v7160_v42  ;;  %v8620_v35 = vld [vmem:[%s10674_s13 + $0x418] sm:$0xff]   ;;  %v8622_v42 = vld [vmem:[%s10674_s13 + $0x460] sm:$0xff]  }
 0xe2d   : > { %v8621_v40 = vld [vmem:[%s10674_s13 + $0x498] sm:$0xff]  }
 0xe2e   : > { %v4089_v62 = vadd.f32 %v4088_v61, %v9759_v55  ;;  %v7134_v55 = vld [vmem:[%s10672_s11 + $0x108] sm:$0xff]  ;;  %v7176_v61 = vcombine.high %v7137_v25, %v7145_v53 }
 0xe2f   : > { %v7169_v13 = vcombine.low %v7134_v55, %v7142_v10  ;;  %v7170_v15 = vcombine.high %v7134_v55, %v7142_v10  ;;  %v7139_v55 = vld [vmem:[%s10672_s11 + $0x130] sm:$0xff]  ;;  %v7140_v10 = vld [vmem:[%s10672_s11 + $0x138] sm:$0xff] }
 0xe30   : > { %v4094_v0 = vsel %vm634_vm1, %v4089_v62, 0.0  ;;  %v7180_v17 = vcombine.high %v7139_v55, %v7147_v8  ;;  %v7182_v18 = vcombine.high %v7140_v10, %v7148_v12 }
 0xe31   : > { %4095 = vadd.xlane.f32.xlu0 %v4094_v0  ;;  %4444 = vmatprep.subr.bf16.mxu1 %v7170_v15  ;;  %v7153_v0 = vld [vmem:[%s10672_s11 + $0x1a0] sm:$0xff] }
 0xe32   : > { %4445 = vmatpush1.bf16.msra.mxu1 %v7169_v13 }
 0xe33   : > { %4446 = vmatprep.subr.bf16.mxu1 %v7186_v24  ;;  %v7181_v24 = vcombine.low %v7140_v10, %v7148_v12 }
 0xe36   : > { %4447 = vmatpush1.bf16.msra.mxu1 %v7185_v14  ;;  %v7179_v14 = vcombine.low %v7139_v55, %v7147_v8 }
 0xe37   : > { %4526 = vmatprep.subr.bf16.mxu1 %v7174_v33  ;;  %v8609_v33 = vld [vmem:[%s10674_s13 + $0x480] sm:$0xff]  }
 0xebe   : > { %v4096_v41 = vpop.xlane.xlu0 %4095 }
 0xebf   : > { %v4097_v3 = vmul.f32 0.03125, %v4096_v41  ;;  %v7161_v41 = vld [vmem:[%s10672_s11 + $0x1e0] sm:$0xff] }
 0xec0   : > { %v7192_v7 = vcombine.high %v7153_v0, %v7161_v41  ;;  %v7191_v13 = vcombine.low %v7153_v0, %v7161_v41  ;;  %v8634_v0 = vld [vmem:[%s10674_s13 + $0x478] sm:$0xff]  }
 0xec1   : > { %v4098_v4 = vsub.f32 %v4089_v62, %v4097_v3  ;;  %v7178_v62 = vcombine.high %v7138_v54, %v7146_v58  ;;  %v7154_v3 = vld [vmem:[%s10672_s11 + $0x1a8] sm:$0xff]  ;;  %v8635_v41 = vld [vmem:[%s10674_s13 + $0x4f8] sm:$0xff]  }
 0xec3   : > { %v4099_v5 = vmul.f32 %v4098_v4, %v4098_v4 }
 0xec5   : > { %v4100_v6 = vsel %vm634_vm1, %v4099_v5, 0.0  ;;  %v7175_v5 = vcombine.low %v7137_v25, %v7145_v53  ;;  %v8626_v25 = vld [vmem:[%s10674_s13 + $0x468] sm:$0xff]  }
 0xec6   : > { %4101 = vadd.xlane.f32.xlu1 %v4100_v6  ;;  %v7177_v6 = vcombine.low %v7138_v54, %v7146_v58  ;;  %v8627_v53 = vld [vmem:[%s10674_s13 + $0x4e8] sm:$0xff]  }
 0xec7   : > { %v8628_v54 = vld [vmem:[%s10674_s13 + $0x428] sm:$0xff]  }
 0xec8   : > { %v8629_v58 = vld [vmem:[%s10674_s13 + $0x4a8] sm:$0xff]  }
 0xf53   : > { %v4102_v34 = vpop.xlane.xlu1 %4101 }
 0xf54   : > { %v4103_v36 = vmul.f32 0.03125, %v4102_v34  ;;  %v8610_v34 = vld [vmem:[%s10674_s13 + $0x448] sm:$0xff]  }
 0xf56   : > { %v4104_v37 = vadd.f32 1e-05, %v4103_v36  ;;  %v8612_v36 = vld [vmem:[%s10674_s13 + $0x408] sm:$0xff]  }
 0xf58   : > { %8754 = vrsqrt.f32 %v4104_v37  ;;  %v8613_v37 = vld [vmem:[%s10674_s13 + $0x488] sm:$0xff]  }
 0xf62   : > { %v8755_v56 = vpop.eup %8754 }
 0xf63   : > { %v4106_v38 = vmul.f32 %v8755_v56, %v4098_v4  ;;  %v7162_v4 = vld [vmem:[%s10672_s11 + $0x1e8] sm:$0xff]  ;;  %v8614_v56 = vld [vmem:[%s10674_s13 + $0x450] sm:$0xff]  }
 0xf64   : > { %v7194_v47 = vcombine.high %v7154_v3, %v7162_v4  ;;  %v7193_v15 = vcombine.low %v7154_v3, %v7162_v4  ;;  %v8636_v3 = vld [vmem:[%s10674_s13 + $0x438] sm:$0xff]  }
 0xf65   : > { %v4113_v45 = vmul.f32 %v7131_v16, %v4106_v38  ;;  %v8615_v16 = vld [vmem:[%s10674_s13 + $0x4d0] sm:$0xff]   ;;  %v8637_v4 = vld [vmem:[%s10674_s13 + $0x4b8] sm:$0xff]  }
 0xf66   : > { %v8616_v38 = vld [vmem:[%s10674_s13 + $0x410] sm:$0xff]  }
 0xf67   : > { %v9927_v44 = vadd.f32 %v7132_v39, %v4113_v45  ;;  %v8617_v39 = vld [vmem:[%s10674_s13 + $0x490] sm:$0xff]   ;;  %v8618_v45 = vld [vmem:[%s10674_s13 + $0x458] sm:$0xff]  }
 0xf69   : > { %v9931_v46 = vpack.c.bf16 %v9927_v44, %v9927_v44 }
 0xf6b   : > { %7199 = vmatmul.mubr.msk.bf16.vlgmr.msra.gmra.mrb[76].mxu0 %vm634_vm1, %v9931_v46  ;;  %7200 = vmatmul.mubr.msk.bf16.vlgmr.msra.gmra.mrb[84].mxu1 %vm634_vm1, %v9931_v46 }
 0xf6c   : > { %4486 = vmatpush1.bf16.msra.mxu0 %v7171_v32  ;;  %4527 = vmatpush1.bf16.msra.mxu1 %v7173_v49  ;;  %v8607_v32 = vld [vmem:[%s10674_s13 + $0x4c0] sm:$0xff]  }
 0xf6d   : > { %4487 = vmatprep.subr.bf16.mxu0 %v7188_v52  ;;  %4528 = vmatprep.subr.bf16.mxu1 %v7190_v11  ;;  %v8608_v49 = vld [vmem:[%s10674_s13 + $0x400] sm:$0xff]  }
 0xf6e   : > { %4517 = vmatprep.mubr.bf16.mxu0 %v8825_v19  ;;  %4558 = vmatprep.mubr.bf16.mxu1 %v8825_v19  ;;  %v8624_v52 = vld [vmem:[%s10674_s13 + $0x420] sm:$0xff]  }
 0xf6f   : > { %v8625_v11 = vld [vmem:[%s10674_s13 + $0x4a0] sm:$0xff]  }
 0xf70   : > { %4488 = vmatpush1.bf16.msra.mxu0 %v7187_v59  ;;  %4529 = vmatpush1.bf16.msra.mxu1 %v7189_v9  ;;  %v8630_v59 = vld [vmem:[%s10674_s13 + $0x470] sm:$0xff]  }
 0xf71   : > { %4567 = vmatprep.subr.bf16.mxu0 %v7176_v61  ;;  %4608 = vmatprep.subr.bf16.mxu1 %v7178_v62  ;;  %v8631_v9 = vld [vmem:[%s10674_s13 + $0x4f0] sm:$0xff]  }
 0xf72   : > { %v8632_v61 = vld [vmem:[%s10674_s13 + $0x430] sm:$0xff]  }
 0xf73   : > { %7201 = vmatmul.mubr.msk.bf16.vlgmr.msra.gmra.mrb[80].mxu0 %vm634_vm1, %v9931_v46  ;;  %7202 = vmatmul.mubr.msk.bf16.vlgmr.msra.gmra.mrb[88].mxu1 %vm634_vm1, %v9931_v46  ;;  %v8633_v62 = vld [vmem:[%s10674_s13 + $0x4b0] sm:$0xff]  }
 0xf74   : > { %4568 = vmatpush1.bf16.msra.mxu0 %v7175_v5  ;;  %4609 = vmatpush1.bf16.msra.mxu1 %v7177_v6  ;;  %v8638_v5 = vld [vmem:[%s10674_s13 + $0x540] sm:$0xff]  }
 0xf75   : > { %4569 = vmatprep.subr.bf16.mxu0 %v7192_v7  ;;  %4610 = vmatprep.subr.bf16.mxu1 %v7194_v47  ;;  %v8639_v6 = vld [vmem:[%s10674_s13 + $0x5c0] sm:$0xff]   ;;  %v10108_v7 = vld [vmem:[%s10673_s12 + $0x10] sm:$0xff] }
 0xf76   : > { %4599 = vmatprep.mubr.bf16.mxu0 %v8825_v19  ;;  %4640 = vmatprep.mubr.bf16.mxu1 %v8825_v19  ;;  %v4163_v47 = vrot.slane %v10108_v7, %v9351_v48  ;;  %v4171_v55 = vrot.slane %v10108_v7, %v9401_v26  ;;  %v4167_v8 = vrot.slane %v10108_v7, %v9359_v50 }
 0xf77   : > { %v4175_v10 = vrot.slane %v10108_v7, %v9362_v51 }
 0xf78   : > { %4570 = vmatpush1.bf16.msra.mxu0 %v7191_v13  ;;  %4611 = vmatpush1.bf16.msra.mxu1 %v7193_v15 }
 0xf79   : > { %4649 = vmatprep.subr.bf16.mxu0 %v7180_v17  ;;  %4690 = vmatprep.subr.bf16.mxu1 %v7182_v18 }
 0xf7b   : > { %7203 = vmatmul.mubr.msk.bf16.vlgmr.msra.gmra.mrb[84].mxu0 %vm634_vm1, %v9931_v46  ;;  %7204 = vmatmul.mubr.msk.bf16.vlgmr.msra.gmra.mrb[92].mxu1 %vm634_vm1, %v9931_v46 }
 0xf7c   : > { %4650 = vmatpush1.bf16.msra.mxu0 %v7179_v14  ;;  %4691 = vmatpush1.bf16.msra.mxu1 %v7181_v24 }
 0xf7d   : > { %4651 = vmatprep.subr.bf16.mxu0 %v7196_v27  ;;  %4692 = vmatprep.subr.bf16.mxu1 %v7198_v28 }
 0xf7e   : > { %4681 = vmatprep.mubr.bf16.mxu0 %v8825_v19  ;;  %4722 = vmatprep.mubr.bf16.mxu1 %v8825_v19  ;;  %v8611_v19 = vld [vmem:[%s10674_s13 + $0x4c8] sm:$0xff]  }
 0xf80   : > { %4652 = vmatpush1.bf16.msra.mxu0 %v7195_v29  ;;  %4693 = vmatpush1.bf16.msra.mxu1 %v7197_v30 }
 0xf81   : > { %7872 = vmatprep.subr.bf16.mxu0 %v8606_v31  ;;  %7894 = vmatprep.subr.bf16.mxu1 %v8607_v32 }
 0xf83   : > { %7205 = vmatmul.mubr.msk.bf16.vlgmr.msra.gmra.mrb[88].mxu0 %vm634_vm1, %v9931_v46  ;;  %7206 = vmatmul.mubr.msk.bf16.vlgmr.msra.gmra.mrb[96].mxu1 %vm634_vm1, %v9931_v46  ;;  %v8623_v46 = vld [vmem:[%s10674_s13 + $0x4e0] sm:$0xff]  }
 0xf84   : > { %7873 = vmatpush3.bf16.msra.mxu0 %v8608_v49  ;;  %7895 = vmatpush3.bf16.msra.mxu1 %v8609_v33  ;;  %v4183_v33 = vrot.slane %v10108_v7, %v9376_v2 }
 0xf85   : > { %7874 = vmatprep.subr.bf16.mxu0 %v8610_v34  ;;  %7896 = vmatprep.subr.bf16.mxu1 %v8611_v19  ;;  %v4191_v34 = vrot.slane %v10108_v7, %v9444_v63  ;;  %v8640_v19 = vld [vmem:[%s10674_s13 + $0x500] sm:$0xff]  }
 0xf88   : > { %7875 = vmatpush3.bf16.msra.mxu0 %v8612_v36  ;;  %7897 = vmatpush3.bf16.msra.mxu1 %v8613_v37  ;;  %v8641_v36 = vld [vmem:[%s10674_s13 + $0x580] sm:$0xff]  }
 0xf89   : > { %7876 = vmatprep.subr.bf16.mxu0 %v8614_v56  ;;  %7898 = vmatprep.subr.bf16.mxu1 %v8615_v16  ;;  %v8642_v16 = vld [vmem:[%s10674_s13 + $0x548] sm:$0xff]  }
 0xf8c   : > { %7877 = vmatpush3.bf16.msra.mxu0 %v8616_v38  ;;  %7899 = vmatpush3.bf16.msra.mxu1 %v8617_v39  ;;  %v8643_v38 = vld [vmem:[%s10674_s13 + $0x5c8] sm:$0xff]  }
 0xf8d   : > { %7878 = vmatprep.subr.bf16.mxu0 %v8618_v45  ;;  %7900 = vmatprep.subr.bf16.mxu1 %v8619_v20 }
 0xf90   : > { %7879 = vmatpush3.bf16.msra.mxu0 %v8620_v35  ;;  %7901 = vmatpush3.bf16.msra.mxu1 %v8621_v40 }
 0xf91   : > { %7880 = vmatprep.subr.bf16.mxu0 %v8622_v42  ;;  %7902 = vmatprep.subr.bf16.mxu1 %v8623_v46 }
 0xf94   : > { %7881 = vmatpush3.bf16.msra.mxu0 %v8624_v52  ;;  %7903 = vmatpush3.bf16.msra.mxu1 %v8625_v11  ;;  %v8644_v11 = vld [vmem:[%s10674_s13 + $0x508] sm:$0xff]  }
 0xf95   : > { %7882 = vmatprep.subr.bf16.mxu0 %v8626_v25  ;;  %7904 = vmatprep.subr.bf16.mxu1 %v8627_v53  ;;  %v8645_v25 = vld [vmem:[%s10674_s13 + $0x588] sm:$0xff]  }
 0xf98   : > { %7883 = vmatpush3.bf16.msra.mxu0 %v8628_v54  ;;  %7905 = vmatpush3.bf16.msra.mxu1 %v8629_v58  ;;  %v8646_v58 = vld [vmem:[%s10674_s13 + $0x550] sm:$0xff]  }
 0xf99   : > { %7884 = vmatprep.subr.bf16.mxu0 %v8630_v59  ;;  %7906 = vmatprep.subr.bf16.mxu1 %v8631_v9  ;;  %v8647_v59 = vld [vmem:[%s10674_s13 + $0x5d0] sm:$0xff]  }
 0xf9c   : > { %7885 = vmatpush3.bf16.msra.mxu0 %v8632_v61  ;;  %7907 = vmatpush3.bf16.msra.mxu1 %v8633_v62 }
 0xf9d   : > { %7886 = vmatprep.subr.bf16.mxu0 %v8634_v0  ;;  %7908 = vmatprep.subr.bf16.mxu1 %v8635_v41  ;;  %v8648_v41 = vld [vmem:[%s10674_s13 + $0x510] sm:$0xff]  }
 0xfa0   : > { %7887 = vmatpush3.bf16.msra.mxu0 %v8636_v3  ;;  %7909 = vmatpush3.bf16.msra.mxu1 %v8637_v4  ;;  %v8649_v3 = vld [vmem:[%s10674_s13 + $0x590] sm:$0xff]   ;;  %v8650_v4 = vld [vmem:[%s10674_s13 + $0x558] sm:$0xff]  }
 0xfa1   : > { %7916 = vmatprep.subr.bf16.mxu0 %v8638_v5  ;;  %7938 = vmatprep.subr.bf16.mxu1 %v8639_v6  ;;  %v8651_v5 = vld [vmem:[%s10674_s13 + $0x5d8] sm:$0xff]  }
0x103e   : > { %v4437_v12 = vpop.f32.mrb[76].mxu0  ;;  %v4478_v13 = vpop.f32.mrb[84].mxu1 }
0x103f   : > { %v4438_v15 = vadd.f32 %v4437_v12, %v4163_v47  ;;  %v4479_v17 = vadd.f32 %v4478_v13, %v4171_v55  ;;  %v4439_v18 = vpop.f32.mrb[77].mxu0  ;;  %v4480_v21 = vpop.f32.mrb[85].mxu1  ;;  %v8652_v13 = vld [vmem:[%s10674_s13 + $0x518] sm:$0xff]  }
0x1040   : > { %v4440_v22 = vadd.f32 %v4439_v18, %v4167_v8  ;;  %v4481_v23 = vadd.f32 %v4480_v21, %v4175_v10  ;;  %v4441_v43 = vpop.f32.mrb[78].mxu0  ;;  %v4482_v14 = vpop.f32.mrb[86].mxu1  ;;  %v8654_v21 = vld [vmem:[%s10674_s13 + $0x560] sm:$0xff]  }
0x1041   : > { %v4731_v24 = vmax.f32 %v4438_v15, 0.0  ;;  %v4733_v27 = vmax.f32 %v4479_v17, 0.0  ;;  %v4442_v28 = vpop.f32.mrb[79].mxu0  ;;  %v4483_v29 = vpop.f32.mrb[87].mxu1  ;;  %v8653_v15 = vld [vmem:[%s10674_s13 + $0x598] sm:$0xff]   ;;  %v8656_v14 = vld [vmem:[%s10674_s13 + $0x520] sm:$0xff]  }
0x1042   : > { %v4732_v30 = vmax.f32 %v4440_v22, 0.0  ;;  %v4734_v31 = vmax.f32 %v4481_v23, 0.0  ;;  %v8655_v22 = vld [vmem:[%s10674_s13 + $0x5e0] sm:$0xff]   ;;  %v10181_v23 = vld [vmem:[%s10673_s12 + $0x18] sm:$0xff]  ;;  %v8659_v28 = vld [vmem:[%s10674_s13 + $0x5e8] sm:$0xff]  }
0x1043   : > { %v4747_v37 = vpack.c.bf16 %v4731_v24, %v4731_v24  ;;  %v4749_v56 = vpack.c.bf16 %v4733_v27, %v4733_v27  ;;  %v4219_v43 = vrot.slane %v10181_v23, %v9435_v57  ;;  %v8657_v24 = vld [vmem:[%s10674_s13 + $0x5a0] sm:$0xff]   ;;  %v8658_v27 = vld [vmem:[%s10674_s13 + $0x568] sm:$0xff]  }
0x1044   : > { %v4748_v32 = vpack.c.bf16 %v4732_v30, %v4732_v30  ;;  %v4750_v49 = vpack.c.bf16 %v4734_v31, %v4734_v31 }
0x1046   : > { %v10134_v39 = vpop.f32.mrb[80].mxu0  ;;  %v10136_v45 = vpop.f32.mrb[88].mxu1  ;;  %5828 = vmatprep.mubr.bf16.mxu0 %v4748_v32  ;;  %5868 = vmatprep.mubr.bf16.mxu1 %v4750_v49 }
0x1047   : > { %v4521_v20 = vpop.f32.mrb[81].mxu0  ;;  %v4562_v35 = vpop.f32.mrb[89].mxu1  ;;  %5829 = vmatmul.mubr.bf16.vlgmr.msra.gmra.mrb[92].mxu0 %v4747_v37  ;;  %5869 = vmatmul.mubr.bf16.vlgmr.msra.gmra.mrb[100].mxu1 %v4749_v56  ;;  %v4179_v37 = vrot.slane %v10108_v7, %v9373_v60  ;;  %v4187_v56 = vrot.slane %v10108_v7, %v9435_v57  ;;  %v8664_v57 = vld [vmem:[%s10674_s13 + $0x530] sm:$0xff]  }
0x1048   : > { %v4522_v40 = vadd.f32 %v4521_v20, %v4183_v33  ;;  %v4563_v42 = vadd.f32 %v4562_v35, %v4191_v34  ;;  %7917 = vmatpush3.bf16.msra.mxu0 %v8640_v19  ;;  %7939 = vmatpush3.bf16.msra.mxu1 %v8641_v36  ;;  %v4523_v46 = vpop.f32.mrb[82].mxu0  ;;  %v4564_v52 = vpop.f32.mrb[90].mxu1  ;;  %v8660_v19 = vld [vmem:[%s10674_s13 + $0x528] sm:$0xff]   ;;  %v8662_v20 = vld [vmem:[%s10674_s13 + $0x570] sm:$0xff]  }
0x1049   : > { %v4524_v53 = vpop.f32.mrb[83].mxu0  ;;  %v4565_v54 = vpop.f32.mrb[91].mxu1  ;;  %7918 = vmatprep.subr.bf16.mxu0 %v8642_v16  ;;  %7940 = vmatprep.subr.bf16.mxu1 %v8643_v38  ;;  %v8661_v36 = vld [vmem:[%s10674_s13 + $0x5a8] sm:$0xff]   ;;  %v8663_v35 = vld [vmem:[%s10674_s13 + $0x5f0] sm:$0xff]   ;;  %v4520_v46 = vadd.f32 %v10134_v39, %v4179_v37  ;;  %v4561_v52 = vadd.f32 %v10136_v45, %v4187_v56  ;;  %v8668_v39 = vld [vmem:[%s10674_s13 + $0x538] sm:$0xff]  }
0x104a   : > { %v4736_v9 = vmax.f32 %v4522_v40, 0.0  ;;  %v4738_v61 = vmax.f32 %v4563_v42, 0.0  ;;  %v4199_v40 = vrot.slane %v10181_v23, %v9359_v50  ;;  %v4207_v42 = vrot.slane %v10181_v23, %v9362_v51  ;;  %v8665_v7 = vld [vmem:[%s10674_s13 + $0x5b0] sm:$0xff]   ;;  %v8666_v50 = vld [vmem:[%s10674_s13 + $0x578] sm:$0xff]   ;;  %v8693_v37 = vld [vmem:[%s10674_s13 + $0x6a8] sm:$0xff]  }
0x104b   : > { %v8667_v51 = vld [vmem:[%s10674_s13 + $0x5f8] sm:$0xff]   ;;  %v4735_v53 = vmax.f32 %v4520_v46, 0.0  ;;  %v4737_v54 = vmax.f32 %v4561_v52, 0.0  ;;  %v8694_v56 = vld [vmem:[%s10674_s13 + $0x670] sm:$0xff]   ;;  %v8702_v52 = vld [vmem:[%s10674_s13 + $0x740] sm:$0xff]  }
0x104c   : > { %v4752_v62 = vpack.c.bf16 %v4736_v9, %v4736_v9  ;;  %v4754_v0 = vpack.c.bf16 %v4738_v61, %v4738_v61  ;;  %7919 = vmatpush3.bf16.msra.mxu0 %v8644_v11  ;;  %7941 = vmatpush3.bf16.msra.mxu1 %v8645_v25  ;;  %v8669_v45 = vld [vmem:[%s10674_s13 + $0x5b8] sm:$0xff]  }
0x104d   : > { %7920 = vmatprep.subr.bf16.mxu0 %v8646_v58  ;;  %7942 = vmatprep.subr.bf16.mxu1 %v8647_v59  ;;  %v8670_v58 = vld [vmem:[%s10674_s13 + $0x640] sm:$0xff]  }
0x104e   : > { %v10162_v6 = vpop.f32.mrb[84].mxu0  ;;  %v10164_v47 = vpop.f32.mrb[92].mxu1  ;;  %5908 = vmatprep.mubr.bf16.mxu0 %v4752_v62  ;;  %5948 = vmatprep.mubr.bf16.mxu1 %v4754_v0  ;;  %v8671_v59 = vld [vmem:[%s10674_s13 + $0x6c0] sm:$0xff]   ;;  %v4751_v0 = vpack.c.bf16 %v4735_v53, %v4735_v53  ;;  %v8706_v53 = vld [vmem:[%s10674_s13 + $0x748] sm:$0xff]  }
0x104f   : > { %v4603_v55 = vpop.f32.mrb[85].mxu0  ;;  %v4644_v8 = vpop.f32.mrb[93].mxu1  ;;  %v8672_v62 = vld [vmem:[%s10674_s13 + $0x600] sm:$0xff]  }
0x1050   : > { %7921 = vmatpush3.bf16.msra.mxu0 %v8648_v41  ;;  %7943 = vmatpush3.bf16.msra.mxu1 %v8649_v3  ;;  %v4605_v10 = vpop.f32.mrb[86].mxu0  ;;  %v4646_v12 = vpop.f32.mrb[94].mxu1  ;;  %v4604_v11 = vadd.f32 %v4603_v55, %v4199_v40  ;;  %v4645_v25 = vadd.f32 %v4644_v8, %v4207_v42  ;;  %v4753_v41 = vpack.c.bf16 %v4737_v54, %v4737_v54  ;;  %v8673_v3 = vld [vmem:[%s10674_s13 + $0x680] sm:$0xff]   ;;  %v8675_v55 = vld [vmem:[%s10674_s13 + $0x6c8] sm:$0xff]  }
0x1051   : > { %v4606_v17 = vpop.f32.mrb[87].mxu0  ;;  %v4647_v18 = vpop.f32.mrb[95].mxu1  ;;  %7922 = vmatprep.subr.bf16.mxu0 %v8650_v4  ;;  %7944 = vmatprep.subr.bf16.mxu1 %v8651_v5  ;;  %v8674_v5 = vld [vmem:[%s10674_s13 + $0x648] sm:$0xff]  }
0x1052   : > { %v4740_v9 = vmax.f32 %v4604_v11, 0.0  ;;  %v4742_v61 = vmax.f32 %v4645_v25, 0.0  ;;  %v8676_v10 = vld [vmem:[%s10674_s13 + $0x608] sm:$0xff]   ;;  %v8680_v17 = vld [vmem:[%s10674_s13 + $0x610] sm:$0xff]   ;;  %v8704_v11 = vld [vmem:[%s10674_s13 + $0x700] sm:$0xff]  }
0x1053   : > { %v8677_v12 = vld [vmem:[%s10674_s13 + $0x688] sm:$0xff]   ;;  %v8681_v18 = vld [vmem:[%s10674_s13 + $0x690] sm:$0xff]  }
0x1054   : > { %7923 = vmatpush3.bf16.msra.mxu0 %v8652_v13  ;;  %7945 = vmatpush3.bf16.msra.mxu1 %v8653_v15  ;;  %v4756_v4 = vpack.c.bf16 %v4740_v9, %v4740_v9  ;;  %v4758_v8 = vpack.c.bf16 %v4742_v61, %v4742_v61  ;;  %v8678_v13 = vld [vmem:[%s10674_s13 + $0x650] sm:$0xff]   ;;  %v8708_v9 = vld [vmem:[%s10674_s13 + $0x708] sm:$0xff]  }
0x1055   : > { %7924 = vmatprep.subr.bf16.mxu0 %v8654_v21  ;;  %7946 = vmatprep.subr.bf16.mxu1 %v8655_v22  ;;  %v8679_v15 = vld [vmem:[%s10674_s13 + $0x6d0] sm:$0xff]   ;;  %v8682_v21 = vld [vmem:[%s10674_s13 + $0x658] sm:$0xff]   ;;  %v8709_v61 = vld [vmem:[%s10674_s13 + $0x788] sm:$0xff]  }
0x1056   : > { %v10197_v29 = vpop.f32.mrb[88].mxu0  ;;  %v4724_v30 = vpop.f32.mrb[96].mxu1  ;;  %v8683_v22 = vld [vmem:[%s10674_s13 + $0x6d8] sm:$0xff]  }
0x1057   : > { %v10199_v31 = vadd.f32 %v4724_v30, %v4219_v43  ;;  %v10201_v32 = vpop.f32.mrb[89].mxu0  ;;  %v10203_v49 = vpop.f32.mrb[97].mxu1  ;;  %v8684_v43 = vld [vmem:[%s10674_s13 + $0x618] sm:$0xff]   ;;  %v8689_v30 = vld [vmem:[%s10674_s13 + $0x6a0] sm:$0xff]  }
0x1058   : > { %7925 = vmatpush3.bf16.msra.mxu0 %v8656_v14  ;;  %7947 = vmatpush3.bf16.msra.mxu1 %v8657_v24  ;;  %v4687_v33 = vpop.f32.mrb[90].mxu0  ;;  %v4728_v34 = vpop.f32.mrb[98].mxu1  ;;  %v8685_v14 = vld [vmem:[%s10674_s13 + $0x698] sm:$0xff]   ;;  %v8686_v24 = vld [vmem:[%s10674_s13 + $0x660] sm:$0xff]  }
0x1059   : > { %v4688_v16 = vpop.f32.mrb[91].mxu0  ;;  %v4729_v38 = vpop.f32.mrb[99].mxu1  ;;  %7926 = vmatprep.subr.bf16.mxu0 %v8658_v27  ;;  %7948 = vmatprep.subr.bf16.mxu1 %v8659_v28  ;;  %v8687_v27 = vld [vmem:[%s10674_s13 + $0x6e0] sm:$0xff]   ;;  %v8690_v33 = vld [vmem:[%s10674_s13 + $0x668] sm:$0xff]  }
0x105a   : > { %v8688_v28 = vld [vmem:[%s10674_s13 + $0x620] sm:$0xff]   ;;  %v8691_v34 = vld [vmem:[%s10674_s13 + $0x6e8] sm:$0xff]   ;;  %v4203_v16 = vrot.slane %v10181_v23, %v9401_v26  ;;  %v8695_v38 = vld [vmem:[%s10674_s13 + $0x6f0] sm:$0xff]  }
0x105b   : > { %v8697_v26 = vld [vmem:[%s10674_s13 + $0x6b0] sm:$0xff]  }
0x105c   : > { %7927 = vmatpush3.bf16.msra.mxu0 %v8660_v19  ;;  %7949 = vmatpush3.bf16.msra.mxu1 %v8661_v36  ;;  %v8692_v19 = vld [vmem:[%s10674_s13 + $0x628] sm:$0xff]   ;;  %v4195_v36 = vrot.slane %v10181_v23, %v9351_v48  ;;  %v4215_v48 = vrot.slane %v10181_v23, %v9376_v2  ;;  %v8698_v2 = vld [vmem:[%s10674_s13 + $0x678] sm:$0xff]   ;;  %v4643_v42 = vadd.f32 %v10164_v47, %v4203_v16 }
0x105d   : > { %7928 = vmatprep.subr.bf16.mxu0 %v8662_v20  ;;  %7950 = vmatprep.subr.bf16.mxu1 %v8663_v35  ;;  %v4223_v20 = vrot.slane %v10181_v23, %v9444_v63  ;;  %v8696_v35 = vld [vmem:[%s10674_s13 + $0x630] sm:$0xff]   ;;  %v8699_v63 = vld [vmem:[%s10674_s13 + $0x6f8] sm:$0xff]  }
0x105e   : > { %v4602_v40 = vadd.f32 %v10162_v6, %v4195_v36  ;;  %v8701_v47 = vld [vmem:[%s10674_s13 + $0x6b8] sm:$0xff]  }
0x105f   : > { %v4727_v6 = vadd.f32 %v10203_v49, %v4223_v20 }
0x1060   : > { %7929 = vmatpush3.bf16.msra.mxu0 %v8664_v57  ;;  %7951 = vmatpush3.bf16.msra.mxu1 %v8665_v7  ;;  %v4686_v57 = vadd.f32 %v10201_v32, %v4215_v48  ;;  %v8700_v7 = vld [vmem:[%s10674_s13 + $0x638] sm:$0xff]   ;;  %v4739_v46 = vmax.f32 %v4602_v40, 0.0  ;;  %v8703_v32 = vld [vmem:[%s10674_s13 + $0x7c0] sm:$0xff]  }
0x1061   : > { %7930 = vmatprep.subr.bf16.mxu0 %v8666_v50  ;;  %7952 = vmatprep.subr.bf16.mxu1 %v8667_v51  ;;  %v4741_v50 = vmax.f32 %v4643_v42, 0.0  ;;  %v4746_v51 = vmax.f32 %v4727_v6, 0.0 }
0x1062   : > { %v4744_v49 = vmax.f32 %v4686_v57, 0.0  ;;  %v4755_v25 = vpack.c.bf16 %v4739_v46, %v4739_v46 }
0x1064   : > { %7931 = vmatpush3.bf16.msra.mxu0 %v8668_v39  ;;  %7953 = vmatpush3.bf16.msra.mxu1 %v8669_v45  ;;  %v8705_v39 = vld [vmem:[%s10674_s13 + $0x780] sm:$0xff]   ;;  %v4757_v45 = vpack.c.bf16 %v4741_v50, %v4741_v50  ;;  %v4760_v54 = vpack.c.bf16 %v4744_v49, %v4744_v49 }
0x1065   : > { %7960 = vmatprep.subr.bf16.mxu0 %v8670_v58  ;;  %7982 = vmatprep.subr.bf16.mxu1 %v8671_v59  ;;  %v8707_v58 = vld [vmem:[%s10674_s13 + $0x7c8] sm:$0xff]   ;;  %v4762_v59 = vpack.c.bf16 %v4746_v51, %v4746_v51 }
0x1067   : > { %5909 = vmatmul.mubr.bf16.vlgmr.msra.gmra.mrb[96].mxu0 %v4751_v0  ;;  %5949 = vmatmul.mubr.bf16.vlgmr.msra.gmra.mrb[104].mxu1 %v4753_v41  ;;  %v8711_v0 = vld [vmem:[%s10674_s13 + $0x7d0] sm:$0xff]  }
0x1068   : > { %7961 = vmatpush3.bf16.msra.mxu0 %v8672_v62  ;;  %5988 = vmatprep.mubr.bf16.mxu0 %v4756_v4  ;;  %v8710_v62 = vld [vmem:[%s10674_s13 + $0x750] sm:$0xff]   ;;  %v8714_v4 = vld [vmem:[%s10674_s13 + $0x758] sm:$0xff]  }
0x1069   : > { %7983 = vmatpush3.bf16.msra.mxu1 %v8673_v3  ;;  %6028 = vmatprep.mubr.bf16.mxu1 %v4758_v8  ;;  %v8712_v41 = vld [vmem:[%s10674_s13 + $0x710] sm:$0xff]   ;;  %v8717_v8 = vld [vmem:[%s10674_s13 + $0x798] sm:$0xff]  }
0x106a   : > { %7962 = vmatprep.subr.bf16.mxu0 %v8674_v5  ;;  %7984 = vmatprep.subr.bf16.mxu1 %v8675_v55  ;;  %v8713_v3 = vld [vmem:[%s10674_s13 + $0x790] sm:$0xff]   ;;  %v8715_v5 = vld [vmem:[%s10674_s13 + $0x7d8] sm:$0xff]  }
0x106b   : > { %v8716_v55 = vld [vmem:[%s10674_s13 + $0x718] sm:$0xff]  }
0x106c   : > { %7963 = vmatpush3.bf16.msra.mxu0 %v8676_v10  ;;  %v8718_v10 = vld [vmem:[%s10674_s13 + $0x760] sm:$0xff]  }
0x106d   : > { %7985 = vmatpush3.bf16.msra.mxu1 %v8677_v12  ;;  %7964 = vmatprep.subr.bf16.mxu0 %v8678_v13  ;;  %v8719_v12 = vld [vmem:[%s10674_s13 + $0x7e0] sm:$0xff]  }
0x106e   : > { %7986 = vmatprep.subr.bf16.mxu1 %v8679_v15  ;;  %v8720_v13 = vld [vmem:[%s10674_s13 + $0x720] sm:$0xff]  }
0x106f   : > { %v8721_v15 = vld [vmem:[%s10674_s13 + $0x7a0] sm:$0xff]  }
0x1070   : > { %7965 = vmatpush3.bf16.msra.mxu0 %v8680_v17  ;;  %v8722_v17 = vld [vmem:[%s10674_s13 + $0x768] sm:$0xff]  }
0x1071   : > { %7987 = vmatpush3.bf16.msra.mxu1 %v8681_v18  ;;  %7966 = vmatprep.subr.bf16.mxu0 %v8682_v21  ;;  %v8723_v18 = vld [vmem:[%s10674_s13 + $0x7e8] sm:$0xff]  }
0x1072   : > { %7988 = vmatprep.subr.bf16.mxu1 %v8683_v22  ;;  %v8724_v21 = vld [vmem:[%s10674_s13 + $0x728] sm:$0xff]   ;;  %v4211_v22 = vrot.slane %v10181_v23, %v9373_v60  ;;  %v8728_v60 = vld [vmem:[%s10674_s13 + $0x730] sm:$0xff]  }
0x1074   : > { %7967 = vmatpush3.bf16.msra.mxu0 %v8684_v43  ;;  %v8725_v43 = vld [vmem:[%s10674_s13 + $0x7a8] sm:$0xff]   ;;  %v4684_v23 = vadd.f32 %v10197_v29, %v4211_v22  ;;  %v8732_v29 = vld [vmem:[%s10674_s13 + $0x738] sm:$0xff]  }
0x1075   : > { %7989 = vmatpush3.bf16.msra.mxu1 %v8685_v14  ;;  %7968 = vmatprep.subr.bf16.mxu0 %v8686_v24  ;;  %v8726_v14 = vld [vmem:[%s10674_s13 + $0x770] sm:$0xff]  }
0x1076   : > { %7990 = vmatprep.subr.bf16.mxu1 %v8687_v27  ;;  %v8727_v24 = vld [vmem:[%s10674_s13 + $0x7f0] sm:$0xff]  }
0x1077   : > { %v8729_v27 = vld [vmem:[%s10674_s13 + $0x7b0] sm:$0xff]  }
0x1078   : > { %7969 = vmatpush3.bf16.msra.mxu0 %v8688_v28  ;;  %v8730_v28 = vld [vmem:[%s10674_s13 + $0x778] sm:$0xff]  }
0x1079   : > { %7991 = vmatpush3.bf16.msra.mxu1 %v8689_v30  ;;  %7970 = vmatprep.subr.bf16.mxu0 %v8690_v33  ;;  %v8731_v30 = vld [vmem:[%s10674_s13 + $0x7f8] sm:$0xff]   ;;  %v4743_v33 = vmax.f32 %v4684_v23, 0.0 }
0x107a   : > { %7992 = vmatprep.subr.bf16.mxu1 %v8691_v34  ;;  %v8733_v34 = vld [vmem:[%s10674_s13 + $0x7b8] sm:$0xff]  }
0x107b   : > { %v4759_v36 = vpack.c.bf16 %v4743_v33, %v4743_v33  ;;  %v6150_v33 = vld [vmem:[%s10678_s17 + $0x8] sm:$0xff] }
0x107c   : > { %7971 = vmatpush3.bf16.msra.mxu0 %v8692_v19  ;;  %v4745_v19 = vmax.f32 %v10199_v31, 0.0 }
0x107d   : > { %7993 = vmatpush3.bf16.msra.mxu1 %v8693_v37  ;;  %7972 = vmatprep.subr.bf16.mxu0 %v8694_v56 }
0x107e   : > { %7994 = vmatprep.subr.bf16.mxu1 %v8695_v38  ;;  %v4761_v37 = vpack.c.bf16 %v4745_v19, %v4745_v19  ;;  %v7464_v38 = vld [vmem:[%s10675_s14 + $0x1] ss:$0 sm:$0xff]  ;;  %v6151_v19 = vld [vmem:[%s10678_s17 + $0x10] sm:$0xff] }
0x1080   : > { %7973 = vmatpush3.bf16.msra.mxu0 %v8696_v35 }
0x1081   : > { %7995 = vmatpush3.bf16.msra.mxu1 %v8697_v26  ;;  %7974 = vmatprep.subr.bf16.mxu0 %v8698_v2 }
0x1082   : > { %7996 = vmatprep.subr.bf16.mxu1 %v8699_v63 }
0x1084   : > { %7975 = vmatpush3.bf16.msra.mxu0 %v8700_v7 }
0x1085   : > { %7997 = vmatpush3.bf16.msra.mxu1 %v8701_v47  ;;  %8004 = vmatprep.subr.bf16.mxu0 %v8702_v52 }
0x1086   : > { %8026 = vmatprep.subr.bf16.mxu1 %v8703_v32 }
0x1087   : > { %5989 = vmatmul.mubr.bf16.vlgmr.msra.gmra.mrb[100].mxu0 %v4755_v25 }
0x1088   : > { %6029 = vmatmul.mubr.bf16.vlgmr.msra.gmra.mrb[108].mxu1 %v4757_v45  ;;  %8005 = vmatpush3.bf16.msra.mxu0 %v8704_v11 }
0x1089   : > { %6068 = vmatprep.mubr.bf16.mxu0 %v4760_v54  ;;  %8027 = vmatpush3.bf16.msra.mxu1 %v8705_v39 }
0x108a   : > { %6108 = vmatprep.mubr.bf16.mxu1 %v4762_v59  ;;  %8006 = vmatprep.subr.bf16.mxu0 %v8706_v53 }
0x108b   : > { %8028 = vmatprep.subr.bf16.mxu1 %v8707_v58 }
0x108c   : > { %8007 = vmatpush3.bf16.msra.mxu0 %v8708_v9 }
0x108d   : > { %8029 = vmatpush3.bf16.msra.mxu1 %v8709_v61  ;;  %8008 = vmatprep.subr.bf16.mxu0 %v8710_v62 }
0x108e   : > { %8030 = vmatprep.subr.bf16.mxu1 %v8711_v0 }
0x1090   : > { %8009 = vmatpush3.bf16.msra.mxu0 %v8712_v41 }
0x1091   : > { %8031 = vmatpush3.bf16.msra.mxu1 %v8713_v3  ;;  %8010 = vmatprep.subr.bf16.mxu0 %v8714_v4 }
0x1092   : > { %8032 = vmatprep.subr.bf16.mxu1 %v8715_v5 }
0x1094   : > { %8011 = vmatpush3.bf16.msra.mxu0 %v8716_v55 }
0x1095   : > { %8033 = vmatpush3.bf16.msra.mxu1 %v8717_v8  ;;  %8012 = vmatprep.subr.bf16.mxu0 %v8718_v10 }
0x1096   : > { %8034 = vmatprep.subr.bf16.mxu1 %v8719_v12 }
0x1098   : > { %8013 = vmatpush3.bf16.msra.mxu0 %v8720_v13 }
0x1099   : > { %8035 = vmatpush3.bf16.msra.mxu1 %v8721_v15  ;;  %8014 = vmatprep.subr.bf16.mxu0 %v8722_v17 }
0x109a   : > { %8036 = vmatprep.subr.bf16.mxu1 %v8723_v18 }
0x109c   : > { %8015 = vmatpush3.bf16.msra.mxu0 %v8724_v21 }
0x109d   : > { %8037 = vmatpush3.bf16.msra.mxu1 %v8725_v43  ;;  %8016 = vmatprep.subr.bf16.mxu0 %v8726_v14 }
0x109e   : > { %8038 = vmatprep.subr.bf16.mxu1 %v8727_v24 }
0x10a0   : > { %8017 = vmatpush3.bf16.msra.mxu0 %v8728_v60 }
0x10a1   : > { %8039 = vmatpush3.bf16.msra.mxu1 %v8729_v27  ;;  %8018 = vmatprep.subr.bf16.mxu0 %v8730_v28 }
0x10a2   : > { %8040 = vmatprep.subr.bf16.mxu1 %v8731_v30 }
0x10a4   : > { %8019 = vmatpush3.bf16.msra.mxu0 %v8732_v29  ;;  %v6149_v29 = vld [vmem:[%s10678_s17] sm:$0xff] }
0x10a5   : > { %8041 = vmatpush3.bf16.msra.mxu1 %v8733_v34  ;;  %v8345_v34 = vpack.c.bf16 %v6150_v33, %v6149_v29 }
0x10a7   : > { %6069 = vmatmul.mubr.bf16.vlgmr.msra.gmra.mrb[104].mxu0 %v4759_v36  ;;  %v6152_v36 = vld [vmem:[%s10678_s17 + $0x18] sm:$0xff] }
0x10a8   : > { %6109 = vmatmul.mubr.bf16.vlgmr.msra.gmra.mrb[112].mxu1 %v4761_v37  ;;  %8264 = vmatprep.mubr.msk.f32.mxu0 %vm8824_vm0, %v8823_v1  ;;  %v8348_v37 = vpack.c.bf16 %v6152_v36, %v6151_v19 }
0x111a   : > { %v7888_v56 = vpop.f32.mrb[92].mxu0  ;;  %v7910_v16 = vpop.f32.mrb[100].mxu1 }
0x111b   : > { %v7889_v48 = vpop.f32.mrb[93].mxu0  ;;  %v7911_v20 = vpop.f32.mrb[101].mxu1 }
0x111c   : > { %v7890_v35 = vadd.f32 %v7889_v48, %v7888_v56  ;;  %v7912_v31 = vadd.f32 %v7911_v20, %v7910_v16  ;;  %v7891_v40 = vpop.f32.mrb[94].mxu0  ;;  %v7913_v26 = vpop.f32.mrb[102].mxu1  ;;  %v7595_v20 = vld [vmem:[%s10676_s15 + $0x1] ss:$0 sm:$0xff] }
0x111d   : > { %v7892_v2 = vpop.f32.mrb[95].mxu0  ;;  %v7914_v42 = vpop.f32.mrb[103].mxu1  ;;  %v7599_v40 = vld [vmem:[%s10678_s17 + $0x28] sm:$0xff]  ;;  %v7596_v26 = vld [vmem:[%s10677_s16 + $0x1] ss:$0 sm:$0xff] }
0x111e   : > { %v5831_v63 = vadd.f32 %v7890_v35, %v7464_v38 }
0x1120   : > { %v5871_v57 = vadd.f32 %v7912_v31, %v5831_v63  ;;  %v7598_v31 = vld [vmem:[%s10678_s17 + $0x20] sm:$0xff] }
0x1121   : > { %v8351_v42 = vpack.c.bf16 %v7599_v40, %v7598_v31 }
0x113a   : > { %v7932_v6 = vpop.f32.mrb[96].mxu0  ;;  %v7954_v7 = vpop.f32.mrb[104].mxu1 }
0x113b   : > { %v7933_v46 = vpop.f32.mrb[97].mxu0  ;;  %v7955_v47 = vpop.f32.mrb[105].mxu1 }
0x113c   : > { %v7934_v52 = vadd.f32 %v7933_v46, %v7932_v6  ;;  %v7956_v50 = vadd.f32 %v7955_v47, %v7954_v7  ;;  %v7935_v32 = vpop.f32.mrb[98].mxu0  ;;  %v7957_v49 = vpop.f32.mrb[106].mxu1  ;;  %v7601_v6 = vld [vmem:[%s10678_s17 + $0x38] sm:$0xff]  ;;  %v7603_v46 = vld [vmem:[%s10678_s17 + $0x40] sm:$0xff]  ;;  %v7604_v47 = vld [vmem:[%s10678_s17 + $0x48] sm:$0xff] }
0x113d   : > { %v7936_v51 = vpop.f32.mrb[99].mxu0  ;;  %v7958_v11 = vpop.f32.mrb[107].mxu1  ;;  %v7605_v32 = vld [vmem:[%s10678_s17 + $0x50] sm:$0xff]  ;;  %v7606_v49 = vld [vmem:[%s10678_s17 + $0x58] sm:$0xff] }
0x113e   : > { %v5911_v25 = vadd.f32 %v7934_v52, %v5871_v57  ;;  %v7600_v57 = vld [vmem:[%s10678_s17 + $0x30] sm:$0xff]  ;;  %v8357_v52 = vpack.c.bf16 %v7604_v47, %v7603_v46  ;;  %v8360_v51 = vpack.c.bf16 %v7606_v49, %v7605_v32  ;;  %v7608_v11 = vld [vmem:[%s10678_s17 + $0x60] sm:$0xff] }
0x113f   : > { %v8354_v7 = vpack.c.bf16 %v7601_v6, %v7600_v57 }
0x1140   : > { %v5951_v39 = vadd.f32 %v7956_v50, %v5911_v25  ;;  %v7609_v25 = vld [vmem:[%s10678_s17 + $0x68] sm:$0xff] }
0x115a   : > { %v7976_v45 = vpop.f32.mrb[100].mxu0 }
0x115b   : > { %v7998_v53 = vpop.f32.mrb[108].mxu1  ;;  %v7977_v54 = vpop.f32.mrb[101].mxu0 }
0x115c   : > { %v7978_v58 = vadd.f32 %v7977_v54, %v7976_v45  ;;  %v7999_v59 = vpop.f32.mrb[109].mxu1  ;;  %v7979_v9 = vpop.f32.mrb[102].mxu0  ;;  %v7611_v54 = vld [vmem:[%s10678_s17 + $0x78] sm:$0xff] }
0x115d   : > { %v8000_v61 = vadd.f32 %v7999_v59, %v7998_v53  ;;  %v8001_v62 = vpop.f32.mrb[110].mxu1  ;;  %v7980_v0 = vpop.f32.mrb[103].mxu0  ;;  %v7610_v53 = vld [vmem:[%s10678_s17 + $0x70] sm:$0xff]  ;;  %v7613_v59 = vld [vmem:[%s10678_s17 + $0x80] sm:$0xff]  ;;  %v7614_v9 = vld [vmem:[%s10678_s17 + $0x88] sm:$0xff] }
0x115e   : > { %v5991_v41 = vadd.f32 %v7978_v58, %v5951_v39  ;;  %v8002_v3 = vpop.f32.mrb[111].mxu1  ;;  %v8363_v39 = vpack.c.bf16 %v7609_v25, %v7608_v11  ;;  %v8366_v58 = vpack.c.bf16 %v7611_v54, %v7610_v53  ;;  %v7615_v0 = vld [vmem:[%s10678_s17 + $0x90] sm:$0xff] }
0x1160   : > { %v6031_v4 = vadd.f32 %v8000_v61, %v5991_v41  ;;  %v8369_v61 = vpack.c.bf16 %v7614_v9, %v7613_v59  ;;  %v7616_v41 = vld [vmem:[%s10678_s17 + $0x98] sm:$0xff] }
0x1161   : > { %v8372_v3 = vpack.c.bf16 %v7616_v41, %v7615_v0 }
0x117a   : > { %v8020_v5 = vpop.f32.mrb[104].mxu0 }
0x117b   : > { %v8042_v55 = vpop.f32.mrb[112].mxu1  ;;  %v8021_v8 = vpop.f32.mrb[105].mxu0 }
0x117c   : > { %v8022_v10 = vadd.f32 %v8021_v8, %v8020_v5  ;;  %v8043_v12 = vpop.f32.mrb[113].mxu1  ;;  %v8023_v13 = vpop.f32.mrb[106].mxu0  ;;  %v7619_v5 = vld [vmem:[%s10678_s17 + $0xa8] sm:$0xff] }
0x117d   : > { %v8044_v15 = vadd.f32 %v8043_v12, %v8042_v55  ;;  %v8045_v17 = vpop.f32.mrb[114].mxu1  ;;  %v8024_v18 = vpop.f32.mrb[107].mxu0  ;;  %v7621_v12 = vld [vmem:[%s10678_s17 + $0xb8] sm:$0xff] }
0x117e   : > { %v6071_v21 = vadd.f32 %v8022_v10, %v6031_v4  ;;  %v8046_v22 = vpop.f32.mrb[115].mxu1  ;;  %v7618_v4 = vld [vmem:[%s10678_s17 + $0xa0] sm:$0xff]  ;;  %v7620_v10 = vld [vmem:[%s10678_s17 + $0xb0] sm:$0xff]  ;;  %v7624_v17 = vld [vmem:[%s10678_s17 + $0xc8] sm:$0xff] }
0x117f   : > { %v8375_v55 = vpack.c.bf16 %v7619_v5, %v7618_v4  ;;  %v8378_v13 = vpack.c.bf16 %v7621_v12, %v7620_v10  ;;  %v7625_v22 = vld [vmem:[%s10678_s17 + $0xd0] sm:$0xff] }
0x1180   : > { %v6111_v43 = vadd.f32 %v8044_v15, %v6071_v21  ;;  %v7623_v15 = vld [vmem:[%s10678_s17 + $0xc0] sm:$0xff] }
0x1181   : > { %v8381_v18 = vpack.c.bf16 %v7624_v17, %v7623_v15 }
0x1182   : > { %v6116_v14 = vadd.f32 %v6111_v43, %v9927_v44  ;;  %v8826_v44 = vmov 0.0|0.0   ;;  %v7626_v43 = vld [vmem:[%s10678_s17 + $0xd8] sm:$0xff] }
0x1183   : > { %8344 = vmatprep.subr.bf16.mxu0 %v8826_v44 }
0x1184   : > { %v6121_v24 = vsel %vm634_vm1, %v6116_v14, 0.0  ;;  %8346 = vmatpush3.bf16.msra.mxu0 %v8345_v34  ;;  %v6148_v34 = vld [vmem:[%s10679_s18] sm:$0x1] }
0x1185   : > { %6122 = vadd.xlane.f32.xlu0 %v6121_v24  ;;  %8347 = vmatprep.subr.bf16.mxu0 %v8826_v44  ;;  %v7628_v24 = vld [vmem:[%s10678_s17 + $0xe0] sm:$0xff] }
0x1188   : > { %8349 = vmatpush3.bf16.msra.mxu0 %v8348_v37 }
0x1189   : > { %8350 = vmatprep.subr.bf16.mxu0 %v8826_v44 }
0x1212   : > { %v6123_v60 = vpop.xlane.xlu0 %6122 }
0x1213   : > { %v6124_v23 = vmul.f32 0.03125, %v6123_v60  ;;  %v7629_v60 = vld [vmem:[%s10678_s17 + $0xe8] sm:$0xff] }
0x1215   : > { %v6125_v27 = vsub.f32 %v6116_v14, %v6124_v23  ;;  %v8384_v14 = vpack.c.bf16 %v7626_v43, %v7625_v22  ;;  %v8387_v23 = vpack.c.bf16 %v7629_v60, %v7628_v24 }
0x1217   : > { %v6126_v28 = vmul.f32 %v6125_v27, %v6125_v27 }
0x1219   : > { %v6127_v30 = vsel %vm634_vm1, %v6126_v28, 0.0  ;;  %v7630_v28 = vld [vmem:[%s10678_s17 + $0xf0] sm:$0xff] }
0x121a   : > { %6128 = vadd.xlane.f32.xlu1 %v6127_v30  ;;  %v7631_v30 = vld [vmem:[%s10678_s17 + $0xf8] sm:$0xff] }
0x121b   : > { %v8390_v29 = vpack.c.bf16 %v7631_v30, %v7630_v28 }
0x12a7   : > { %v6129_v56 = vpop.xlane.xlu1 %6128 }
0x12a8   : > { %v6130_v16 = vmul.f32 0.03125, %v6129_v56 }
0x12aa   : > { %v6131_v38 = vadd.f32 1e-05, %v6130_v16 }
0x12ac   : > { %8756 = vrsqrt.f32 %v6131_v38 }
0x12b6   : > { %v8757_v48 = vpop.eup %8756 }
0x12b7   : > { %v6133_v35 = vmul.f32 %v8757_v48, %v6125_v27 }
0x12b9   : > { %v6140_v2 = vmul.f32 %v7595_v20, %v6133_v35 }
0x12bb   : > { %v10488_v63 = vadd.f32 %v7596_v26, %v6140_v2 }
0x12bd   : > { %8265 = vmatmul.mubr.msk.f32.vlgmr.msra.gmra.mrb[108].mxu0 %vm634_vm1, %v10488_v63  ;;  %v6232_v50 = vrot.slane %v10488_v63, 1  ;;  %v6311_v45 = vrot.slane %v10488_v63, 2  ;;  %v6390_v62 = vrot.slane %v10488_v63, 3  ;;  %v6469_v8 = vrot.slane %v10488_v63, 4 }
0x12be   : > { %8352 = vmatpush3.bf16.msra.mxu0 %v8351_v42  ;;  %8275 = vmatprep.mubr.msk.f32.mxu0 %vm8824_vm0, %v8823_v1  ;;  %v6548_v21 = vrot.slane %v10488_v63, 5  ;;  %v6627_v27 = vrot.slane %v10488_v63, 6  ;;  %v6706_v33 = vrot.slane %v10488_v63, 7 }
0x12bf   : > { %8353 = vmatprep.subr.bf16.mxu0 %v8826_v44 }
0x12c2   : > { %8355 = vmatpush3.bf16.msra.mxu0 %v8354_v7 }
0x12c3   : > { %8356 = vmatprep.subr.bf16.mxu0 %v8826_v44 }
0x12c5   : > { %8276 = vmatmul.mubr.msk.f32.vlgmr.msra.gmra.mrb[108].mxu0 %vm634_vm1, %v6232_v50 }
0x12c6   : > { %8358 = vmatpush3.bf16.msra.mxu0 %v8357_v52  ;;  %8286 = vmatprep.mubr.msk.f32.mxu0 %vm8824_vm0, %v8823_v1 }
0x12c7   : > { %8359 = vmatprep.subr.bf16.mxu0 %v8826_v44 }
0x12ca   : > { %8361 = vmatpush3.bf16.msra.mxu0 %v8360_v51 }
0x12cb   : > { %8362 = vmatprep.subr.bf16.mxu0 %v8826_v44 }
0x12cd   : > { %8287 = vmatmul.mubr.msk.f32.vlgmr.msra.gmra.mrb[108].mxu0 %vm634_vm1, %v6311_v45 }
0x12ce   : > { %8364 = vmatpush3.bf16.msra.mxu0 %v8363_v39  ;;  %8297 = vmatprep.mubr.msk.f32.mxu0 %vm8824_vm0, %v8823_v1 }
0x12cf   : > { %8365 = vmatprep.subr.bf16.mxu0 %v8826_v44 }
0x12d2   : > { %8367 = vmatpush3.bf16.msra.mxu0 %v8366_v58 }
0x12d3   : > { %8368 = vmatprep.subr.bf16.mxu0 %v8826_v44 }
0x12d5   : > { %8298 = vmatmul.mubr.msk.f32.vlgmr.msra.gmra.mrb[108].mxu0 %vm634_vm1, %v6390_v62 }
0x12d6   : > { %8370 = vmatpush3.bf16.msra.mxu0 %v8369_v61  ;;  %8308 = vmatprep.mubr.msk.f32.mxu0 %vm8824_vm0, %v8823_v1 }
0x12d7   : > { %8371 = vmatprep.subr.bf16.mxu0 %v8826_v44 }
0x12da   : > { %8373 = vmatpush3.bf16.msra.mxu0 %v8372_v3 }
0x12db   : > { %8374 = vmatprep.subr.bf16.mxu0 %v8826_v44 }
0x12dd   : > { %8309 = vmatmul.mubr.msk.f32.vlgmr.msra.gmra.mrb[108].mxu0 %vm634_vm1, %v6469_v8 }
0x12de   : > { %8376 = vmatpush3.bf16.msra.mxu0 %v8375_v55  ;;  %8319 = vmatprep.mubr.msk.f32.mxu0 %vm8824_vm0, %v8823_v1 }
0x12df   : > { %8377 = vmatprep.subr.bf16.mxu0 %v8826_v44 }
0x12e2   : > { %8379 = vmatpush3.bf16.msra.mxu0 %v8378_v13 }
0x12e3   : > { %8380 = vmatprep.subr.bf16.mxu0 %v8826_v44 }
0x12e5   : > { %8320 = vmatmul.mubr.msk.f32.vlgmr.msra.gmra.mrb[108].mxu0 %vm634_vm1, %v6548_v21 }
0x12e6   : > { %8382 = vmatpush3.bf16.msra.mxu0 %v8381_v18  ;;  %8330 = vmatprep.mubr.msk.f32.mxu0 %vm8824_vm0, %v8823_v1 }
0x12e7   : > { %8383 = vmatprep.subr.bf16.mxu0 %v8826_v44 }
0x12ea   : > { %8385 = vmatpush3.bf16.msra.mxu0 %v8384_v14 }
0x12eb   : > { %8386 = vmatprep.subr.bf16.mxu0 %v8826_v44 }
0x12ed   : > { %8331 = vmatmul.mubr.msk.f32.vlgmr.msra.gmra.mrb[108].mxu0 %vm634_vm1, %v6627_v27 }
0x12ee   : > { %8388 = vmatpush3.bf16.msra.mxu0 %v8387_v23  ;;  %8341 = vmatprep.mubr.msk.f32.mxu0 %vm8824_vm0, %v8823_v1 }
0x12ef   : > { %8389 = vmatprep.subr.bf16.mxu0 %v8826_v44 }
0x12f2   : > { %8391 = vmatpush3.bf16.msra.mxu0 %v8390_v29 }
0x12f5   : > { %8342 = vmatmul.mubr.msk.f32.vlgmr.msra.gmra.mrb[108].mxu0 %vm634_vm1, %v6706_v33 }
0x13c8   : > { %v6775_v19 = vpop.f32.mrb[108].mxu0 }
0x13c9   : > { %v8392_v36 = vadd.f32 %v6775_v19, %v6148_v34  ;;  %v8343_v1 = vpop.f32.mrb[109].mxu0 }
0x13cb   : > { %6781 = vst.msk [vmem:[%s592_s26] sm:$0x1] %vm6780_vm5, %v8392_v36 }
0x13cc   : > { %8772 = shalt.err (!%p8769_p3)
}
0x13cd   : > { %s8773_s20 = scalar_lea.hbm %s10619_s23, 16  ;;  %s8777_s19 = scalar_lea.hbm %s10712_s2, 32 }
0x13ce   : > { %p8774_p4 = scmp.ne.s32.totalorder %s10619_s23, %s8773_s20  ;;  %p8778_p9 = scmp.lt.u32.totalorder %s10619_s23, %s10712_s2 }
0x13cf   : > { %p8779_p10 = scmp.lt.u32.totalorder %s8777_s19, %s8773_s20  ;;  %p8781_p12 = scmp.lt.u32.totalorder %s8773_s20, %s10619_s23 }
0x13d0   : > { %p8775_p7 = pnand %p8774_p4, %p8966_p5 }
0x13d1   : > { %p8780_p11 = por %p8779_p10, %p8778_p9 }
0x13d2   : > { %p8776_p8 = pneg %p8775_p7 }
0x13d3   : > { %p8782_p13 = por %p8781_p12, %p8780_p11 }
0x13d5   : > { %p8783_p0 = pnand %p8782_p13, %p8776_p8 }
0x13d7   : > { %8786 = shalt.err (!%p8783_p0)
}
0x13d8   : > { %8407 = dma.vmem_to_hbm [thread:$0]  (%p8966_p5), %s10621_s24, 16, %s10619_s23, %s6783_s25  }
0x13d9 PF: > { %s10713_s5 = sld [smem:[#allocation7_spill]]  ;;  %s10714_s0 = sld [smem:[#allocation5_spill]] }
0x13df   : > { %p8413_p1 = scmp.ge.s32.totalorder %s10713_s5, 2  ;;  %s6807_s21 = sand.u32 1, %s10714_s0  }
0x13e0   : > { %s6808_s26 = scalar_lea.sflag [#allocation3], %s6807_s21 }
0x13e1   : > { %p8410_p2 = pnand %p8413_p1, %p8970_p6 }
0x13e3   : > { %8804 = dma.done.wait (!%p8410_p2), %s6808_s26, 16  }
0x13e4   : > { %8806 = vsyncadd (!%p8410_p2), %s6808_s26, 4294967280  ;;  %s10716_s21 = sld [smem:[#allocation8_spill]]  ;;  %s10717_s20 = sld [smem:[#allocation6_spill]] }
0x13e5   : > { %s10718_s19 = sld [smem:[#allocation9_spill]]  ;;  %s10719_s0 = smov %s8813_s30 }
0x13ea   : > { %p29_p3 = scmp.ge.s32.totalorder %s10716_s21, 4   ;;  %s10720_s30 = smov %s10717_s20 }
0x13eb   : > { %s10721_s20 = smov %s10718_s19 }
0x13ec   :  { %31 = sbr.rel (!%p29_p3) target bundleno = 11 (0xb), region = 154 }
0x13f3   :  { %6812 = vsyncpa [#allocation3], 1 }
0x13f4   :  { %6814 = vsyncpa [#allocation3 + $0x1], 1 }

</bundles_post_ra>
